<compile_context>
chip_gen: v6e
topology: v6e:2x2x1
jax: 0.10.0
libtpu: 0.0.40
codegen_flags: <defaults>
</compile_context>

<pallas_src>
import math

import jax
import jax.numpy as jnp
from jax import lax
from jax.experimental import pallas as pl
from jax.experimental.pallas import tpu as pltpu

# ----------------------- model hyper-parameters ("args") --------------------
NUM_WORDS_TITLE = 8                  # args.num_words_title
WORD_EMBEDDING_DIM = 64              # args.word_embedding_dim (BERT hidden)
NUM_ATTENTION_HEADS = 4              # args.num_attention_heads
D_K = 20
D_V = 20
D_PAD = 32                           # per-head dim padded to 32 lanes
MHA_DIM = NUM_ATTENTION_HEADS * D_V  # 80 (true un-padded concat width)
MHA_PAD = NUM_ATTENTION_HEADS * D_PAD  # 128
NEWS_QUERY_VECTOR_DIM = 32           # args.news_query_vector_dim
NEWS_DIM = 16                        # args.news_dim
NEWS_DIM_PAD = 128                   # lane-dense output slab
USER_QUERY_VECTOR_DIM = 32           # args.user_query_vector_dim
NPRATIO = 1                          # args.npratio  -> 1 + K = 2 candidates
USER_LOG_LENGTH = 4                  # args.user_log_length
VOCAB_SIZE = 128
TYPE_VOCAB = 2
# args.news_attributes = ['title'], args.user_log_mask = False,
# args.use_padded_news_embedding = False, dropout is a no-op (eval mode).


def _round_up(x, m):
    return (x + m - 1) // m * m


def _pick_block_items(n_items):
    """Items per grid step.  Small inputs -> one big step (grid steps are a
    serial loop on 1-TC chips); large inputs -> few balanced aligned steps."""
    n8 = _round_up(max(n_items, 1), 8)
    if n8 <= 512:
        return n8
    steps = -(-n8 // 512)
    return _round_up(-(-n_items // steps), 8)


# ------------------------------- kernels ------------------------------------
def news_kernel(ids_ref, wtab_ref, ttab_ref,
                wq_ref, bq_ref, wk_ref, bk_ref, wv_ref, bv_ref,
                a1w_ref, a1b_ref, a2w_ref, a2b_ref, rw_ref, rb_ref,
                out_ref, ctx_scr):
    """Block of R news items: embedding stub + MHA + AdditiveAttention + reduce."""
    RS = ids_ref.shape[0]                      # R * S token rows in this block
    S = NUM_WORDS_TITLE
    R = RS // S
    V = wtab_ref.shape[0]
    H = NUM_ATTENTION_HEADS
    HP = wq_ref.shape[1]                       # H * D_PAD = 128
    DP = HP // H                               # 32

    # ---- fused embedding lookup ----
    # TODO(synk): external pretrained BERT backbone (layer-8 hidden states) is
    # replaced by this deterministic word + token-type embedding stub.
    ids = ids_ref[...]                         # (RS, 2) int32 [word_id | type_id]
    wid = ids[:, 0:1]
    tid = ids[:, 1:2]
    oh_w = (wid == lax.broadcasted_iota(jnp.int32, (RS, V), 1)).astype(jnp.float32)
    x = jnp.dot(oh_w, wtab_ref[...], preferred_element_type=jnp.float32)  # (RS, D)
    # TYPE_VOCAB == 2 -> plain VPU select instead of a one-hot matmul.
    x = x + jnp.where(tid == 0, ttab_ref[0:1, :], ttab_ref[1:2, :])

    # ---- fused Q/K/V projections: three (RS, 64) x (64, 128) dots ----
    q = jnp.dot(x, wq_ref[...], preferred_element_type=jnp.float32) + bq_ref[...]
    k = jnp.dot(x, wk_ref[...], preferred_element_type=jnp.float32) + bk_ref[...]
    v = jnp.dot(x, wv_ref[...], preferred_element_type=jnp.float32) + bv_ref[...]
    q3 = q.reshape(R, S, HP)
    k3 = k.reshape(R, S, HP)
    v3 = v.reshape(R, S, HP)

    scale = 1.0 / math.sqrt(D_K)               # scale uses the true d_k = 20
    for h in range(H):                         # static unroll, 32-lane slices
        qh = q3[:, :, h * DP:(h + 1) * DP]
        kh = k3[:, :, h * DP:(h + 1) * DP]
        vh = v3[:, :, h * DP:(h + 1) * DP]
        s = jnp.einsum('rsk,rtk->rst', qh, kh,
                       preferred_element_type=jnp.float32) * scale
        e = jnp.exp(s)                         # exp-softmax (no max-sub), as torch
        attn = e * pl.reciprocal(jnp.sum(e, axis=-1, keepdims=True) + 1e-8,
                                 approx=True)
        ctx = jnp.einsum('rst,rtv->rsv', attn, vh,
                         preferred_element_type=jnp.float32)        # (R, S, DP)
        ctx_scr[:, h * DP:(h + 1) * DP] = ctx.reshape(RS, DP)

    # ---- additive attention pooling + reduce_dim, fused across heads ----
    ctx_all = ctx_scr[...]                     # (RS, 128), pad lanes are zero
    t = jnp.tanh(jnp.dot(ctx_all, a1w_ref[...],
                         preferred_element_type=jnp.float32) + a1b_ref[...])
    logit = jnp.sum(t * a2w_ref[...], axis=-1, keepdims=True) + a2b_ref[0, 0]
    ae = jnp.exp(logit).reshape(R, S, 1)
    alpha = ae * pl.reciprocal(jnp.sum(ae, axis=1, keepdims=True) + 1e-8,
                               approx=True)                          # (R, S, 1)
    pooled = jnp.sum(ctx_all.reshape(R, S, HP) * alpha, axis=1)      # (R, 128)
    out_ref[...] = (jnp.dot(pooled, rw_ref[...],
                            preferred_element_type=jnp.float32) + rb_ref[...])


def user_kernel(log_ref, cand_ref, u1w_ref, u1b_ref, u2w_ref, u2b_ref, out_ref):
    """Fully batched user AdditiveAttention + candidate dot, single store."""
    B, L, nd = log_ref.shape
    log_v = log_ref[...]                                             # (B, L, nd)
    t = jnp.tanh(jnp.dot(log_v.reshape(B * L, nd), u1w_ref[...],
                         preferred_element_type=jnp.float32) + u1b_ref[...])
    logit = jnp.sum(t * u2w_ref[...], axis=-1, keepdims=True) + u2b_ref[0, 0]
    a = jnp.exp(logit).reshape(B, L, 1)
    a = a * pl.reciprocal(jnp.sum(a, axis=1, keepdims=True) + 1e-8, approx=True)
    user = jnp.sum(log_v * a, axis=1)                                # (B, nd)
    out_ref[...] = jnp.sum(user[:, None, :] * cand_ref[...], axis=-1)  # (B, C)


# ----------------------------- pallas wrappers ------------------------------
def news_encoder_pallas(params, word_ids, type_ids):
    """word_ids/type_ids: (N, S) int32 -> (N, NEWS_DIM) float32."""
    N, S = word_ids.shape
    D = WORD_EMBEDDING_DIM
    H, DP = NUM_ATTENTION_HEADS, D_PAD
    QV, ND, NDP = NEWS_QUERY_VECTOR_DIM, NEWS_DIM, NEWS_DIM_PAD

    R = _pick_block_items(N)
    n_pad = _round_up(N, R)
    pad = n_pad - N
    ids = jnp.stack([word_ids, type_ids], axis=-1).astype(jnp.int32)  # (N, S, 2)
    ids = jnp.pad(ids, ((0, pad), (0, 0), (0, 0))).reshape(n_pad * S, 2)

    def pad_heads_cols(w, b):
        # (D, H*d), (1, H*d) -> (D, H*DP), (1, H*DP) with zero pad lanes
        d = w.shape[1] // H
        w3 = jnp.pad(w.reshape(D, H, d), ((0, 0), (0, 0), (0, DP - d)))
        b3 = jnp.pad(b.reshape(1, H, d), ((0, 0), (0, 0), (0, DP - d)))
        return w3.reshape(D, H * DP), b3.reshape(1, H * DP)

    def pad_heads_rows(w):
        # (H*d, F) -> (H*DP, F) with zero pad rows
        d = w.shape[0] // H
        return jnp.pad(w.reshape(H, d, -1),
                       ((0, 0), (0, DP - d), (0, 0))).reshape(H * DP, w.shape[1])

    wq, bq = pad_heads_cols(params['wq'], params['bq'])
    wk, bk = pad_heads_cols(params['wk'], params['bk'])
    wv, bv = pad_heads_cols(params['wv'], params['bv'])
    a1w = pad_heads_rows(params['att1_w'])                               # (128, QV)
    rw = jnp.pad(pad_heads_rows(params['red_w']),
                 ((0, 0), (0, NDP - ND)))                                # (128, 128)
    rb = jnp.pad(params['red_b'], ((0, 0), (0, NDP - ND)))               # (1, 128)
    a2w_row = params['att2_w'].reshape(1, QV)
    a2b = params['att2_b'].reshape(1, 1)

    rows = lambda i: (i, 0)
    full2 = lambda i: (0, 0)

    out = pl.pallas_call(
        news_kernel,
        grid=(n_pad // R,),
        in_specs=[
            pl.BlockSpec((R * S, 2), rows),                      # [word|type] ids
            pl.BlockSpec((VOCAB_SIZE, D), full2),                # word table
            pl.BlockSpec((TYPE_VOCAB, D), full2),                # type table
            pl.BlockSpec((D, H * DP), full2), pl.BlockSpec((1, H * DP), full2),
            pl.BlockSpec((D, H * DP), full2), pl.BlockSpec((1, H * DP), full2),
            pl.BlockSpec((D, H * DP), full2), pl.BlockSpec((1, H * DP), full2),
            pl.BlockSpec((H * DP, QV), full2),                   # att_fc1 w (padded)
            pl.BlockSpec((1, QV), full2),                        # att_fc1 b
            pl.BlockSpec((1, QV), full2),                        # att_fc2 w (row)
            pl.BlockSpec(memory_space=pltpu.MemorySpace.SMEM),   # att_fc2 b scalar
            pl.BlockSpec((H * DP, NDP), full2),                  # reduce_dim w (padded)
            pl.BlockSpec((1, NDP), full2),                       # reduce_dim b (padded)
        ],
        out_specs=pl.BlockSpec((R, NDP), rows),
        out_shape=jax.ShapeDtypeStruct((n_pad, NDP), jnp.float32),
        scratch_shapes=[pltpu.VMEM((R * S, H * DP), jnp.float32)],
        compiler_params=pltpu.CompilerParams(dimension_semantics=("parallel",)),
    )(ids, params['word_emb'], params['type_emb'],
      wq, bq, wk, bk, wv, bv,
      a1w, params['att1_b'], a2w_row, a2b, rw, rb)
    return out[:N, :ND]


def user_score_pallas(params, log_vec, news_vec):
    """log_vec: (B, L, news_dim), news_vec: (B, 1+K, news_dim) -> (B, 1+K)."""
    B, L, nd = log_vec.shape
    C = news_vec.shape[1]
    Q = USER_QUERY_VECTOR_DIM
    u2w_row = params['u2_w'].reshape(1, Q)
    u2b = params['u2_b'].reshape(1, 1)
    return pl.pallas_call(
        user_kernel,
        grid=(1,),
        in_specs=[
            pl.BlockSpec((B, L, nd), lambda i: (0, 0, 0)),
            pl.BlockSpec((B, C, nd), lambda i: (0, 0, 0)),
            pl.BlockSpec((nd, Q), lambda i: (0, 0)),
            pl.BlockSpec((1, Q), lambda i: (0, 0)),
            pl.BlockSpec((1, Q), lambda i: (0, 0)),
            pl.BlockSpec(memory_space=pltpu.MemorySpace.SMEM),
        ],
        out_specs=pl.BlockSpec((B, C), lambda i: (0, 0)),
        out_shape=jax.ShapeDtypeStruct((B, C), jnp.float32),
    )(log_vec, news_vec, params['u1_w'], params['u1_b'], u2w_row, u2b)


# ------------------------------- full forward --------------------------------
def model_bert_forward(params, input_ids, log_ids, log_mask):
    """ModelBert.forward with compute_loss=False -> score (B, 1+K)."""
    B, C, ids_len = input_ids.shape
    L = log_ids.shape[1]
    S = NUM_WORDS_TITLE

    # Single batched news-encoder call over candidate + clicked items.
    flat = jnp.concatenate([input_ids.reshape(-1, ids_len),
                            log_ids.reshape(-1, ids_len)], axis=0)       # (N, 3S)
    word_ids = flat[:, :S]
    type_ids = flat[:, S:2 * S]
    # attention-mask third flat[:, 2S:] only feeds the (stubbed) BERT backbone;
    # TextEncoder / MHA run with mask=None, so it is unused.
    all_vec = news_encoder_pallas(params, word_ids, type_ids)            # (N, nd)
    news_vec = all_vec[:B * C].reshape(B, C, NEWS_DIM)
    log_vec = all_vec[B * C:B * C + B * L].reshape(B, L, NEWS_DIM)
    # args.user_log_mask=False, use_padded_news_embedding=False -> log_mask unused.
    del log_mask
    return user_score_pallas(params, log_vec, news_vec)                  # (B, 1+K)


# ------------------------------ parameter init --------------------------------
def init_params(key):
    ks = jax.random.split(key, 10)

    def lin_w(k, fi, fo):
        return jax.random.normal(k, (fi, fo), jnp.float32) * (1.0 / math.sqrt(fi))

    def lin_b(d):
        return (0.01 * jnp.arange(d, dtype=jnp.float32)).reshape(1, d)

    return {
        'word_emb': jax.random.normal(ks[0], (VOCAB_SIZE, WORD_EMBEDDING_DIM),
                                      jnp.float32) * 0.02,
        'type_emb': jax.random.normal(ks[1], (TYPE_VOCAB, WORD_EMBEDDING_DIM),
                                      jnp.float32) * 0.02,
        'wq': lin_w(ks[2], WORD_EMBEDDING_DIM, MHA_DIM), 'bq': lin_b(MHA_DIM),
        'wk': lin_w(ks[3], WORD_EMBEDDING_DIM, MHA_DIM), 'bk': lin_b(MHA_DIM),
        'wv': lin_w(ks[4], WORD_EMBEDDING_DIM, MHA_DIM), 'bv': lin_b(MHA_DIM),
        'att1_w': lin_w(ks[5], MHA_DIM, NEWS_QUERY_VECTOR_DIM),
        'att1_b': lin_b(NEWS_QUERY_VECTOR_DIM),
        'att2_w': lin_w(ks[6], NEWS_QUERY_VECTOR_DIM, 1), 'att2_b': lin_b(1),
        'red_w': lin_w(ks[7], MHA_DIM, NEWS_DIM), 'red_b': lin_b(NEWS_DIM),
        'u1_w': lin_w(ks[8], NEWS_DIM, USER_QUERY_VECTOR_DIM),
        'u1_b': lin_b(USER_QUERY_VECTOR_DIM),
        'u2_w': lin_w(ks[9], USER_QUERY_VECTOR_DIM, 1), 'u2_b': lin_b(1),
    }


# ---------------------------------- main --------------------------------------
if __name__ == "__main__":
    key = jax.random.PRNGKey(0)
    pkey, ikey, lkey = jax.random.split(key, 3)
    params = init_params(pkey)

    B = 2
    ids_length = 3 * NUM_WORDS_TITLE

    def make_tokens(k, rows):
        ids = jax.random.randint(k, (rows, NUM_WORDS_TITLE), 1, VOCAB_SIZE,
                                 dtype=jnp.int32)
        ttype = jnp.zeros((rows, NUM_WORDS_TITLE), jnp.int32)
        attm = jnp.ones((rows, NUM_WORDS_TITLE), jnp.int32)
        return jnp.concatenate([ids, ttype, attm], axis=1)

    input_ids = make_tokens(ikey, B * (1 + NPRATIO)).reshape(
        B, 1 + NPRATIO, ids_length)
    log_ids = make_tokens(lkey, B * USER_LOG_LENGTH).reshape(
        B, USER_LOG_LENGTH, ids_length)
    log_mask = jnp.ones((B, USER_LOG_LENGTH), jnp.float32)

    score = jax.jit(model_bert_forward)(params, input_ids, log_ids, log_mask)
    jax.block_until_ready(score)
    assert score.shape == (B, 1 + NPRATIO)
    assert bool(jnp.all(jnp.isfinite(score)))
    print("KERNEL_OK")
</pallas_src>

<mosaic_0001>
module attributes {stable_mosaic.version = 11 : i64} {
  func.func @user_kernel(%arg0: i32, %arg1: memref<2x4x16xf32, #tpu.memory_space<vmem>>, %arg2: memref<2x2x16xf32, #tpu.memory_space<vmem>>, %arg3: memref<16x32xf32, #tpu.memory_space<vmem>>, %arg4: memref<1x32xf32, #tpu.memory_space<vmem>>, %arg5: memref<1x32xf32, #tpu.memory_space<vmem>>, %arg6: memref<1x1xf32, #tpu.memory_space<smem>>, %arg7: memref<2x2xf32, #tpu.memory_space<vmem>>) attributes {dimension_semantics = [#tpu.dimension_semantics<arbitrary>], iteration_bounds = array<i64: 1>, scalar_prefetch = 0 : i64, scratch_operands = 0 : i64, tpu.core_type = #tpu.core_type<tc>, window_params = [{pipeline_mode = #tpu.pipeline_mode<synchronous>, transform_indices = @transform_0, window_bounds = array<i64: 2, 4, 16>}, {pipeline_mode = #tpu.pipeline_mode<synchronous>, transform_indices = @transform_1, window_bounds = array<i64: 2, 2, 16>}, {pipeline_mode = #tpu.pipeline_mode<synchronous>, transform_indices = @transform_2, window_bounds = array<i64: 16, 32>}, {pipeline_mode = #tpu.pipeline_mode<synchronous>, transform_indices = @transform_3, window_bounds = array<i64: 1, 32>}, {pipeline_mode = #tpu.pipeline_mode<synchronous>, transform_indices = @transform_4, window_bounds = array<i64: 1, 32>}, {transform_indices = @transform_5, window_bounds = array<i64: 1, 1>}, {pipeline_mode = #tpu.pipeline_mode<synchronous>, transform_indices = @transform_6, window_bounds = array<i64: 2, 2>}]} {
    %c0 = arith.constant 0 : index
    %c0_0 = arith.constant 0 : index
    %c0_1 = arith.constant 0 : index
    %0 = vector.load %arg1[%c0, %c0_0, %c0_1] : memref<2x4x16xf32, #tpu.memory_space<vmem>>, vector<2x4x16xf32>
    %1 = vector.shape_cast %0 : vector<2x4x16xf32> to vector<8x16xf32>
    %c0_2 = arith.constant 0 : index
    %c0_3 = arith.constant 0 : index
    %2 = vector.load %arg3[%c0_2, %c0_3] : memref<16x32xf32, #tpu.memory_space<vmem>>, vector<16x32xf32>
    %cst = arith.constant dense<0.000000e+00> : vector<8x32xf32>
    %3 = tpu.matmul %1, %2, %cst {dimension_numbers = #tpu.dot_dimension_numbers<[1], [0], [0], [1], [0, 0, 1, 1], [], []>} : vector<8x16xf32>, vector<16x32xf32>, vector<8x32xf32> -> vector<8x32xf32>
    %c0_4 = arith.constant 0 : index
    %c0_5 = arith.constant 0 : index
    %4 = vector.load %arg4[%c0_4, %c0_5] : memref<1x32xf32, #tpu.memory_space<vmem>>, vector<1x32xf32>
    %5 = vector.broadcast %4 : vector<1x32xf32> to vector<8x32xf32>
    %6 = arith.addf %3, %5 : vector<8x32xf32>
    %7 = math.tanh %6 : vector<8x32xf32>
    %c0_6 = arith.constant 0 : index
    %c0_7 = arith.constant 0 : index
    %8 = vector.load %arg5[%c0_6, %c0_7] : memref<1x32xf32, #tpu.memory_space<vmem>>, vector<1x32xf32>
    %9 = vector.broadcast %8 : vector<1x32xf32> to vector<8x32xf32>
    %10 = arith.mulf %7, %9 : vector<8x32xf32>
    %cst_8 = arith.constant dense<0.000000e+00> : vector<8xf32>
    %11 = vector.multi_reduction <add>, %10, %cst_8 [1] : vector<8x32xf32> to vector<8xf32>
    %12 = vector.shape_cast %11 : vector<8xf32> to vector<8x1xf32>
    %c0_9 = arith.constant 0 : index
    %c0_10 = arith.constant 0 : index
    %13 = memref.load %arg6[%c0_9, %c0_10] : memref<1x1xf32, #tpu.memory_space<smem>>
    %14 = vector.broadcast %13 : f32 to vector<8x1xf32>
    %15 = arith.addf %12, %14 : vector<8x1xf32>
    %16 = math.exp %15 : vector<8x1xf32>
    %17 = vector.shape_cast %16 : vector<8x1xf32> to vector<2x4x1xf32>
    %cst_11 = arith.constant dense<0.000000e+00> : vector<2x1xf32>
    %18 = vector.multi_reduction <add>, %17, %cst_11 [1] : vector<2x4x1xf32> to vector<2x1xf32>
    %19 = vector.shape_cast %18 : vector<2x1xf32> to vector<2x1x1xf32>
    %cst_12 = arith.constant 9.99999993E-9 : f32
    %20 = vector.broadcast %cst_12 : f32 to vector<2x1x1xf32>
    %21 = arith.addf %19, %20 : vector<2x1x1xf32>
    %22 = tpu.reciprocal %21 {approx = true} : vector<2x1x1xf32> -> vector<2x1x1xf32>
    %23 = vector.broadcast %22 : vector<2x1x1xf32> to vector<2x4x1xf32>
    %24 = arith.mulf %17, %23 : vector<2x4x1xf32>
    %25 = vector.broadcast %24 : vector<2x4x1xf32> to vector<2x4x16xf32>
    %26 = arith.mulf %0, %25 : vector<2x4x16xf32>
    %cst_13 = arith.constant dense<0.000000e+00> : vector<2x16xf32>
    %27 = vector.multi_reduction <add>, %26, %cst_13 [1] : vector<2x4x16xf32> to vector<2x16xf32>
    %28 = vector.shape_cast %27 : vector<2x16xf32> to vector<2x1x16xf32>
    %c0_14 = arith.constant 0 : index
    %c0_15 = arith.constant 0 : index
    %c0_16 = arith.constant 0 : index
    %29 = vector.load %arg2[%c0_14, %c0_15, %c0_16] : memref<2x2x16xf32, #tpu.memory_space<vmem>>, vector<2x2x16xf32>
    %30 = vector.broadcast %28 : vector<2x1x16xf32> to vector<2x2x16xf32>
    %31 = arith.mulf %30, %29 : vector<2x2x16xf32>
    %cst_17 = arith.constant dense<0.000000e+00> : vector<2x2xf32>
    %32 = vector.multi_reduction <add>, %31, %cst_17 [2] : vector<2x2x16xf32> to vector<2x2xf32>
    %c0_18 = arith.constant 0 : index
    %c0_19 = arith.constant 0 : index
    %33 = vector.load %arg7[%c0_18, %c0_19] : memref<2x2xf32, #tpu.memory_space<vmem>>, vector<2x2xf32>
    tpu.vector_store %arg7[%c0_18, %c0_19], %32 {strides = array<i32>} : memref<2x2xf32, #tpu.memory_space<vmem>>, vector<2x2xf32>,
    return
  }
  func.func @transform_0(%arg0: i32) -> (i32, i32, i32) {
    %c0_i32 = arith.constant 0 : i32
    %c0_i32_0 = arith.constant 0 : i32
    %c0_i32_1 = arith.constant 0 : i32
    %c0_i32_2 = arith.constant 0 : i32
    return %c0_i32, %c0_i32_0, %c0_i32_1 : i32, i32, i32
  }
  func.func @transform_1(%arg0: i32) -> (i32, i32, i32) {
    %c0_i32 = arith.constant 0 : i32
    %c0_i32_0 = arith.constant 0 : i32
    %c0_i32_1 = arith.constant 0 : i32
    %c0_i32_2 = arith.constant 0 : i32
    return %c0_i32, %c0_i32_0, %c0_i32_1 : i32, i32, i32
  }
  func.func @transform_2(%arg0: i32) -> (i32, i32) {
    %c0_i32 = arith.constant 0 : i32
    %c0_i32_0 = arith.constant 0 : i32
    %c0_i32_1 = arith.constant 0 : i32
    return %c0_i32, %c0_i32_0 : i32, i32
  }
  func.func @transform_3(%arg0: i32) -> (i32, i32) {
    %c0_i32 = arith.constant 0 : i32
    %c0_i32_0 = arith.constant 0 : i32
    %c0_i32_1 = arith.constant 0 : i32
    return %c0_i32, %c0_i32_0 : i32, i32
  }
  func.func @transform_4(%arg0: i32) -> (i32, i32) {
    %c0_i32 = arith.constant 0 : i32
    %c0_i32_0 = arith.constant 0 : i32
    %c0_i32_1 = arith.constant 0 : i32
    return %c0_i32, %c0_i32_0 : i32, i32
  }
  func.func @transform_5(%arg0: i32) -> (i32, i32) {
    %c0_i32 = arith.constant 0 : i32
    %c0_i32_0 = arith.constant 0 : i32
    %c0_i32_1 = arith.constant 0 : i32
    return %c0_i32, %c0_i32_0 : i32, i32
  }
  func.func @transform_6(%arg0: i32) -> (i32, i32) {
    %c0_i32 = arith.constant 0 : i32
    %c0_i32_0 = arith.constant 0 : i32
    %c0_i32_1 = arith.constant 0 : i32
    return %c0_i32, %c0_i32_0 : i32, i32
  }
}

module attributes {stable_mosaic.version = 11 : i64} {
  func.func @news_kernel(%arg0: i32, %arg1: memref<128x2xi32, #tpu.memory_space<vmem>>, %arg2: memref<128x64xf32, #tpu.memory_space<vmem>>, %arg3: memref<2x64xf32, #tpu.memory_space<vmem>>, %arg4: memref<64x128xf32, #tpu.memory_space<vmem>>, %arg5: memref<1x128xf32, #tpu.memory_space<vmem>>, %arg6: memref<64x128xf32, #tpu.memory_space<vmem>>, %arg7: memref<1x128xf32, #tpu.memory_space<vmem>>, %arg8: memref<64x128xf32, #tpu.memory_space<vmem>>, %arg9: memref<1x128xf32, #tpu.memory_space<vmem>>, %arg10: memref<128x32xf32, #tpu.memory_space<vmem>>, %arg11: memref<1x32xf32, #tpu.memory_space<vmem>>, %arg12: memref<1x32xf32, #tpu.memory_space<vmem>>, %arg13: memref<1x1xf32, #tpu.memory_space<smem>>, %arg14: memref<128x128xf32, #tpu.memory_space<vmem>>, %arg15: memref<1x128xf32, #tpu.memory_space<vmem>>, %arg16: memref<16x128xf32, #tpu.memory_space<vmem>>, %arg17: memref<128x128xf32, #tpu.memory_space<vmem>>) attributes {dimension_semantics = [#tpu.dimension_semantics<parallel>], iteration_bounds = array<i64: 1>, scalar_prefetch = 0 : i64, scratch_operands = 1 : i64, tpu.core_type = #tpu.core_type<tc>, window_params = [{transform_indices = @transform_0, window_bounds = array<i64: 128, 2>}, {pipeline_mode = #tpu.pipeline_mode<synchronous>, transform_indices = @transform_1, window_bounds = array<i64: 128, 64>}, {pipeline_mode = #tpu.pipeline_mode<synchronous>, transform_indices = @transform_2, window_bounds = array<i64: 2, 64>}, {pipeline_mode = #tpu.pipeline_mode<synchronous>, transform_indices = @transform_3, window_bounds = array<i64: 64, 128>}, {pipeline_mode = #tpu.pipeline_mode<synchronous>, transform_indices = @transform_4, window_bounds = array<i64: 1, 128>}, {pipeline_mode = #tpu.pipeline_mode<synchronous>, transform_indices = @transform_5, window_bounds = array<i64: 64, 128>}, {pipeline_mode = #tpu.pipeline_mode<synchronous>, transform_indices = @transform_6, window_bounds = array<i64: 1, 128>}, {pipeline_mode = #tpu.pipeline_mode<synchronous>, transform_indices = @transform_7, window_bounds = array<i64: 64, 128>}, {pipeline_mode = #tpu.pipeline_mode<synchronous>, transform_indices = @transform_8, window_bounds = array<i64: 1, 128>}, {pipeline_mode = #tpu.pipeline_mode<synchronous>, transform_indices = @transform_9, window_bounds = array<i64: 128, 32>}, {pipeline_mode = #tpu.pipeline_mode<synchronous>, transform_indices = @transform_10, window_bounds = array<i64: 1, 32>}, {pipeline_mode = #tpu.pipeline_mode<synchronous>, transform_indices = @transform_11, window_bounds = array<i64: 1, 32>}, {transform_indices = @transform_12, window_bounds = array<i64: 1, 1>}, {pipeline_mode = #tpu.pipeline_mode<synchronous>, transform_indices = @transform_13, window_bounds = array<i64: 128, 128>}, {pipeline_mode = #tpu.pipeline_mode<synchronous>, transform_indices = @transform_14, window_bounds = array<i64: 1, 128>}, {transform_indices = @transform_15, window_bounds = array<i64: 16, 128>}]} {
    %c0 = arith.constant 0 : index
    %c0_0 = arith.constant 0 : index
    %0 = vector.load %arg1[%c0, %c0_0] : memref<128x2xi32, #tpu.memory_space<vmem>>, vector<128x2xi32>
    %1 = vector.extract_strided_slice %0 {offsets = [0, 0], sizes = [128, 1], strides = [1, 1]} : vector<128x2xi32> to vector<128x1xi32>
    %2 = vector.extract_strided_slice %0 {offsets = [0, 1], sizes = [128, 1], strides = [1, 1]} : vector<128x2xi32> to vector<128x1xi32>
    %3 = tpu.iota {dimensions = array<i32: 1>} : vector<128x128xi32>
    %4 = vector.broadcast %1 : vector<128x1xi32> to vector<128x128xi32>
    %5 = arith.cmpi eq, %4, %3 : vector<128x128xi32>
    %6 = arith.extui %5 : vector<128x128xi1> to vector<128x128xi32>
    %7 = arith.sitofp %6 : vector<128x128xi32> to vector<128x128xf32>
    %c0_1 = arith.constant 0 : index
    %c0_2 = arith.constant 0 : index
    %8 = vector.load %arg2[%c0_1, %c0_2] : memref<128x64xf32, #tpu.memory_space<vmem>>, vector<128x64xf32>
    %cst = arith.constant dense<0.000000e+00> : vector<128x64xf32>
    %9 = tpu.matmul %7, %8, %cst {dimension_numbers = #tpu.dot_dimension_numbers<[1], [0], [0], [1], [0, 0, 1, 1], [], []>} : vector<128x128xf32>, vector<128x64xf32>, vector<128x64xf32> -> vector<128x64xf32>
    %c0_i32 = arith.constant 0 : i32
    %10 = vector.broadcast %c0_i32 : i32 to vector<128x1xi32>
    %11 = arith.cmpi eq, %2, %10 : vector<128x1xi32>
    %c0_3 = arith.constant 0 : index
    %c0_4 = arith.constant 0 : index
    %12 = vector.load %arg3[%c0_3, %c0_4] : memref<2x64xf32, #tpu.memory_space<vmem>>, vector<1x64xf32>
    %c1 = arith.constant 1 : index
    %c0_5 = arith.constant 0 : index
    %13 = vector.load %arg3[%c1, %c0_5] : memref<2x64xf32, #tpu.memory_space<vmem>>, vector<1x64xf32>
    %14 = vector.shape_cast %11 : vector<128x1xi1> to vector<128x1xi1>
    %15 = vector.broadcast %14 : vector<128x1xi1> to vector<128x64xi1>
    %16 = vector.shape_cast %12 : vector<1x64xf32> to vector<1x64xf32>
    %17 = vector.broadcast %16 : vector<1x64xf32> to vector<128x64xf32>
    %18 = vector.shape_cast %13 : vector<1x64xf32> to vector<1x64xf32>
    %19 = vector.broadcast %18 : vector<1x64xf32> to vector<128x64xf32>
    %20 = arith.select %15, %17, %19 : vector<128x64xi1>, vector<128x64xf32>
    %21 = arith.addf %9, %20 : vector<128x64xf32>
    %c0_6 = arith.constant 0 : index
    %c0_7 = arith.constant 0 : index
    %22 = vector.load %arg4[%c0_6, %c0_7] : memref<64x128xf32, #tpu.memory_space<vmem>>, vector<64x128xf32>
    %cst_8 = arith.constant dense<0.000000e+00> : vector<128x128xf32>
    %23 = tpu.matmul %21, %22, %cst_8 {dimension_numbers = #tpu.dot_dimension_numbers<[1], [0], [0], [1], [0, 0, 1, 1], [], []>} : vector<128x64xf32>, vector<64x128xf32>, vector<128x128xf32> -> vector<128x128xf32>
    %c0_9 = arith.constant 0 : index
    %c0_10 = arith.constant 0 : index
    %24 = vector.load %arg5[%c0_9, %c0_10] : memref<1x128xf32, #tpu.memory_space<vmem>>, vector<1x128xf32>
    %25 = vector.broadcast %24 : vector<1x128xf32> to vector<128x128xf32>
    %26 = arith.addf %23, %25 : vector<128x128xf32>
    %c0_11 = arith.constant 0 : index
    %c0_12 = arith.constant 0 : index
    %27 = vector.load %arg6[%c0_11, %c0_12] : memref<64x128xf32, #tpu.memory_space<vmem>>, vector<64x128xf32>
    %cst_13 = arith.constant dense<0.000000e+00> : vector<128x128xf32>
    %28 = tpu.matmul %21, %27, %cst_13 {dimension_numbers = #tpu.dot_dimension_numbers<[1], [0], [0], [1], [0, 0, 1, 1], [], []>} : vector<128x64xf32>, vector<64x128xf32>, vector<128x128xf32> -> vector<128x128xf32>
    %c0_14 = arith.constant 0 : index
    %c0_15 = arith.constant 0 : index
    %29 = vector.load %arg7[%c0_14, %c0_15] : memref<1x128xf32, #tpu.memory_space<vmem>>, vector<1x128xf32>
    %30 = vector.broadcast %29 : vector<1x128xf32> to vector<128x128xf32>
    %31 = arith.addf %28, %30 : vector<128x128xf32>
    %c0_16 = arith.constant 0 : index
    %c0_17 = arith.constant 0 : index
    %32 = vector.load %arg8[%c0_16, %c0_17] : memref<64x128xf32, #tpu.memory_space<vmem>>, vector<64x128xf32>
    %cst_18 = arith.constant dense<0.000000e+00> : vector<128x128xf32>
    %33 = tpu.matmul %21, %32, %cst_18 {dimension_numbers = #tpu.dot_dimension_numbers<[1], [0], [0], [1], [0, 0, 1, 1], [], []>} : vector<128x64xf32>, vector<64x128xf32>, vector<128x128xf32> -> vector<128x128xf32>
    %c0_19 = arith.constant 0 : index
    %c0_20 = arith.constant 0 : index
    %34 = vector.load %arg9[%c0_19, %c0_20] : memref<1x128xf32, #tpu.memory_space<vmem>>, vector<1x128xf32>
    %35 = vector.broadcast %34 : vector<1x128xf32> to vector<128x128xf32>
    %36 = arith.addf %33, %35 : vector<128x128xf32>
    %37 = vector.shape_cast %26 : vector<128x128xf32> to vector<16x8x128xf32>
    %38 = vector.shape_cast %31 : vector<128x128xf32> to vector<16x8x128xf32>
    %39 = vector.shape_cast %36 : vector<128x128xf32> to vector<16x8x128xf32>
    %40 = vector.extract_strided_slice %37 {offsets = [0, 0, 0], sizes = [16, 8, 32], strides = [1, 1, 1]} : vector<16x8x128xf32> to vector<16x8x32xf32>
    %41 = vector.extract_strided_slice %38 {offsets = [0, 0, 0], sizes = [16, 8, 32], strides = [1, 1, 1]} : vector<16x8x128xf32> to vector<16x8x32xf32>
    %42 = vector.extract_strided_slice %39 {offsets = [0, 0, 0], sizes = [16, 8, 32], strides = [1, 1, 1]} : vector<16x8x128xf32> to vector<16x8x32xf32>
    "tpu.trace_start"() <{level = 10 : i32, message = "rsk,rtk->rst"}> : () -> ()
    %cst_21 = arith.constant dense<0.000000e+00> : vector<16x8x8xf32>
    %43 = tpu.matmul %40, %41, %cst_21 {dimension_numbers = #tpu.dot_dimension_numbers<[2], [2], [1], [1], [0, 0, 0, 1, 1, 1], [0], [0]>} : vector<16x8x32xf32>, vector<16x8x32xf32>, vector<16x8x8xf32> -> vector<16x8x8xf32>
    "tpu.trace_stop"() : () -> ()
    %cst_22 = arith.constant 0.223606795 : f32
    %44 = vector.broadcast %cst_22 : f32 to vector<16x8x8xf32>
    %45 = arith.mulf %43, %44 : vector<16x8x8xf32>
    %46 = math.exp %45 : vector<16x8x8xf32>
    %cst_23 = arith.constant dense<0.000000e+00> : vector<16x8xf32>
    %47 = vector.multi_reduction <add>, %46, %cst_23 [2] : vector<16x8x8xf32> to vector<16x8xf32>
    %48 = vector.shape_cast %47 : vector<16x8xf32> to vector<16x8x1xf32>
    %cst_24 = arith.constant 9.99999993E-9 : f32
    %49 = vector.broadcast %cst_24 : f32 to vector<16x8x1xf32>
    %50 = arith.addf %48, %49 : vector<16x8x1xf32>
    %51 = tpu.reciprocal %50 {approx = true} : vector<16x8x1xf32> -> vector<16x8x1xf32>
    %52 = vector.broadcast %51 : vector<16x8x1xf32> to vector<16x8x8xf32>
    %53 = arith.mulf %46, %52 : vector<16x8x8xf32>
    "tpu.trace_start"() <{level = 10 : i32, message = "rst,rtv->rsv"}> : () -> ()
    %cst_25 = arith.constant dense<0.000000e+00> : vector<16x8x32xf32>
    %54 = tpu.matmul %53, %42, %cst_25 {dimension_numbers = #tpu.dot_dimension_numbers<[2], [1], [1], [2], [0, 0, 0, 1, 1, 2], [0], [0]>} : vector<16x8x8xf32>, vector<16x8x32xf32>, vector<16x8x32xf32> -> vector<16x8x32xf32>
    "tpu.trace_stop"() : () -> ()
    %55 = vector.shape_cast %54 : vector<16x8x32xf32> to vector<128x32xf32>
    %c0_26 = arith.constant 0 : index
    %c0_27 = arith.constant 0 : index
    %56 = vector.load %arg17[%c0_26, %c0_27] : memref<128x128xf32, #tpu.memory_space<vmem>>, vector<128x32xf32>
    tpu.vector_store %arg17[%c0_26, %c0_27], %55 {strides = array<i32>} : memref<128x128xf32, #tpu.memory_space<vmem>>, vector<128x32xf32>,
    %57 = vector.extract_strided_slice %37 {offsets = [0, 0, 32], sizes = [16, 8, 32], strides = [1, 1, 1]} : vector<16x8x128xf32> to vector<16x8x32xf32>
    %58 = vector.extract_strided_slice %38 {offsets = [0, 0, 32], sizes = [16, 8, 32], strides = [1, 1, 1]} : vector<16x8x128xf32> to vector<16x8x32xf32>
    %59 = vector.extract_strided_slice %39 {offsets = [0, 0, 32], sizes = [16, 8, 32], strides = [1, 1, 1]} : vector<16x8x128xf32> to vector<16x8x32xf32>
    "tpu.trace_start"() <{level = 10 : i32, message = "rsk,rtk->rst"}> : () -> ()
    %cst_28 = arith.constant dense<0.000000e+00> : vector<16x8x8xf32>
    %60 = tpu.matmul %57, %58, %cst_28 {dimension_numbers = #tpu.dot_dimension_numbers<[2], [2], [1], [1], [0, 0, 0, 1, 1, 1], [0], [0]>} : vector<16x8x32xf32>, vector<16x8x32xf32>, vector<16x8x8xf32> -> vector<16x8x8xf32>
    "tpu.trace_stop"() : () -> ()
    %cst_29 = arith.constant 0.223606795 : f32
    %61 = vector.broadcast %cst_29 : f32 to vector<16x8x8xf32>
    %62 = arith.mulf %60, %61 : vector<16x8x8xf32>
    %63 = math.exp %62 : vector<16x8x8xf32>
    %cst_30 = arith.constant dense<0.000000e+00> : vector<16x8xf32>
    %64 = vector.multi_reduction <add>, %63, %cst_30 [2] : vector<16x8x8xf32> to vector<16x8xf32>
    %65 = vector.shape_cast %64 : vector<16x8xf32> to vector<16x8x1xf32>
    %cst_31 = arith.constant 9.99999993E-9 : f32
    %66 = vector.broadcast %cst_31 : f32 to vector<16x8x1xf32>
    %67 = arith.addf %65, %66 : vector<16x8x1xf32>
    %68 = tpu.reciprocal %67 {approx = true} : vector<16x8x1xf32> -> vector<16x8x1xf32>
    %69 = vector.broadcast %68 : vector<16x8x1xf32> to vector<16x8x8xf32>
    %70 = arith.mulf %63, %69 : vector<16x8x8xf32>
    "tpu.trace_start"() <{level = 10 : i32, message = "rst,rtv->rsv"}> : () -> ()
    %cst_32 = arith.constant dense<0.000000e+00> : vector<16x8x32xf32>
    %71 = tpu.matmul %70, %59, %cst_32 {dimension_numbers = #tpu.dot_dimension_numbers<[2], [1], [1], [2], [0, 0, 0, 1, 1, 2], [0], [0]>} : vector<16x8x8xf32>, vector<16x8x32xf32>, vector<16x8x32xf32> -> vector<16x8x32xf32>
    "tpu.trace_stop"() : () -> ()
    %72 = vector.shape_cast %71 : vector<16x8x32xf32> to vector<128x32xf32>
    %c0_33 = arith.constant 0 : index
    %c32 = arith.constant 32 : index
    %73 = vector.load %arg17[%c0_33, %c32] : memref<128x128xf32, #tpu.memory_space<vmem>>, vector<128x32xf32>
    tpu.vector_store %arg17[%c0_33, %c32], %72 {strides = array<i32>} : memref<128x128xf32, #tpu.memory_space<vmem>>, vector<128x32xf32>,
    %74 = vector.extract_strided_slice %37 {offsets = [0, 0, 64], sizes = [16, 8, 32], strides = [1, 1, 1]} : vector<16x8x128xf32> to vector<16x8x32xf32>
    %75 = vector.extract_strided_slice %38 {offsets = [0, 0, 64], sizes = [16, 8, 32], strides = [1, 1, 1]} : vector<16x8x128xf32> to vector<16x8x32xf32>
    %76 = vector.extract_strided_slice %39 {offsets = [0, 0, 64], sizes = [16, 8, 32], strides = [1, 1, 1]} : vector<16x8x128xf32> to vector<16x8x32xf32>
    "tpu.trace_start"() <{level = 10 : i32, message = "rsk,rtk->rst"}> : () -> ()
    %cst_34 = arith.constant dense<0.000000e+00> : vector<16x8x8xf32>
    %77 = tpu.matmul %74, %75, %cst_34 {dimension_numbers = #tpu.dot_dimension_numbers<[2], [2], [1], [1], [0, 0, 0, 1, 1, 1], [0], [0]>} : vector<16x8x32xf32>, vector<16x8x32xf32>, vector<16x8x8xf32> -> vector<16x8x8xf32>
    "tpu.trace_stop"() : () -> ()
    %cst_35 = arith.constant 0.223606795 : f32
    %78 = vector.broadcast %cst_35 : f32 to vector<16x8x8xf32>
    %79 = arith.mulf %77, %78 : vector<16x8x8xf32>
    %80 = math.exp %79 : vector<16x8x8xf32>
    %cst_36 = arith.constant dense<0.000000e+00> : vector<16x8xf32>
    %81 = vector.multi_reduction <add>, %80, %cst_36 [2] : vector<16x8x8xf32> to vector<16x8xf32>
    %82 = vector.shape_cast %81 : vector<16x8xf32> to vector<16x8x1xf32>
    %cst_37 = arith.constant 9.99999993E-9 : f32
    %83 = vector.broadcast %cst_37 : f32 to vector<16x8x1xf32>
    %84 = arith.addf %82, %83 : vector<16x8x1xf32>
    %85 = tpu.reciprocal %84 {approx = true} : vector<16x8x1xf32> -> vector<16x8x1xf32>
    %86 = vector.broadcast %85 : vector<16x8x1xf32> to vector<16x8x8xf32>
    %87 = arith.mulf %80, %86 : vector<16x8x8xf32>
    "tpu.trace_start"() <{level = 10 : i32, message = "rst,rtv->rsv"}> : () -> ()
    %cst_38 = arith.constant dense<0.000000e+00> : vector<16x8x32xf32>
    %88 = tpu.matmul %87, %76, %cst_38 {dimension_numbers = #tpu.dot_dimension_numbers<[2], [1], [1], [2], [0, 0, 0, 1, 1, 2], [0], [0]>} : vector<16x8x8xf32>, vector<16x8x32xf32>, vector<16x8x32xf32> -> vector<16x8x32xf32>
    "tpu.trace_stop"() : () -> ()
    %89 = vector.shape_cast %88 : vector<16x8x32xf32> to vector<128x32xf32>
    %c0_39 = arith.constant 0 : index
    %c64 = arith.constant 64 : index
    %90 = vector.load %arg17[%c0_39, %c64] : memref<128x128xf32, #tpu.memory_space<vmem>>, vector<128x32xf32>
    tpu.vector_store %arg17[%c0_39, %c64], %89 {strides = array<i32>} : memref<128x128xf32, #tpu.memory_space<vmem>>, vector<128x32xf32>,
    %91 = vector.extract_strided_slice %37 {offsets = [0, 0, 96], sizes = [16, 8, 32], strides = [1, 1, 1]} : vector<16x8x128xf32> to vector<16x8x32xf32>
    %92 = vector.extract_strided_slice %38 {offsets = [0, 0, 96], sizes = [16, 8, 32], strides = [1, 1, 1]} : vector<16x8x128xf32> to vector<16x8x32xf32>
    %93 = vector.extract_strided_slice %39 {offsets = [0, 0, 96], sizes = [16, 8, 32], strides = [1, 1, 1]} : vector<16x8x128xf32> to vector<16x8x32xf32>
    "tpu.trace_start"() <{level = 10 : i32, message = "rsk,rtk->rst"}> : () -> ()
    %cst_40 = arith.constant dense<0.000000e+00> : vector<16x8x8xf32>
    %94 = tpu.matmul %91, %92, %cst_40 {dimension_numbers = #tpu.dot_dimension_numbers<[2], [2], [1], [1], [0, 0, 0, 1, 1, 1], [0], [0]>} : vector<16x8x32xf32>, vector<16x8x32xf32>, vector<16x8x8xf32> -> vector<16x8x8xf32>
    "tpu.trace_stop"() : () -> ()
    %cst_41 = arith.constant 0.223606795 : f32
    %95 = vector.broadcast %cst_41 : f32 to vector<16x8x8xf32>
    %96 = arith.mulf %94, %95 : vector<16x8x8xf32>
    %97 = math.exp %96 : vector<16x8x8xf32>
    %cst_42 = arith.constant dense<0.000000e+00> : vector<16x8xf32>
    %98 = vector.multi_reduction <add>, %97, %cst_42 [2] : vector<16x8x8xf32> to vector<16x8xf32>
    %99 = vector.shape_cast %98 : vector<16x8xf32> to vector<16x8x1xf32>
    %cst_43 = arith.constant 9.99999993E-9 : f32
    %100 = vector.broadcast %cst_43 : f32 to vector<16x8x1xf32>
    %101 = arith.addf %99, %100 : vector<16x8x1xf32>
    %102 = tpu.reciprocal %101 {approx = true} : vector<16x8x1xf32> -> vector<16x8x1xf32>
    %103 = vector.broadcast %102 : vector<16x8x1xf32> to vector<16x8x8xf32>
    %104 = arith.mulf %97, %103 : vector<16x8x8xf32>
    "tpu.trace_start"() <{level = 10 : i32, message = "rst,rtv->rsv"}> : () -> ()
    %cst_44 = arith.constant dense<0.000000e+00> : vector<16x8x32xf32>
    %105 = tpu.matmul %104, %93, %cst_44 {dimension_numbers = #tpu.dot_dimension_numbers<[2], [1], [1], [2], [0, 0, 0, 1, 1, 2], [0], [0]>} : vector<16x8x8xf32>, vector<16x8x32xf32>, vector<16x8x32xf32> -> vector<16x8x32xf32>
    "tpu.trace_stop"() : () -> ()
    %106 = vector.shape_cast %105 : vector<16x8x32xf32> to vector<128x32xf32>
    %c0_45 = arith.constant 0 : index
    %c96 = arith.constant 96 : index
    %107 = vector.load %arg17[%c0_45, %c96] : memref<128x128xf32, #tpu.memory_space<vmem>>, vector<128x32xf32>
    tpu.vector_store %arg17[%c0_45, %c96], %106 {strides = array<i32>} : memref<128x128xf32, #tpu.memory_space<vmem>>, vector<128x32xf32>,
    %c0_46 = arith.constant 0 : index
    %c0_47 = arith.constant 0 : index
    %108 = vector.load %arg17[%c0_46, %c0_47] : memref<128x128xf32, #tpu.memory_space<vmem>>, vector<128x128xf32>
    %c0_48 = arith.constant 0 : index
    %c0_49 = arith.constant 0 : index
    %109 = vector.load %arg10[%c0_48, %c0_49] : memref<128x32xf32, #tpu.memory_space<vmem>>, vector<128x32xf32>
    %cst_50 = arith.constant dense<0.000000e+00> : vector<128x32xf32>
    %110 = tpu.matmul %108, %109, %cst_50 {dimension_numbers = #tpu.dot_dimension_numbers<[1], [0], [0], [1], [0, 0, 1, 1], [], []>} : vector<128x128xf32>, vector<128x32xf32>, vector<128x32xf32> -> vector<128x32xf32>
    %c0_51 = arith.constant 0 : index
    %c0_52 = arith.constant 0 : index
    %111 = vector.load %arg11[%c0_51, %c0_52] : memref<1x32xf32, #tpu.memory_space<vmem>>, vector<1x32xf32>
    %112 = vector.broadcast %111 : vector<1x32xf32> to vector<128x32xf32>
    %113 = arith.addf %110, %112 : vector<128x32xf32>
    %114 = math.tanh %113 : vector<128x32xf32>
    %c0_53 = arith.constant 0 : index
    %c0_54 = arith.constant 0 : index
    %115 = vector.load %arg12[%c0_53, %c0_54] : memref<1x32xf32, #tpu.memory_space<vmem>>, vector<1x32xf32>
    %116 = vector.broadcast %115 : vector<1x32xf32> to vector<128x32xf32>
    %117 = arith.mulf %114, %116 : vector<128x32xf32>
    %cst_55 = arith.constant dense<0.000000e+00> : vector<128xf32>
    %118 = vector.multi_reduction <add>, %117, %cst_55 [1] : vector<128x32xf32> to vector<128xf32>
    %119 = vector.shape_cast %118 : vector<128xf32> to vector<128x1xf32>
    %c0_56 = arith.constant 0 : index
    %c0_57 = arith.constant 0 : index
    %120 = memref.load %arg13[%c0_56, %c0_57] : memref<1x1xf32, #tpu.memory_space<smem>>
    %121 = vector.broadcast %120 : f32 to vector<128x1xf32>
    %122 = arith.addf %119, %121 : vector<128x1xf32>
    %123 = math.exp %122 : vector<128x1xf32>
    %124 = vector.shape_cast %123 : vector<128x1xf32> to vector<16x8x1xf32>
    %cst_58 = arith.constant dense<0.000000e+00> : vector<16x1xf32>
    %125 = vector.multi_reduction <add>, %124, %cst_58 [1] : vector<16x8x1xf32> to vector<16x1xf32>
    %126 = vector.shape_cast %125 : vector<16x1xf32> to vector<16x1x1xf32>
    %cst_59 = arith.constant 9.99999993E-9 : f32
    %127 = vector.broadcast %cst_59 : f32 to vector<16x1x1xf32>
    %128 = arith.addf %126, %127 : vector<16x1x1xf32>
    %129 = tpu.reciprocal %128 {approx = true} : vector<16x1x1xf32> -> vector<16x1x1xf32>
    %130 = vector.broadcast %129 : vector<16x1x1xf32> to vector<16x8x1xf32>
    %131 = arith.mulf %124, %130 : vector<16x8x1xf32>
    %132 = vector.shape_cast %108 : vector<128x128xf32> to vector<16x8x128xf32>
    %133 = vector.broadcast %131 : vector<16x8x1xf32> to vector<16x8x128xf32>
    %134 = arith.mulf %132, %133 : vector<16x8x128xf32>
    %cst_60 = arith.constant dense<0.000000e+00> : vector<16x128xf32>
    %135 = vector.multi_reduction <add>, %134, %cst_60 [1] : vector<16x8x128xf32> to vector<16x128xf32>
    %c0_61 = arith.constant 0 : index
    %c0_62 = arith.constant 0 : index
    %136 = vector.load %arg14[%c0_61, %c0_62] : memref<128x128xf32, #tpu.memory_space<vmem>>, vector<128x128xf32>
    %cst_63 = arith.constant dense<0.000000e+00> : vector<16x128xf32>
    %137 = tpu.matmul %135, %136, %cst_63 {dimension_numbers = #tpu.dot_dimension_numbers<[1], [0], [0], [1], [0, 0, 1, 1], [], []>} : vector<16x128xf32>, vector<128x128xf32>, vector<16x128xf32> -> vector<16x128xf32>
    %c0_64 = arith.constant 0 : index
    %c0_65 = arith.constant 0 : index
    %138 = vector.load %arg15[%c0_64, %c0_65] : memref<1x128xf32, #tpu.memory_space<vmem>>, vector<1x128xf32>
    %139 = vector.broadcast %138 : vector<1x128xf32> to vector<16x128xf32>
    %140 = arith.addf %137, %139 : vector<16x128xf32>
    %c0_66 = arith.constant 0 : index
    %c0_67 = arith.constant 0 : index
    %141 = vector.load %arg16[%c0_66, %c0_67] : memref<16x128xf32, #tpu.memory_space<vmem>>, vector<16x128xf32>
    tpu.vector_store %arg16[%c0_66, %c0_67], %140 {strides = array<i32>} : memref<16x128xf32, #tpu.memory_space<vmem>>, vector<16x128xf32>,
    return
  }
  func.func @transform_0(%arg0: i32) -> (i32, i32) {
    %c0_i32 = arith.constant 0 : i32
    %c0_i32_0 = arith.constant 0 : i32
    return %arg0, %c0_i32 : i32, i32
  }
  func.func @transform_1(%arg0: i32) -> (i32, i32) {
    %c0_i32 = arith.constant 0 : i32
    %c0_i32_0 = arith.constant 0 : i32
    %c0_i32_1 = arith.constant 0 : i32
    return %c0_i32, %c0_i32_0 : i32, i32
  }
  func.func @transform_2(%arg0: i32) -> (i32, i32) {
    %c0_i32 = arith.constant 0 : i32
    %c0_i32_0 = arith.constant 0 : i32
    %c0_i32_1 = arith.constant 0 : i32
    return %c0_i32, %c0_i32_0 : i32, i32
  }
  func.func @transform_3(%arg0: i32) -> (i32, i32) {
    %c0_i32 = arith.constant 0 : i32
    %c0_i32_0 = arith.constant 0 : i32
    %c0_i32_1 = arith.constant 0 : i32
    return %c0_i32, %c0_i32_0 : i32, i32
  }
  func.func @transform_4(%arg0: i32) -> (i32, i32) {
    %c0_i32 = arith.constant 0 : i32
    %c0_i32_0 = arith.constant 0 : i32
    %c0_i32_1 = arith.constant 0 : i32
    return %c0_i32, %c0_i32_0 : i32, i32
  }
  func.func @transform_5(%arg0: i32) -> (i32, i32) {
    %c0_i32 = arith.constant 0 : i32
    %c0_i32_0 = arith.constant 0 : i32
    %c0_i32_1 = arith.constant 0 : i32
    return %c0_i32, %c0_i32_0 : i32, i32
  }
  func.func @transform_6(%arg0: i32) -> (i32, i32) {
    %c0_i32 = arith.constant 0 : i32
    %c0_i32_0 = arith.constant 0 : i32
    %c0_i32_1 = arith.constant 0 : i32
    return %c0_i32, %c0_i32_0 : i32, i32
  }
  func.func @transform_7(%arg0: i32) -> (i32, i32) {
    %c0_i32 = arith.constant 0 : i32
    %c0_i32_0 = arith.constant 0 : i32
    %c0_i32_1 = arith.constant 0 : i32
    return %c0_i32, %c0_i32_0 : i32, i32
  }
  func.func @transform_8(%arg0: i32) -> (i32, i32) {
    %c0_i32 = arith.constant 0 : i32
    %c0_i32_0 = arith.constant 0 : i32
    %c0_i32_1 = arith.constant 0 : i32
    return %c0_i32, %c0_i32_0 : i32, i32
  }
  func.func @transform_9(%arg0: i32) -> (i32, i32) {
    %c0_i32 = arith.constant 0 : i32
    %c0_i32_0 = arith.constant 0 : i32
    %c0_i32_1 = arith.constant 0 : i32
    return %c0_i32, %c0_i32_0 : i32, i32
  }
  func.func @transform_10(%arg0: i32) -> (i32, i32) {
    %c0_i32 = arith.constant 0 : i32
    %c0_i32_0 = arith.constant 0 : i32
    %c0_i32_1 = arith.constant 0 : i32
    return %c0_i32, %c0_i32_0 : i32, i32
  }
  func.func @transform_11(%arg0: i32) -> (i32, i32) {
    %c0_i32 = arith.constant 0 : i32
    %c0_i32_0 = arith.constant 0 : i32
    %c0_i32_1 = arith.constant 0 : i32
    return %c0_i32, %c0_i32_0 : i32, i32
  }
  func.func @transform_12(%arg0: i32) -> (i32, i32) {
    %c0_i32 = arith.constant 0 : i32
    %c0_i32_0 = arith.constant 0 : i32
    %c0_i32_1 = arith.constant 0 : i32
    return %c0_i32, %c0_i32_0 : i32, i32
  }
  func.func @transform_13(%arg0: i32) -> (i32, i32) {
    %c0_i32 = arith.constant 0 : i32
    %c0_i32_0 = arith.constant 0 : i32
    %c0_i32_1 = arith.constant 0 : i32
    return %c0_i32, %c0_i32_0 : i32, i32
  }
  func.func @transform_14(%arg0: i32) -> (i32, i32) {
    %c0_i32 = arith.constant 0 : i32
    %c0_i32_0 = arith.constant 0 : i32
    %c0_i32_1 = arith.constant 0 : i32
    return %c0_i32, %c0_i32_0 : i32, i32
  }
  func.func @transform_15(%arg0: i32) -> (i32, i32) {
    %c0_i32 = arith.constant 0 : i32
    %c0_i32_0 = arith.constant 0 : i32
    return %arg0, %c0_i32 : i32, i32
  }
}

</mosaic_0001>

<bundles_post_ra>
// kernel: model_bert_forward.3
= control target key start
LH: loop header
LB: loop body
LE: loop exit
PB: predicated region body
PF: predicated region fallthrough
CT: control target
= control target key end

     0   :  { %v276_v2 = vmov 0.0   ;;  %vm277_vm0 = vmmov 0   ;;  %vm39_vm1 = vcmask 130048   ;;  %s358_s0 = inlined_call_operand.vmem [shape: f32[2,4,16], index: 0, kind: input, shape index: {}]   ;;  %s359_s1 = inlined_call_operand.vmem [shape: f32[2,2,16], index: 1, kind: input, shape index: {}]   ;;  %s360_s2 = inlined_call_operand.vmem [shape: f32[16,32], index: 2, kind: input, shape index: {}]   ;;  %s361_s3 = inlined_call_operand.vmem [shape: f32[1,32], index: 3, kind: input, shape index: {}]   ;;  %s362_s4 = inlined_call_operand.vmem [shape: f32[1,32], index: 4, kind: input, shape index: {}]   ;;  %s363_s5 = inlined_call_operand.<no memory space> [shape: f32[1,1], index: 5, kind: input, shape index: {}]   ;;  %s364_s6 = inlined_call_operand.hbm [shape: f32[2,2], index: 6, kind: output, shape index: {}]  }
   0x1   :  { %v28_v0 = vld [vmem:[%s360_s2 + $0x8] sm:$0xff]  ;;  %v322_v1 = vld [vmem:[%s358_s0] sm:$0xf]  ;;  %233 = vmatprep.subr.mxu0 %v276_v2  ;;  %237 = vmatprep.mubr.msk.f32.mxu0 %vm277_vm0, %v276_v2  ;;  %v330_v4 = vld [vmem:[%s358_s0 + $0x4] sm:$0xf] }
   0x2   :  { %v27_v3 = vld [vmem:[%s360_s2] sm:$0xff]  ;;  %234 = vmatpush3.msra.mxu0 %v28_v0  ;;  %v38_v5 = vcombine.low %v322_v1, %v330_v4 }
   0x3   :  { %12 = vsyncpa [#allocation4], 0  ;;  %235 = vmatprep.subr.mxu0 %v276_v2  ;;  %v227_v6 = vld [vmem:[%s361_s3] ss:$0 sm:$0xff]  ;;  %vm121_vm2 = vcmask 261120   ;;  %v134_v14 = vlaneseq  ;;  %v126_v18 = vstv %s363_s5  ;;  %vm147_vm3 = vcmask 1043456  }
   0x4   :  { %236 = vmatpush3.msra.mxu0 %v27_v3  ;;  %v229_v10 = vld [vmem:[%s362_s4] ss:$0 sm:$0xff]  ;;  %v278_v22 = vmov 1985246804   ;;  %v279_v24 = vmov 839922192  }
   0x5   :  { %238 = vmatmul.mubr.msk.f32.vlgmr.msra.gmra.mxu0 %vm39_vm1, %v38_v5  ;;  %v135_v15 = vshrl.u32 %v134_v14, 7  ;;  %v199_v16 = vand.u32 127, %v134_v14  ;;  %v139_v23 = vunpack.c.l.s4 %v278_v22  ;;  %v132_v25 = vunpack.c.l.s4 %v279_v24  ;;  %v186_v3 = vld [vmem:[%s359_s1 + $0x2] sm:$0x3]  ;;  %s280_s10 = smov [#allocation3]  }
   0x6   :  { %vm170_vm4 = vcmask 125952   ;;  %vm189_vm5 = vcmask 123904   ;;  %s219_s11 = sshll.u32 %s280_s10, 4  ;;  %vm208_vm6 = vcmask 1041409   ;;  %vm211_vm7 = vcmask 9216   ;;  %s220_s11 = int_to_ptr.vmem [resolvable:$true] %s219_s11 }
   0x7   :  { %v340_v17 = vsub.s32 %v199_v16, %v135_v15  ;;  %v140_v26 = vunpack.c.0.s8 %v139_v23  ;;  %v133_v27 = vunpack.c.0.s8 %v132_v25  ;;  %p259_p1 = scmp.lt.s32.totalorder %s220_s11, %s220_s11 }
   0x9   :  { %v143_v28 = vsub.s32 %v140_v26, %v135_v15  ;;  %v136_v29 = vsub.s32 %v133_v27, %v135_v15 }
  0xc5   :  { %v108_v7 = vpop.f32.mrf.mxu0 }
  0xc6   :  { %v109_v8 = vadd.f32 %v227_v6, %v108_v7 }
  0xc7   :  { %v239_v9 = vpop.f32.mrf.mxu0 }
  0xc8   :  { %246 = vtanh.f32 %v109_v8 }
  0xd5   :  { %v247_v11 = vpop.eup %246 }
  0xd6   :  { %v120_v12 = vmul.f32 %v247_v11, %v229_v10 }
  0xd8   :  { %v122_v13 = vsel %vm121_vm2, %v120_v12, 0.0 }
  0xd9   :  { %123 = vadd.xlane.f32.xlu0 %v122_v13 }
 0x162   :  { %v124_v19 = vpop.xlane.xlu0 %123 }
 0x163   :  { %v127_v20 = vadd.f32 %v126_v18, %v124_v19 }
 0x165   :  { %v128_v21 = vmul.f32 1.442695, %v127_v20 }
 0x167   :  { %248 = vpow2.f32 %v128_v21 }
 0x174   :  { %v249_v30 = vpop.eup %248 }
 0x175   :  { %v144_v31 = vrot.slane %v249_v30, %v143_v28  ;;  %v137_v32 = vrot.slane %v249_v30, %v136_v29 }
 0x177   :  { %v155_v33 = vsel %vm147_vm3, %v144_v31, 0.0  ;;  %v148_v34 = vsel %vm147_vm3, %v137_v32, 0.0 }
 0x178   :  { %v156_v35 = vrot.slane %v155_v33, 4  ;;  %v149_v36 = vrot.slane %v148_v34, 4 }
 0x17a   :  { %v157_v37 = vadd.f32 %v156_v35, %v155_v33  ;;  %v150_v38 = vadd.f32 %v149_v36, %v148_v34 }
 0x17c   :  { %v158_v39 = vrot.slane %v157_v37, 2  ;;  %v151_v40 = vrot.slane %v150_v38, 2 }
 0x17e   :  { %v159_v41 = vadd.f32 %v158_v39, %v157_v37  ;;  %v152_v42 = vadd.f32 %v151_v40, %v150_v38 }
 0x180   :  { %v160_v43 = vrot.slane %v159_v41, 1  ;;  %v153_v44 = vrot.slane %v152_v42, 1 }
 0x182   :  { %v161_v45 = vadd.f32 %v160_v43, %v159_v41  ;;  %v154_v46 = vadd.f32 %v153_v44, %v152_v42 }
 0x184   :  { %v163_v47 = vadd.f32 1e-08, %v161_v45  ;;  %v162_v48 = vadd.f32 1e-08, %v154_v46 }
 0x186   :  { %250 = vrcp.f32 %v163_v47 }
 0x187   :  { %252 = vrcp.f32 %v162_v48 }
 0x193   :  { %v251_v49 = vpop.eup %250 }
 0x194   :  { %v253_v50 = vpop.eup %252  ;;  %v167_v51 = vmul.f32 %v251_v49, %v144_v31 }
 0x195   :  { %v166_v52 = vmul.f32 %v253_v50, %v137_v32 }
 0x196   :  { %v169_v53 = vmul.f32 %v167_v51, %v330_v4 }
 0x197   :  { %v168_v54 = vmul.f32 %v166_v52, %v322_v1  ;;  %v185_v1 = vld [vmem:[%s359_s1] sm:$0x3]  ;;  %s254_s1 = scalar_lea.vmem %s220_s11, 32 }
 0x198   :  { %v178_v55 = vsel %vm170_vm4, %v169_v53, 0.0  ;;  %p255_p0 = scmp.ne.s32.totalorder %s220_s11, %s254_s1  ;;  %p260_p2 = scmp.lt.s32.totalorder %s254_s1, %s254_s1 }
 0x199   :  { %v179_v56 = vrot.slane %v178_v55, 4  ;;  %v171_v57 = vsel %vm170_vm4, %v168_v54, 0.0 }
 0x19a   :  { %v172_v58 = vrot.slane %v171_v57, 4  ;;  %p261_p3 = por %p260_p2, %p259_p1 }
 0x19b   :  { %v180_v59 = vadd.f32 %v179_v56, %v178_v55 }
 0x19c   :  { %v173_v60 = vadd.f32 %v172_v58, %v171_v57  ;;  %p262_p4 = pnand %p261_p3, %p255_p0 }
 0x19d   :  { %v181_v61 = vrot.slane %v180_v59, 2 }
 0x19e   :  { %v174_v62 = vrot.slane %v173_v60, 2 }
 0x19f   :  { %v182_v63 = vadd.f32 %v181_v61, %v180_v59 }
 0x1a0   :  { %v175_v0 = vadd.f32 %v174_v62, %v173_v60 }
 0x1a1   :  { %v183_v2 = vrot.slane %v182_v63, 1 }
 0x1a2   :  { %v176_v5 = vrot.slane %v175_v0, 1 }
 0x1a3   :  { %v184_v6 = vadd.f32 %v183_v2, %v182_v63 }
 0x1a4   :  { %v177_v4 = vadd.f32 %v176_v5, %v175_v0 }
 0x1a5   :  { %v188_v7 = vmul.f32 %v186_v3, %v184_v6 }
 0x1a6   :  { %v187_v8 = vmul.f32 %v185_v1, %v177_v4 }
 0x1a7   :  { %v193_v9 = vsel %vm189_vm5, %v188_v7, 0.0 }
 0x1a8   :  { %194 = vadd.xlane.f32.xlu1 %v193_v9  ;;  %v190_v10 = vsel %vm189_vm5, %v187_v8, 0.0 }
 0x1a9   :  { %191 = vadd.xlane.f32.xlu0 %v190_v10 }
 0x231   :  { %v195_v11 = vpop.xlane.xlu1 %194 }
 0x232   :  { %v207_v12 = vrot.slane %v195_v11, %v340_v17  ;;  %v192_v13 = vpop.xlane.xlu0 %191 }
 0x233   :  { %v203_v14 = vrot.slane %v192_v13, %v340_v17 }
 0x235   :  { %v209_v15 = vsel %vm208_vm6, %v207_v12, %v203_v14 }
 0x236   :  { %212 = vst.msk [vmem:[#allocation3] sm:$0x3] %vm211_vm7, %v209_v15 }
 0x237   :  { %265 = shalt.err (!%p262_p4)
}
 0x238   :  { %222 = dma.vmem_to_hbm [thread:$0]  %s220_s11, 32, %s364_s6, [#allocation4]  }
 0x239   :  { %274 = dma.done.wait [#allocation4], 32  }
 0x23a   :  { %275 = vsyncadd [#allocation4], 4294967264 }
 0x23b   :  { %226 = vsyncpa [#allocation4], 1 }

// kernel: model_bert_forward.2
= control target key start
LH: loop header
LB: loop body
LE: loop exit
PB: predicated region body
PF: predicated region fallthrough
CT: control target
= control target key end

     0   :  { %v14305_v0 = vmov 0   ;;  %v14306_v31 = vmov 1   ;;  %v67_v57 = vlaneseq  ;;  %v14307_v61 = vmov 1.0   ;;  %s14310_s20 = smov 96   ;;  %s17166_s0 = inlined_call_operand.vmem [shape: s32[128,2], index: 0, kind: input, shape index: {}]   ;;  %s17167_s1 = inlined_call_operand.vmem [shape: f32[128,64], index: 1, kind: input, shape index: {}]   ;;  %s17168_s3 = inlined_call_operand.vmem [shape: f32[64,128], index: 3, kind: input, shape index: {}]   ;;  %s17169_s7 = inlined_call_operand.vmem [shape: f32[64,128], index: 7, kind: input, shape index: {}]   ;;  %s17170_s5 = inlined_call_operand.vmem [shape: f32[64,128], index: 5, kind: input, shape index: {}]   ;;  %s17171_s2 = inlined_call_operand.vmem [shape: f32[2,64], index: 2, kind: input, shape index: {}]   ;;  %s17172_s4 = inlined_call_operand.vmem [shape: f32[1,128], index: 4, kind: input, shape index: {}]   ;;  %s17173_s6 = inlined_call_operand.vmem [shape: f32[1,128], index: 6, kind: input, shape index: {}]   ;;  %s17174_s8 = inlined_call_operand.vmem [shape: f32[1,128], index: 8, kind: input, shape index: {}]   ;;  %s17175_s9 = inlined_call_operand.vmem [shape: f32[128,32], index: 9, kind: input, shape index: {}]   ;;  %s17176_s10 = inlined_call_operand.vmem [shape: f32[1,32], index: 10, kind: input, shape index: {}]   ;;  %s17177_s11 = inlined_call_operand.vmem [shape: f32[1,32], index: 11, kind: input, shape index: {}]   ;;  %s17178_s13 = inlined_call_operand.vmem [shape: f32[128,128], index: 13, kind: input, shape index: {}]   ;;  %s17179_s12 = inlined_call_operand.<no memory space> [shape: f32[1,1], index: 12, kind: input, shape index: {}]   ;;  %s17180_s14 = inlined_call_operand.vmem [shape: f32[1,128], index: 14, kind: input, shape index: {}]   ;;  %s17181_s15 = inlined_call_operand.vmem [shape: f32[16,128], index: 15, kind: output, shape index: {}]  }
   0x1   :  { %13948 = vset.pattern.permute.xlu1 %v14305_v0  ;;  %13947 = vset.pattern.permute.xlu0 %v14305_v0  ;;  %v14398_v1 = vld [vmem:[%s17166_s0 + $0x10] sm:$0xff]  ;;  %v14403_v2 = vld [vmem:[%s17166_s0] sm:$0xff]  ;;  %v14410_v3 = vld [vmem:[%s17166_s0 + $0x18] sm:$0xff] }
   0x2   :  { %76 = vperm.xlu1 %13948, %v14398_v1   ;;  %70 = vperm.xlu0 %13947, %v14403_v2   ;;  %v14415_v4 = vld [vmem:[%s17166_s0 + $0x8] sm:$0xff]  ;;  %v180_v5 = vld [vmem:[%s17167_s1 + $0x78] sm:$0xff]  ;;  %v179_v6 = vld [vmem:[%s17167_s1 + $0x70] sm:$0xff]  ;;  %vm181_vm0 = vcmp.eq.s32.totalorder %v14403_v2, 0  ;;  %vm183_vm2 = vcmp.eq.s32.totalorder %v14398_v1, 0  ;;  %vm184_vm3 = vcmp.eq.s32.totalorder %v14410_v3, 0 }
   0x3   :  { %v14428_v7 = vld [vmem:[%s17166_s0 + $0x28] sm:$0xff]  ;;  %v14433_v8 = vld [vmem:[%s17166_s0 + $0x20] sm:$0xff]  ;;  %13016 = vmatprep.subr.mxu0 %v180_v5  ;;  %v14443_v10 = vld [vmem:[%s17166_s0 + $0x38] sm:$0xff]  ;;  %vm182_vm1 = vcmp.eq.s32.totalorder %v14415_v4, 0  ;;  %v199_v32 = vsel %vm181_vm0, 1, %v14305_v0  ;;  %v201_v34 = vsel %vm183_vm2, 1, %v14305_v0 }
   0x4   :  { %13017 = vmatpush3.msra.mxu0 %v180_v5  ;;  %v178_v9 = vld [vmem:[%s17167_s1 + $0x68] sm:$0xff]  ;;  %v14448_v11 = vld [vmem:[%s17166_s0 + $0x30] sm:$0xff]  ;;  %v177_v12 = vld [vmem:[%s17167_s1 + $0x60] sm:$0xff]  ;;  %v200_v29 = vsel %vm182_vm1, 1, %v14305_v0  ;;  %v202_v36 = vsel %vm184_vm3, 1, %v14305_v0  ;;  %vm185_vm4 = vcmp.eq.s32.totalorder %v14433_v8, 0 }
   0x5   :  { %13018 = vmatprep.subr.mxu0 %v179_v6  ;;  %v176_v13 = vld [vmem:[%s17167_s1 + $0x58] sm:$0xff]  ;;  %v14461_v14 = vld [vmem:[%s17166_s0 + $0x48] sm:$0xff]  ;;  %v14466_v15 = vld [vmem:[%s17166_s0 + $0x40] sm:$0xff]  ;;  %vm186_vm5 = vcmp.eq.s32.totalorder %v14428_v7, 0  ;;  %v203_v38 = vsel %vm185_vm4, 1, %v14305_v0  ;;  %vm187_vm6 = vcmp.eq.s32.totalorder %v14448_v11, 0 }
   0x6   :  { %79 = vperm.xlu1 %13948, %v14410_v3   ;;  %73 = vperm.xlu0 %13947, %v14415_v4   ;;  %v175_v16 = vld [vmem:[%s17167_s1 + $0x50] sm:$0xff]  ;;  %v14476_v17 = vld [vmem:[%s17166_s0 + $0x58] sm:$0xff]  ;;  %v174_v19 = vld [vmem:[%s17167_s1 + $0x48] sm:$0xff]  ;;  %v204_v39 = vsel %vm186_vm5, 1, %v14305_v0  ;;  %vm188_vm7 = vcmp.eq.s32.totalorder %v14443_v10, 0  ;;  %v205_v40 = vsel %vm187_vm6, 1, %v14305_v0 }
   0x7   :  { %13019 = vmatpush3.msra.mxu0 %v179_v6  ;;  %v14481_v18 = vld [vmem:[%s17166_s0 + $0x50] sm:$0xff]  ;;  %v173_v20 = vld [vmem:[%s17167_s1 + $0x40] sm:$0xff]  ;;  %v14494_v21 = vld [vmem:[%s17166_s0 + $0x68] sm:$0xff]  ;;  %v206_v41 = vsel %vm188_vm7, 1, %v14305_v0  ;;  %vm189_vm8 = vcmp.eq.s32.totalorder %v14466_v15, 0  ;;  %vm190_vm9 = vcmp.eq.s32.totalorder %v14461_v14, 0 }
   0x8   :  { %13020 = vmatprep.subr.mxu0 %v178_v9  ;;  %v14499_v22 = vld [vmem:[%s17166_s0 + $0x60] sm:$0xff]  ;;  %v172_v23 = vld [vmem:[%s17167_s1 + $0x38] sm:$0xff]  ;;  %v14514_v25 = vld [vmem:[%s17166_s0 + $0x70] sm:$0xff]  ;;  %v207_v42 = vsel %vm189_vm8, 1, %v14305_v0  ;;  %v208_v43 = vsel %vm190_vm9, 1, %v14305_v0  ;;  %vm191_vm10 = vcmp.eq.s32.totalorder %v14481_v18, 0 }
   0x9   :  { %13021 = vmatpush3.msra.mxu0 %v178_v9  ;;  %v14509_v24 = vld [vmem:[%s17166_s0 + $0x78] sm:$0xff]  ;;  %v171_v26 = vld [vmem:[%s17167_s1 + $0x30] sm:$0xff]  ;;  %v170_v27 = vld [vmem:[%s17167_s1 + $0x28] sm:$0xff]  ;;  %vm192_vm11 = vcmp.eq.s32.totalorder %v14476_v17, 0  ;;  %v209_v47 = vsel %vm191_vm10, 1, %v14305_v0  ;;  %vm193_vm12 = vcmp.eq.s32.totalorder %v14499_v22, 0 }
   0xa   :  { %85 = vperm.xlu1 %13948, %v14428_v7   ;;  %82 = vperm.xlu0 %13947, %v14433_v8   ;;  %v169_v28 = vld [vmem:[%s17167_s1 + $0x20] sm:$0xff]  ;;  %v168_v30 = vld [vmem:[%s17167_s1 + $0x18] sm:$0xff]  ;;  %v167_v33 = vld [vmem:[%s17167_s1 + $0x10] sm:$0xff]  ;;  %v210_v49 = vsel %vm192_vm11, 1, %v14305_v0  ;;  %vm194_vm13 = vcmp.eq.s32.totalorder %v14494_v21, 0  ;;  %v211_v51 = vsel %vm193_vm12, 1, %v14305_v0 }
   0xb   :  { %13022 = vmatprep.subr.mxu0 %v177_v12  ;;  %v166_v35 = vld [vmem:[%s17167_s1 + $0x8] sm:$0xff]  ;;  %v165_v37 = vld [vmem:[%s17167_s1] sm:$0xff]  ;;  %v455_v44 = vld [vmem:[%s17168_s3 + $0x38] sm:$0xff]  ;;  %v212_v53 = vsel %vm194_vm13, 1, %v14305_v0  ;;  %vm195_vm14 = vcmp.eq.s32.totalorder %v14514_v25, 0  ;;  %vm196_vm15 = vcmp.eq.s32.totalorder %v14509_v24, 0 }
   0xc   :  { %13023 = vmatpush3.msra.mxu0 %v177_v12  ;;  %v14566_v45 = vld [vmem:[%s17169_s7 + $0x38] sm:$0xff]  ;;  %v454_v46 = vld [vmem:[%s17168_s3 + $0x30] sm:$0xff]  ;;  %13072 = vmatprep.subr.mxu1 %v455_v44  ;;  %v453_v48 = vld [vmem:[%s17168_s3 + $0x28] sm:$0xff]  ;;  %v213_v55 = vsel %vm195_vm14, 1, %v14305_v0  ;;  %v214_v56 = vsel %vm196_vm15, 1, %v14305_v0  ;;  %v14595_v58 = vand.u32 127, %v67_v57 }
   0xd   :  { %13024 = vmatprep.subr.mxu0 %v176_v13  ;;  %13073 = vmatpush3.msra.mxu1 %v455_v44  ;;  %v452_v50 = vld [vmem:[%s17168_s3 + $0x20] sm:$0xff]  ;;  %v451_v52 = vld [vmem:[%s17168_s3 + $0x18] sm:$0xff]  ;;  %v450_v54 = vld [vmem:[%s17168_s3 + $0x10] sm:$0xff]  ;;  %s14312_s1 = smov 32  }
   0xe   :  { %91 = vperm.xlu1 %13948, %v14443_v10   ;;  %88 = vperm.xlu0 %13947, %v14448_v11   ;;  %v14603_v0 = vld [vmem:[%s17169_s7 + $0x30] sm:$0xff]  ;;  %v14609_v1 = vld [vmem:[%s17169_s7 + $0x28] sm:$0xff]  ;;  %v14618_v4 = vld [vmem:[%s17169_s7 + $0x20] sm:$0xff] }
   0xf   :  { %13025 = vmatpush3.msra.mxu0 %v176_v13  ;;  %13074 = vmatprep.subr.mxu1 %v454_v46  ;;  %v14625_v5 = vld [vmem:[%s17169_s7 + $0x18] sm:$0xff] }
  0x10   :  { %13026 = vmatprep.subr.mxu0 %v175_v16  ;;  %13075 = vmatpush3.msra.mxu1 %v454_v46 }
  0x11   :  { %13027 = vmatpush3.msra.mxu0 %v175_v16  ;;  %13076 = vmatprep.subr.mxu1 %v453_v48  ;;  %v14645_v16 = vld [vmem:[%s17169_s7 + $0x10] sm:$0xff] }
  0x12   :  { %97 = vperm.xlu1 %13948, %v14461_v14   ;;  %94 = vperm.xlu0 %13947, %v14466_v15  }
  0x13   :  { %13028 = vmatprep.subr.mxu0 %v174_v19  ;;  %13077 = vmatpush3.msra.mxu1 %v453_v48 }
  0x14   :  { %13029 = vmatpush3.msra.mxu0 %v174_v19  ;;  %13078 = vmatprep.subr.mxu1 %v452_v50  ;;  %v448_v19 = vld [vmem:[%s17168_s3] sm:$0xff] }
  0x15   :  { %13030 = vmatprep.subr.mxu0 %v173_v20  ;;  %13079 = vmatpush3.msra.mxu1 %v452_v50 }
  0x16   :  { %103 = vperm.xlu1 %13948, %v14476_v17   ;;  %100 = vperm.xlu0 %13947, %v14481_v18   ;;  %v449_v17 = vld [vmem:[%s17168_s3 + $0x8] sm:$0xff] }
  0x17   :  { %13031 = vmatpush3.msra.mxu0 %v173_v20  ;;  %13080 = vmatprep.subr.mxu1 %v451_v52  ;;  %v14655_v18 = vld [vmem:[%s17169_s7 + $0x8] sm:$0xff]  ;;  %v14665_v20 = vld [vmem:[%s17169_s7] sm:$0xff] }
  0x18   :  { %13032 = vmatprep.subr.mxu0 %v172_v23  ;;  %13081 = vmatpush3.msra.mxu1 %v451_v52 }
  0x19   :  { %13033 = vmatpush3.msra.mxu0 %v172_v23  ;;  %13082 = vmatprep.subr.mxu1 %v450_v54 }
  0x1a   :  { %109 = vperm.xlu1 %13948, %v14494_v21   ;;  %106 = vperm.xlu0 %13947, %v14499_v22   ;;  %v664_v21 = vld [vmem:[%s17170_s5 + $0x38] sm:$0xff] }
  0x1b   :  { %13034 = vmatprep.subr.mxu0 %v171_v26  ;;  %13083 = vmatpush3.msra.mxu1 %v450_v54 }
  0x1c   :  { %13035 = vmatpush3.msra.mxu0 %v171_v26  ;;  %13084 = vmatprep.subr.mxu1 %v449_v17 }
  0x1d   :  { %13036 = vmatprep.subr.mxu0 %v170_v27  ;;  %13085 = vmatpush3.msra.mxu1 %v449_v17 }
  0x1e   :  { %115 = vperm.xlu1 %13948, %v14509_v24   ;;  %112 = vperm.xlu0 %13947, %v14514_v25  }
  0x1f   :  { %13037 = vmatpush3.msra.mxu0 %v170_v27  ;;  %13086 = vmatprep.subr.mxu1 %v448_v19 }
  0x20   :  { %13038 = vmatprep.subr.mxu0 %v169_v28  ;;  %13087 = vmatpush3.msra.mxu1 %v448_v19 }
  0x21   :  { %13039 = vmatpush3.msra.mxu0 %v169_v28  ;;  %13112 = vmatprep.subr.mxu1 %v664_v21  ;;  %v14675_v28 = vld [vmem:[%s17171_s2] ss:$0 sm:$0xff] }
  0x22   :  { %13950 = vset.pattern.permute.xlu1 %v14306_v31  ;;  %13949 = vset.pattern.permute.xlu0 %v14306_v31 }
  0x23   :  { %219 = vperm.xlu1 %13950, %v200_v29   ;;  %13040 = vmatprep.subr.mxu0 %v168_v30  ;;  %v14680_v29 = vld [vmem:[%s17171_s2 + $0x1] ss:$0 sm:$0xff] }
  0x24   :  { %216 = vperm.xlu0 %13949, %v199_v32   ;;  %13041 = vmatpush3.msra.mxu0 %v168_v30 }
  0x25   :  { %13042 = vmatprep.subr.mxu0 %v167_v33 }
  0x26   :  { %13043 = vmatpush3.msra.mxu0 %v167_v33 }
  0x27   :  { %222 = vperm.xlu1 %13950, %v201_v34   ;;  %13044 = vmatprep.subr.mxu0 %v166_v35 }
  0x28   :  { %225 = vperm.xlu0 %13949, %v202_v36   ;;  %13045 = vmatpush3.msra.mxu0 %v166_v35 }
  0x29   :  { %13046 = vmatprep.subr.mxu0 %v165_v37 }
  0x2a   :  { %13047 = vmatpush3.msra.mxu0 %v165_v37 }
  0x2b   :  { %228 = vperm.xlu1 %13950, %v203_v38   ;;  %13152 = vmatprep.subr.mxu0 %v14566_v45 }
  0x2c   :  { %231 = vperm.xlu0 %13949, %v204_v39   ;;  %v663_v39 = vld [vmem:[%s17170_s5 + $0x30] sm:$0xff] }
  0x2f   :  { %234 = vperm.xlu1 %13950, %v205_v40  }
  0x30   :  { %237 = vperm.xlu0 %13949, %v206_v41  }
  0x33   :  { %240 = vperm.xlu1 %13950, %v207_v42  }
  0x34   :  { %243 = vperm.xlu0 %13949, %v208_v43  }
  0x37   :  { %246 = vperm.xlu1 %13950, %v209_v47  }
  0x38   :  { %249 = vperm.xlu0 %13949, %v210_v49   ;;  %v662_v49 = vld [vmem:[%s17170_s5 + $0x28] sm:$0xff] }
  0x3b   :  { %252 = vperm.xlu1 %13950, %v211_v51  }
  0x3c   :  { %255 = vperm.xlu0 %13949, %v212_v53  }
  0x3f   :  { %258 = vperm.xlu1 %13950, %v213_v55  }
  0x40   :  { %261 = vperm.xlu0 %13949, %v214_v56  }
  0x7d   :  { %v77_v59 = vpop.permute.xlu1 %76  ;;  %v71_v60 = vpop.permute.xlu0 %70 }
  0x7e   :  { %vm117_vm0 = vcmp.eq.s32.totalorder %v71_v60, %v14595_v58  ;;  %vm119_vm1 = vcmp.eq.s32.totalorder %v77_v59, %v14595_v58 }
  0x7f   :  { %13048 = vmatprep.mubr.msk.f32.mxu0 %vm117_vm0, %v14307_v61 }
  0x81   :  { %v80_v62 = vpop.permute.xlu1 %79  ;;  %v74_v63 = vpop.permute.xlu0 %73 }
  0x82   :  { %vm118_vm2 = vcmp.eq.s32.totalorder %v74_v63, %v14595_v58  ;;  %vm120_vm3 = vcmp.eq.s32.totalorder %v80_v62, %v14595_v58 }
  0x83   :  { %13049 = vmatmul.mubr.msk.f32.vlgmr.msra.gmra.mxu0 %vm118_vm2, %v14307_v61  ;;  %vm463_vm2 = vcmask 523264  }
  0x84   :  { %13051 = vmatprep.mubr.msk.f32.mxu0 %vm119_vm1, %v14307_v61  ;;  %13153 = vmatpush3.msra.mxu0 %v14566_v45 }
  0x85   :  { %v86_v2 = vpop.permute.xlu1 %85  ;;  %v83_v3 = vpop.permute.xlu0 %82  ;;  %13154 = vmatprep.subr.mxu0 %v14603_v0 }
  0x86   :  { %vm121_vm4 = vcmp.eq.s32.totalorder %v83_v3, %v14595_v58  ;;  %13155 = vmatpush3.msra.mxu0 %v14603_v0  ;;  %vm122_vm5 = vcmp.eq.s32.totalorder %v86_v2, %v14595_v58  ;;  %v660_v3 = vld [vmem:[%s17170_s5 + $0x18] sm:$0xff] }
  0x87   :  { %13052 = vmatmul.mubr.msk.f32.gmra.mxu0 %vm120_vm3, %v14307_v61  ;;  %13156 = vmatprep.subr.mxu0 %v14609_v1 }
  0x88   :  { %13054 = vmatprep.mubr.msk.f32.mxu0 %vm121_vm4, %v14307_v61  ;;  %13157 = vmatpush3.msra.mxu0 %v14609_v1 }
  0x89   :  { %v92_v6 = vpop.permute.xlu1 %91  ;;  %v89_v7 = vpop.permute.xlu0 %88  ;;  %13158 = vmatprep.subr.mxu0 %v14618_v4 }
  0x8a   :  { %vm123_vm6 = vcmp.eq.s32.totalorder %v89_v7, %v14595_v58  ;;  %13159 = vmatpush3.msra.mxu0 %v14618_v4  ;;  %vm124_vm7 = vcmp.eq.s32.totalorder %v92_v6, %v14595_v58 }
  0x8b   :  { %13055 = vmatmul.mubr.msk.f32.gmra.mxu0 %vm122_vm5, %v14307_v61  ;;  %13160 = vmatprep.subr.mxu0 %v14625_v5 }
  0x8c   :  { %13057 = vmatprep.mubr.msk.f32.mxu0 %vm123_vm6, %v14307_v61  ;;  %13161 = vmatpush3.msra.mxu0 %v14625_v5 }
  0x8d   :  { %v98_v8 = vpop.permute.xlu1 %97  ;;  %v95_v9 = vpop.permute.xlu0 %94  ;;  %13162 = vmatprep.subr.mxu0 %v14645_v16 }
  0x8e   :  { %vm125_vm8 = vcmp.eq.s32.totalorder %v95_v9, %v14595_v58  ;;  %vm126_vm9 = vcmp.eq.s32.totalorder %v98_v8, %v14595_v58  ;;  %13163 = vmatpush3.msra.mxu0 %v14645_v16 }
  0x8f   :  { %13058 = vmatmul.mubr.msk.f32.gmra.mxu0 %vm124_vm7, %v14307_v61  ;;  %13164 = vmatprep.subr.mxu0 %v14655_v18 }
  0x90   :  { %13060 = vmatprep.mubr.msk.f32.mxu0 %vm125_vm8, %v14307_v61  ;;  %13165 = vmatpush3.msra.mxu0 %v14655_v18 }
  0x91   :  { %v104_v10 = vpop.permute.xlu1 %103  ;;  %v101_v11 = vpop.permute.xlu0 %100  ;;  %13166 = vmatprep.subr.mxu0 %v14665_v20 }
  0x92   :  { %vm127_vm10 = vcmp.eq.s32.totalorder %v101_v11, %v14595_v58  ;;  %vm128_vm11 = vcmp.eq.s32.totalorder %v104_v10, %v14595_v58  ;;  %13167 = vmatpush3.msra.mxu0 %v14665_v20 }
  0x93   :  { %13061 = vmatmul.mubr.msk.f32.gmra.mxu0 %vm126_vm9, %v14307_v61 }
  0x94   :  { %13063 = vmatprep.mubr.msk.f32.mxu0 %vm127_vm10, %v14307_v61 }
  0x95   :  { %v110_v12 = vpop.permute.xlu1 %109  ;;  %v107_v13 = vpop.permute.xlu0 %106 }
  0x96   :  { %vm129_vm12 = vcmp.eq.s32.totalorder %v107_v13, %v14595_v58  ;;  %vm130_vm13 = vcmp.eq.s32.totalorder %v110_v12, %v14595_v58 }
  0x97   :  { %13064 = vmatmul.mubr.msk.f32.gmra.mxu0 %vm128_vm11, %v14307_v61 }
  0x98   :  { %13066 = vmatprep.mubr.msk.f32.mxu0 %vm129_vm12, %v14307_v61 }
  0x99   :  { %v113_v14 = vpop.permute.xlu0 %112  ;;  %v116_v15 = vpop.permute.xlu1 %115 }
  0x9a   :  { %vm131_vm14 = vcmp.eq.s32.totalorder %v113_v14, %v14595_v58  ;;  %vm132_vm15 = vcmp.eq.s32.totalorder %v116_v15, %v14595_v58  ;;  %v661_v58 = vld [vmem:[%s17170_s5 + $0x20] sm:$0xff]  ;;  %v659_v14 = vld [vmem:[%s17170_s5 + $0x10] sm:$0xff] }
  0x9b   :  { %13067 = vmatmul.mubr.msk.f32.gmra.mxu0 %vm130_vm13, %v14307_v61 }
  0x9c   :  { %13069 = vmatprep.mubr.msk.f32.mxu0 %vm131_vm14, %v14307_v61 }
  0x9e   :  { %v220_v22 = vpop.permute.xlu1 %219 }
  0x9f   :  { %13070 = vmatmul.mubr.msk.f32.gmra.mxu0 %vm132_vm15, %v14307_v61  ;;  %v217_v23 = vpop.permute.xlu0 %216  ;;  %vm264_vm1 = vcmp.eq.s32.totalorder %v220_v22, 1  ;;  %v658_v22 = vld [vmem:[%s17170_s5 + $0x8] sm:$0xff] }
  0xa0   :  { %vm263_vm0 = vcmp.eq.s32.totalorder %v217_v23, 1  ;;  %v288_v34 = vsel %vm264_vm1, %v14675_v28, %v14680_v29  ;;  %vm14309_vm1 = vmmov 0  }
  0xa1   :  { %v287_v32 = vsel %vm263_vm0, %v14675_v28, %v14680_v29 }
  0xa2   :  { %v223_v24 = vpop.permute.xlu1 %222 }
  0xa3   :  { %v226_v25 = vpop.permute.xlu0 %225  ;;  %vm265_vm3 = vcmp.eq.s32.totalorder %v223_v24, 1 }
  0xa4   :  { %vm266_vm4 = vcmp.eq.s32.totalorder %v226_v25, 1  ;;  %v289_v41 = vsel %vm265_vm3, %v14675_v28, %v14680_v29  ;;  %vm2242_vm3 = vcmask 64512  }
  0xa5   :  { %v290_v44 = vsel %vm266_vm4, %v14675_v28, %v14680_v29  ;;  %vm6211_vm4 = vcmask 523520  }
  0xa6   :  { %v229_v26 = vpop.permute.xlu1 %228 }
  0xa7   :  { %v232_v27 = vpop.permute.xlu0 %231  ;;  %vm267_vm5 = vcmp.eq.s32.totalorder %v229_v26, 1 }
  0xa8   :  { %vm268_vm6 = vcmp.eq.s32.totalorder %v232_v27, 1  ;;  %v291_v50 = vsel %vm267_vm5, %v14675_v28, %v14680_v29  ;;  %v657_v27 = vld [vmem:[%s17170_s5] sm:$0xff]  ;;  %vm8900_vm5 = vcmask 785920  }
  0xa9   :  { %v292_v52 = vsel %vm268_vm6, %v14675_v28, %v14680_v29  ;;  %vm11589_vm6 = vcmask 1048320  }
  0xaa   :  { %v235_v30 = vpop.permute.xlu1 %234 }
  0xab   :  { %v238_v33 = vpop.permute.xlu0 %237  ;;  %vm269_vm7 = vcmp.eq.s32.totalorder %v235_v30, 1 }
  0xac   :  { %vm270_vm8 = vcmp.eq.s32.totalorder %v238_v33, 1  ;;  %v293_v59 = vsel %vm269_vm7, %v14675_v28, %v14680_v29  ;;  %vm12222_vm7 = vcmask 1041409  }
  0xad   :  { %v294_v61 = vsel %vm270_vm8, %v14675_v28, %v14680_v29  ;;  %vm12224_vm8 = vcmask 1042434  }
  0xae   :  { %v241_v40 = vpop.permute.xlu1 %240 }
  0xaf   :  { %v244_v43 = vpop.permute.xlu0 %243  ;;  %vm271_vm9 = vcmp.eq.s32.totalorder %v241_v40, 1 }
  0xb0   :  { %vm272_vm10 = vcmp.eq.s32.totalorder %v244_v43, 1  ;;  %v295_v7 = vsel %vm271_vm9, %v14675_v28, %v14680_v29  ;;  %vm12226_vm9 = vcmask 1043459  }
  0xb1   :  { %v296_v10 = vsel %vm272_vm10, %v14675_v28, %v14680_v29  ;;  %vm12228_vm10 = vcmask 1044484  }
  0xb2   :  { %v247_v54 = vpop.permute.xlu1 %246 }
  0xb3   :  { %v250_v57 = vpop.permute.xlu0 %249  ;;  %vm273_vm11 = vcmp.eq.s32.totalorder %v247_v54, 1 }
  0xb4   :  { %vm274_vm12 = vcmp.eq.s32.totalorder %v250_v57, 1  ;;  %v297_v15 = vsel %vm273_vm11, %v14675_v28, %v14680_v29  ;;  %v14921_v57 = vld [vmem:[%s17173_s6] ss:$0 sm:$0xff]  ;;  %vm12230_vm11 = vcmask 1045509  }
  0xb5   :  { %v298_v19 = vsel %vm274_vm12, %v14675_v28, %v14680_v29  ;;  %vm12232_vm12 = vcmask 1046534  }
  0xb6   :  { %v253_v6 = vpop.permute.xlu1 %252 }
  0xb7   :  { %v256_v9 = vpop.permute.xlu0 %255  ;;  %vm275_vm13 = vcmp.eq.s32.totalorder %v253_v6, 1 }
  0xb8   :  { %vm276_vm14 = vcmp.eq.s32.totalorder %v256_v9, 1  ;;  %v299_v30 = vsel %vm275_vm13, %v14675_v28, %v14680_v29  ;;  %vm12234_vm13 = vcmask 1047559  }
  0xba   :  { %v259_v23 = vpop.permute.xlu1 %258 }
  0xbb   :  { %v262_v26 = vpop.permute.xlu0 %261  ;;  %vm277_vm15 = vcmp.eq.s32.totalorder %v259_v23, 1 }
  0xbc   :  { %vm278_vm0 = vcmp.eq.s32.totalorder %v262_v26, 1 }
  0xbd   :  { %v302_v40 = vsel %vm278_vm0, %v14675_v28, %v14680_v29 }
 0x143   :  { %v13050_v31 = vpop.f32.mrf.mxu0 }
 0x144   :  { %v14688_v37 = vadd.f32 %v13050_v31, %v288_v34 }
 0x145   :  { %v369_v35 = vpop.f32.mrf.mxu0 }
 0x146   :  { %v14686_v36 = vadd.f32 %v369_v35, %v287_v32  ;;  %v300_v32 = vsel %vm276_vm14, %v14675_v28, %v14680_v29 }
 0x147   :  { %v13053_v38 = vpop.f32.mrf.mxu0 }
 0x148   :  { %13088 = vmatprep.mubr.msk.f32.mxu1 %vm463_vm2, %v14686_v36  ;;  %13168 = vmatprep.mubr.msk.f32.mxu0 %vm463_vm2, %v14686_v36  ;;  %v14707_v47 = vadd.f32 %v13053_v38, %v290_v44  ;;  %v301_v38 = vsel %vm277_vm15, %v14675_v28, %v14680_v29 }
 0x149   :  { %v379_v42 = vpop.f32.mrf.mxu0  ;;  %13089 = vmatmul.mubr.msk.f32.vlgmr.msra.gmra.mxu1 %vm463_vm2, %v14688_v37  ;;  %13169 = vmatmul.mubr.msk.f32.vlgmr.msra.gmra.mxu0 %vm463_vm2, %v14688_v37 }
 0x14a   :  { %v14705_v46 = vadd.f32 %v379_v42, %v289_v41  ;;  %13113 = vmatpush3.msra.mxu1 %v664_v21 }
 0x14b   :  { %v13056_v48 = vpop.f32.mrf.mxu0  ;;  %13114 = vmatprep.subr.mxu1 %v663_v39 }
 0x14c   :  { %13091 = vmatprep.mubr.msk.f32.mxu1 %vm463_vm2, %v14705_v46  ;;  %13171 = vmatprep.mubr.msk.f32.mxu0 %vm463_vm2, %v14705_v46  ;;  %v14726_v55 = vadd.f32 %v13056_v48, %v292_v52 }
 0x14d   :  { %v389_v51 = vpop.f32.mrf.mxu0  ;;  %13092 = vmatmul.mubr.msk.f32.gmra.mxu1 %vm463_vm2, %v14707_v47  ;;  %13172 = vmatmul.mubr.msk.f32.gmra.mxu0 %vm463_vm2, %v14707_v47 }
 0x14e   :  { %v14724_v53 = vadd.f32 %v389_v51, %v291_v50  ;;  %13115 = vmatpush3.msra.mxu1 %v663_v39 }
 0x14f   :  { %v13059_v56 = vpop.f32.mrf.mxu0  ;;  %13116 = vmatprep.subr.mxu1 %v662_v49 }
 0x150   :  { %13094 = vmatprep.mubr.msk.f32.mxu1 %vm463_vm2, %v14724_v53  ;;  %13174 = vmatprep.mubr.msk.f32.mxu0 %vm463_vm2, %v14724_v53  ;;  %v14745_v63 = vadd.f32 %v13059_v56, %v294_v61 }
 0x151   :  { %v399_v60 = vpop.f32.mrf.mxu0  ;;  %13095 = vmatmul.mubr.msk.f32.gmra.mxu1 %vm463_vm2, %v14726_v55  ;;  %13175 = vmatmul.mubr.msk.f32.gmra.mxu0 %vm463_vm2, %v14726_v55 }
 0x152   :  { %v14743_v62 = vadd.f32 %v399_v60, %v293_v59  ;;  %13117 = vmatpush3.msra.mxu1 %v662_v49 }
 0x153   :  { %v13062_v2 = vpop.f32.mrf.mxu0  ;;  %13118 = vmatprep.subr.mxu1 %v661_v58 }
 0x154   :  { %13097 = vmatprep.mubr.msk.f32.mxu1 %vm463_vm2, %v14743_v62  ;;  %13177 = vmatprep.mubr.msk.f32.mxu0 %vm463_vm2, %v14743_v62  ;;  %v14764_v12 = vadd.f32 %v13062_v2, %v296_v10 }
 0x155   :  { %v409_v8 = vpop.f32.mrf.mxu0  ;;  %13098 = vmatmul.mubr.msk.f32.gmra.mxu1 %vm463_vm2, %v14745_v63  ;;  %13178 = vmatmul.mubr.msk.f32.gmra.mxu0 %vm463_vm2, %v14745_v63 }
 0x156   :  { %v14762_v11 = vadd.f32 %v409_v8, %v295_v7  ;;  %13119 = vmatpush3.msra.mxu1 %v661_v58 }
 0x157   :  { %v13065_v13 = vpop.f32.mrf.mxu0  ;;  %13120 = vmatprep.subr.mxu1 %v660_v3 }
 0x158   :  { %13100 = vmatprep.mubr.msk.f32.mxu1 %vm463_vm2, %v14762_v11  ;;  %13180 = vmatprep.mubr.msk.f32.mxu0 %vm463_vm2, %v14762_v11  ;;  %v425_v24 = vadd.f32 %v13065_v13, %v298_v19 }
 0x159   :  { %v419_v17 = vpop.f32.mrf.mxu0  ;;  %13101 = vmatmul.mubr.msk.f32.gmra.mxu1 %vm463_vm2, %v14764_v12  ;;  %13181 = vmatmul.mubr.msk.f32.gmra.mxu0 %vm463_vm2, %v14764_v12 }
 0x15a   :  { %v14781_v21 = vadd.f32 %v419_v17, %v297_v15  ;;  %13121 = vmatpush3.msra.mxu1 %v660_v3 }
 0x15b   :  { %v13068_v25 = vpop.f32.mrf.mxu0  ;;  %13122 = vmatprep.subr.mxu1 %v659_v14 }
 0x15c   :  { %13103 = vmatprep.mubr.msk.f32.mxu1 %vm463_vm2, %v14781_v21  ;;  %13123 = vmatpush3.msra.mxu1 %v659_v14  ;;  %v435_v34 = vadd.f32 %v13068_v25, %v300_v32 }
 0x15d   :  { %v429_v31 = vpop.f32.mrf.mxu0  ;;  %13104 = vmatmul.mubr.msk.f32.gmra.mxu1 %vm463_vm2, %v425_v24  ;;  %13124 = vmatprep.subr.mxu1 %v658_v22 }
 0x15e   :  { %v430_v33 = vadd.f32 %v429_v31, %v299_v30  ;;  %13125 = vmatpush3.msra.mxu1 %v658_v22 }
 0x15f   :  { %v13071_v35 = vpop.f32.mrf.mxu0  ;;  %13126 = vmatprep.subr.mxu1 %v657_v27 }
 0x160   :  { %13106 = vmatprep.mubr.msk.f32.mxu1 %vm463_vm2, %v430_v33  ;;  %13127 = vmatpush3.msra.mxu1 %v657_v27  ;;  %v445_v42 = vadd.f32 %v13071_v35, %v302_v40 }
 0x161   :  { %v439_v39 = vpop.f32.mrf.mxu0  ;;  %13107 = vmatmul.mubr.msk.f32.gmra.mxu1 %vm463_vm2, %v435_v34  ;;  %13923 = vmatprep.subr.mxu1 %v14566_v45 }
 0x162   :  { %v440_v41 = vadd.f32 %v439_v39, %v301_v38 }
 0x164   :  { %13109 = vmatprep.mubr.msk.f32.mxu1 %vm463_vm2, %v440_v41 }
 0x165   :  { %13110 = vmatmul.mubr.msk.f32.gmra.mxu1 %vm463_vm2, %v445_v42 }
 0x166   :  { %13128 = vmatprep.mubr.msk.f32.mxu1 %vm463_vm2, %v14686_v36 }
 0x169   :  { %13129 = vmatmul.mubr.msk.f32.vlgmr.msra.gmra.mxu1 %vm463_vm2, %v14688_v37 }
 0x16a   :  { %13131 = vmatprep.mubr.msk.f32.mxu1 %vm463_vm2, %v14705_v46  ;;  %13931 = vmatpush3.msra.mxu1 %v14566_v45  ;;  %v17182_v45 = vmov 0.0  }
 0x16b   :  { %13924 = vmatprep.subr.mxu1 %v14603_v0  ;;  %13212 = vmatprep.subr.mxu0 %v17182_v45 }
 0x16c   :  { %13932 = vmatpush3.msra.mxu1 %v14603_v0  ;;  %13214 = vmatprep.mubr.msk.f32.mxu0 %vm14309_vm1, %v17182_v45  ;;  %v14863_v0 = vld [vmem:[%s17172_s4] ss:$0 sm:$0xff] }
 0x16d   :  { %13132 = vmatmul.mubr.msk.f32.gmra.mxu1 %vm463_vm2, %v14707_v47  ;;  %13925 = vmatprep.subr.mxu1 %v14609_v1 }
 0x16e   :  { %13134 = vmatprep.mubr.msk.f32.mxu1 %vm463_vm2, %v14724_v53  ;;  %13933 = vmatpush3.msra.mxu1 %v14609_v1 }
 0x16f   :  { %13926 = vmatprep.subr.mxu1 %v14618_v4 }
 0x170   :  { %13934 = vmatpush3.msra.mxu1 %v14618_v4 }
 0x171   :  { %13135 = vmatmul.mubr.msk.f32.gmra.mxu1 %vm463_vm2, %v14726_v55  ;;  %13927 = vmatprep.subr.mxu1 %v14625_v5 }
 0x172   :  { %13137 = vmatprep.mubr.msk.f32.mxu1 %vm463_vm2, %v14743_v62  ;;  %13935 = vmatpush3.msra.mxu1 %v14625_v5 }
 0x173   :  { %13928 = vmatprep.subr.mxu1 %v14645_v16 }
 0x174   :  { %13936 = vmatpush3.msra.mxu1 %v14645_v16 }
 0x175   :  { %13138 = vmatmul.mubr.msk.f32.gmra.mxu1 %vm463_vm2, %v14745_v63  ;;  %13929 = vmatprep.subr.mxu1 %v14655_v18 }
 0x176   :  { %13140 = vmatprep.mubr.msk.f32.mxu1 %vm463_vm2, %v14762_v11  ;;  %13937 = vmatpush3.msra.mxu1 %v14655_v18 }
 0x177   :  { %13930 = vmatprep.subr.mxu1 %v14665_v20 }
 0x178   :  { %13938 = vmatpush3.msra.mxu1 %v14665_v20 }
 0x179   :  { %13141 = vmatmul.mubr.msk.f32.gmra.mxu1 %vm463_vm2, %v14764_v12  ;;  %13192 = vmatprep.subr.mxu1 %v17182_v45 }
 0x17a   :  { %13143 = vmatprep.mubr.msk.f32.mxu1 %vm463_vm2, %v14781_v21 }
 0x17d   :  { %13144 = vmatmul.mubr.msk.f32.gmra.mxu1 %vm463_vm2, %v425_v24 }
 0x17e   :  { %13146 = vmatprep.mubr.msk.f32.mxu1 %vm463_vm2, %v430_v33 }
 0x181   :  { %13147 = vmatmul.mubr.msk.f32.gmra.mxu1 %vm463_vm2, %v435_v34 }
 0x182   :  { %13149 = vmatprep.mubr.msk.f32.mxu1 %vm463_vm2, %v440_v41 }
 0x185   :  { %13150 = vmatmul.mubr.msk.f32.gmra.mxu1 %vm463_vm2, %v445_v42 }
 0x186   :  { %13183 = vmatprep.mubr.msk.f32.mxu1 %vm463_vm2, %v14781_v21 }
 0x189   :  { %13184 = vmatmul.mubr.msk.f32.vlgmr.msra.gmra.mxu1 %vm463_vm2, %v425_v24 }
 0x18a   :  { %13186 = vmatprep.mubr.msk.f32.mxu1 %vm463_vm2, %v430_v33 }
 0x18d   :  { %13187 = vmatmul.mubr.msk.f32.gmra.mxu1 %vm463_vm2, %v435_v34 }
 0x18e   :  { %13189 = vmatprep.mubr.msk.f32.mxu1 %vm463_vm2, %v440_v41 }
 0x191   :  { %13190 = vmatmul.mubr.msk.f32.gmra.mxu1 %vm463_vm2, %v445_v42  ;;  %vm977_vm2 = vcmask 261120   ;;  %v15086_v42 = vld [vmem:[%s17174_s8] ss:$0 sm:$0xff]  ;;  %s14311_s8 = smov 64  }
 0x192   :  { %13194 = vmatprep.mubr.msk.f32.mxu1 %vm14309_vm1, %v17182_v45 }
 0x209   :  { %v13090_v1 = vpop.f32.mrf.mxu1  ;;  %v13170_v32 = vpop.f32.mrf.mxu0 }
 0x20a   :  { %v14866_v4 = vadd.f32 %v13090_v1, %v14863_v0 }
 0x20b   :  { %v578_v5 = vpop.f32.mrf.mxu1  ;;  %v898_v40 = vpop.f32.mrf.mxu0 }
 0x20c   :  { %17246 = vst [vmem:[#allocation4_spill] sm:$0xff] %v14866_v4  ;;  %v14869_v16 = vadd.f32 %v14863_v0, %v578_v5  ;;  %3601 = vrot.lane.b32.xlu0 %v14866_v4, %s14310_s20  ;;  %v15097_v5 = vadd.f32 %v15086_v42, %v898_v40 }
 0x20d   :  { %v13093_v18 = vpop.f32.mrf.mxu1 }
 0x20e   :  { %17247 = vst [vmem:[#allocation5_spill] sm:$0xff] %v14869_v16  ;;  %v14874_v20 = vadd.f32 %v13093_v18, %v14863_v0  ;;  %3523 = vrot.lane.b32.xlu1 %v14869_v16, %s14310_s20  ;;  %17270 = vst [vmem:[#allocation28_spill] sm:$0xff] %v15097_v5 }
 0x20f   :  { %v588_v28 = vpop.f32.mrf.mxu1 }
 0x210   :  { %17248 = vst [vmem:[#allocation6_spill] sm:$0xff] %v14874_v20  ;;  %v14879_v29 = vadd.f32 %v14863_v0, %v588_v28  ;;  %3757 = vrot.lane.b32.xlu0 %v14874_v20, %s14310_s20 }
 0x211   :  { %v13096_v36 = vpop.f32.mrf.mxu1 }
 0x212   :  { %17249 = vst [vmem:[#allocation7_spill] sm:$0xff] %v14879_v29  ;;  %v14884_v37 = vadd.f32 %v13096_v36, %v14863_v0  ;;  %3679 = vrot.lane.b32.xlu1 %v14879_v29, %s14310_s20 }
 0x213   :  { %v598_v43 = vpop.f32.mrf.mxu1 }
 0x214   :  { %17250 = vst [vmem:[#allocation8_spill] sm:$0xff] %v14884_v37  ;;  %v14889_v44 = vadd.f32 %v14863_v0, %v598_v43  ;;  %3913 = vrot.lane.b32.xlu0 %v14884_v37, %s14310_s20 }
 0x215   :  { %v14893_v46 = vpop.f32.mrf.mxu1 }
 0x216   :  { %17251 = vst [vmem:[#allocation9_spill] sm:$0xff] %v14889_v44  ;;  %3835 = vrot.lane.b32.xlu1 %v14889_v44, %s14310_s20  ;;  %v15040_v31 = vadd.f32 %v14893_v46, %v14863_v0 }
 0x217   :  { %v608_v47 = vpop.f32.mrf.mxu1 }
 0x218   :  { %v14898_v48 = vadd.f32 %v14863_v0, %v608_v47  ;;  %v15142_v47 = vadd.f32 %v13170_v32, %v15086_v42 }
 0x219   :  { %v14900_v49 = vpop.f32.mrf.mxu1 }
 0x21a   :  { %17252 = vst [vmem:[#allocation10_spill] sm:$0xff] %v14898_v48  ;;  %3991 = vrot.lane.b32.xlu1 %v14898_v48, %s14310_s20  ;;  %v15068_v39 = vadd.f32 %v14900_v49, %v14863_v0  ;;  %17276 = vst [vmem:[#allocation34_spill] sm:$0xff] %v15142_v47  ;;  %v15150_v49 = vpop.f32.mrf.mxu0 }
 0x21b   :  { %v14904_v50 = vpop.f32.mrf.mxu1 }
 0x21c   :  { %v15013_v23 = vadd.f32 %v14863_v0, %v14904_v50  ;;  %17267 = vst [vmem:[#allocation25_spill] sm:$0xff] %v15068_v39 }
 0x21d   :  { %v14906_v51 = vpop.f32.mrf.mxu1 }
 0x21e   :  { %v15101_v18 = vadd.f32 %v14906_v51, %v14863_v0 }
 0x21f   :  { %v14908_v52 = vpop.f32.mrf.mxu1 }
 0x220   :  { %v15032_v27 = vadd.f32 %v14863_v0, %v14908_v52  ;;  %17271 = vst [vmem:[#allocation29_spill] sm:$0xff] %v15101_v18 }
 0x221   :  { %v14910_v53 = vpop.f32.mrf.mxu1 }
 0x222   :  { %17263 = vst [vmem:[#allocation21_spill] sm:$0xff] %v15032_v27  ;;  %v15121_v36 = vadd.f32 %v14910_v53, %v14863_v0 }
 0x223   :  { %v14912_v54 = vpop.f32.mrf.mxu1 }
 0x224   :  { %v15060_v38 = vadd.f32 %v14863_v0, %v14912_v54  ;;  %17273 = vst [vmem:[#allocation31_spill] sm:$0xff] %v15121_v36 }
 0x225   :  { %v14914_v55 = vpop.f32.mrf.mxu1 }
 0x226   :  { %17266 = vst [vmem:[#allocation24_spill] sm:$0xff] %v15060_v38  ;;  %v15138_v46 = vadd.f32 %v14914_v55, %v14863_v0 }
 0x227   :  { %v14916_v56 = vpop.f32.mrf.mxu1 }
 0x228   :  { %v15090_v1 = vadd.f32 %v14863_v0, %v14916_v56  ;;  %17275 = vst [vmem:[#allocation33_spill] sm:$0xff] %v15138_v46  ;;  %v15154_v0 = vpop.f32.mrf.mxu0 }
 0x229   :  { %v13130_v58 = vpop.f32.mrf.mxu1 }
 0x22a   :  { %v14924_v59 = vadd.f32 %v13130_v58, %v14921_v57  ;;  %17269 = vst [vmem:[#allocation27_spill] sm:$0xff] %v15090_v1  ;;  %v15158_v52 = vpop.f32.mrf.mxu0 }
 0x22b   :  { %v738_v60 = vpop.f32.mrf.mxu1 }
 0x22c   :  { %17253 = vst [vmem:[#allocation11_spill] sm:$0xff] %v14924_v59  ;;  %v14927_v61 = vadd.f32 %v14921_v57, %v738_v60  ;;  %3603 = vrot.lane.b32.xlu1 %v14924_v59, %s14310_s20  ;;  %v15162_v54 = vpop.f32.mrf.mxu0 }
 0x22d   :  { %v13133_v62 = vpop.f32.mrf.mxu1 }
 0x22e   :  { %17254 = vst [vmem:[#allocation12_spill] sm:$0xff] %v14927_v61  ;;  %3525 = vrot.lane.b32.xlu0 %v14927_v61, %s14310_s20  ;;  %13193 = vmatpush3.xpose.msk.msra.mxu1 %vm977_vm2, %v14927_v61  ;;  %v14937_v2 = vadd.f32 %v13133_v62, %v14921_v57  ;;  %v15166_v56 = vpop.f32.mrf.mxu0 }
 0x22f   :  { %v748_v63 = vpop.f32.mrf.mxu1  ;;  %13197 = vmatprep.subr.mxu1 %v17182_v45 }
 0x230   :  { %17255 = vst [vmem:[#allocation13_spill] sm:$0xff] %v14937_v2  ;;  %v14940_v3 = vadd.f32 %v14921_v57, %v748_v63  ;;  %v15170_v58 = vpop.f32.mrf.mxu0 }
 0x231   :  { %v13136_v6 = vpop.f32.mrf.mxu1  ;;  %13195 = vmatmul.mubr.msk.f32.vlgmr.msra.gmra.mxu1 %vm977_vm2, %v14869_v16 }
 0x232   :  { %17256 = vst [vmem:[#allocation14_spill] sm:$0xff] %v14940_v3  ;;  %3681 = vrot.lane.b32.xlu1 %v14940_v3, %s14310_s20  ;;  %3759 = vrot.lane.b32.xlu0 %v14937_v2, %s14310_s20  ;;  %v14957_v9 = vadd.f32 %v13136_v6, %v14921_v57  ;;  %v15174_v6 = vpop.f32.mrf.mxu0 }
 0x233   :  { %13198 = vmatpush3.xpose.msk.msra.mxu1 %vm977_vm2, %v14924_v59  ;;  %v758_v7 = vpop.f32.mrf.mxu1  ;;  %13199 = vmatprep.mubr.msk.f32.mxu1 %vm14309_vm1, %v17182_v45 }
 0x234   :  { %v14953_v8 = vadd.f32 %v14921_v57, %v758_v7  ;;  %13202 = vmatprep.subr.mxu1 %v17182_v45  ;;  %17258 = vst [vmem:[#allocation16_spill] sm:$0xff] %v14957_v9 }
 0x235   :  { %v13139_v10 = vpop.f32.mrf.mxu1 }
 0x236   :  { %17257 = vst [vmem:[#allocation15_spill] sm:$0xff] %v14953_v8  ;;  %13200 = vmatmul.mubr.msk.f32.vlgmr.msra.gmra.mxu1 %vm977_vm2, %v14866_v4  ;;  %13213 = vmatpush3.xpose.msk.msra.mxu0 %vm977_vm2, %v14953_v8  ;;  %v14978_v14 = vadd.f32 %v13139_v10, %v14921_v57 }
 0x237   :  { %3837 = vrot.lane.b32.xlu1 %v14953_v8, %s14310_s20  ;;  %3915 = vrot.lane.b32.xlu0 %v14957_v9, %s14310_s20  ;;  %v768_v11 = vpop.f32.mrf.mxu1 }
 0x238   :  { %13203 = vmatpush3.xpose.msk.msra.mxu1 %vm977_vm2, %v14940_v3  ;;  %v14970_v12 = vadd.f32 %v14921_v57, %v768_v11  ;;  %13204 = vmatprep.mubr.msk.f32.mxu1 %vm14309_vm1, %v17182_v45  ;;  %17260 = vst [vmem:[#allocation18_spill] sm:$0xff] %v14978_v14 }
 0x239   :  { %v13142_v13 = vpop.f32.mrf.mxu1  ;;  %13207 = vmatprep.subr.mxu1 %v17182_v45  ;;  %13215 = vmatmul.mubr.msk.f32.vlgmr.msra.gmra.mxu0 %vm977_vm2, %v14889_v44 }
 0x23a   :  { %17259 = vst [vmem:[#allocation17_spill] sm:$0xff] %v14970_v12  ;;  %13222 = vmatprep.subr.mxu0 %v17182_v45  ;;  %13224 = vmatprep.mubr.msk.f32.mxu0 %vm14309_vm1, %v17182_v45  ;;  %v15046_v33 = vadd.f32 %v13142_v13, %v14921_v57  ;;  %v15176_v13 = vpop.f32.mrf.mxu0 }
 0x23b   :  { %13205 = vmatmul.mubr.msk.f32.vlgmr.msra.gmra.mxu1 %vm977_vm2, %v14879_v29  ;;  %13223 = vmatpush3.xpose.msk.msra.mxu0 %vm977_vm2, %v14970_v12  ;;  %v778_v15 = vpop.f32.mrf.mxu1 }
 0x23c   :  { %3993 = vrot.lane.b32.xlu1 %v14970_v12, %s14310_s20  ;;  %4071 = vrot.lane.b32.xlu0 %v14978_v14, %s14310_s20  ;;  %v14992_v17 = vadd.f32 %v14921_v57, %v778_v15  ;;  %17264 = vst [vmem:[#allocation22_spill] sm:$0xff] %v15046_v33 }
 0x23d   :  { %13208 = vmatpush3.xpose.msk.msra.mxu1 %vm977_vm2, %v14937_v2  ;;  %13209 = vmatprep.mubr.msk.f32.mxu1 %vm14309_vm1, %v17182_v45  ;;  %v13145_v19 = vpop.f32.mrf.mxu1 }
 0x23e   :  { %13217 = vmatprep.subr.mxu1 %v17182_v45  ;;  %13225 = vmatmul.mubr.msk.f32.vlgmr.msra.gmra.mxu0 %vm977_vm2, %v14898_v48  ;;  %v15074_v41 = vadd.f32 %v13145_v19, %v14921_v57 }
 0x23f   :  { %13232 = vmatprep.subr.mxu0 %v17182_v45  ;;  %v788_v21 = vpop.f32.mrf.mxu1  ;;  %13234 = vmatprep.mubr.msk.f32.mxu0 %vm14309_vm1, %v17182_v45 }
 0x240   :  { %13210 = vmatmul.mubr.msk.f32.vlgmr.msra.gmra.mxu1 %vm977_vm2, %v14874_v20  ;;  %13233 = vmatpush3.xpose.msk.msra.mxu0 %vm977_vm2, %v14992_v17  ;;  %v15009_v22 = vadd.f32 %v14921_v57, %v788_v21  ;;  %17268 = vst [vmem:[#allocation26_spill] sm:$0xff] %v15074_v41 }
 0x241   :  { %13218 = vmatpush3.xpose.msk.msra.mxu1 %vm977_vm2, %v14957_v9  ;;  %13219 = vmatprep.mubr.msk.f32.mxu1 %vm14309_vm1, %v17182_v45  ;;  %v13148_v24 = vpop.f32.mrf.mxu1 }
 0x242   :  { %17261 = vst [vmem:[#allocation19_spill] sm:$0xff] %v15009_v22  ;;  %13227 = vmatprep.subr.mxu1 %v17182_v45  ;;  %13242 = vmatprep.subr.mxu0 %v17182_v45  ;;  %v15107_v28 = vadd.f32 %v13148_v24, %v14921_v57 }
 0x243   :  { %13235 = vmatmul.mubr.msk.f32.vlgmr.msra.gmra.mxu0 %vm977_vm2, %v15013_v23  ;;  %v798_v25 = vpop.f32.mrf.mxu1 }
 0x244   :  { %13220 = vmatmul.mubr.msk.f32.vlgmr.msra.gmra.mxu1 %vm977_vm2, %v14884_v37  ;;  %13243 = vmatpush3.xpose.msk.msra.mxu0 %vm977_vm2, %v15009_v22  ;;  %v15028_v26 = vadd.f32 %v14921_v57, %v798_v25  ;;  %17272 = vst [vmem:[#allocation30_spill] sm:$0xff] %v15107_v28 }
 0x245   :  { %13228 = vmatpush3.xpose.msk.msra.mxu1 %vm977_vm2, %v14978_v14  ;;  %13229 = vmatprep.mubr.msk.f32.mxu1 %vm14309_vm1, %v17182_v45  ;;  %v13151_v30 = vpop.f32.mrf.mxu1 }
 0x246   :  { %17262 = vst [vmem:[#allocation20_spill] sm:$0xff] %v15028_v26  ;;  %13244 = vmatprep.mubr.msk.f32.mxu0 %vm14309_vm1, %v17182_v45  ;;  %13237 = vmatprep.subr.mxu1 %v17182_v45  ;;  %v15127_v43 = vadd.f32 %v13151_v30, %v14921_v57 }
 0x247   :  { %13245 = vmatmul.mubr.msk.f32.vlgmr.msra.gmra.mxu0 %vm977_vm2, %v15032_v27  ;;  %13252 = vmatprep.subr.mxu0 %v17182_v45  ;;  %v808_v34 = vpop.f32.mrf.mxu1 }
 0x248   :  { %13230 = vmatmul.mubr.msk.f32.vlgmr.msra.gmra.mxu1 %vm977_vm2, %v15040_v31  ;;  %13253 = vmatpush3.xpose.msk.msra.mxu0 %vm977_vm2, %v15028_v26  ;;  %v15056_v35 = vadd.f32 %v14921_v57, %v808_v34  ;;  %17274 = vst [vmem:[#allocation32_spill] sm:$0xff] %v15127_v43 }
 0x249   :  { %13238 = vmatpush3.xpose.msk.msra.mxu1 %vm977_vm2, %v15046_v33  ;;  %13239 = vmatprep.mubr.msk.f32.mxu1 %vm14309_vm1, %v17182_v45  ;;  %v15152_v50 = vpop.f32.mrf.mxu1 }
 0x24a   :  { %17265 = vst [vmem:[#allocation23_spill] sm:$0xff] %v15056_v35  ;;  %13254 = vmatprep.mubr.msk.f32.mxu0 %vm14309_vm1, %v17182_v45  ;;  %13247 = vmatprep.subr.mxu1 %v17182_v45 }
 0x24b   :  { %13255 = vmatmul.mubr.msk.f32.vlgmr.msra.gmra.mxu0 %vm977_vm2, %v15060_v38  ;;  %13262 = vmatprep.subr.mxu0 %v17182_v45  ;;  %v15156_v51 = vpop.f32.mrf.mxu1 }
 0x24c   :  { %13240 = vmatmul.mubr.msk.f32.vlgmr.msra.gmra.mxu1 %vm977_vm2, %v15068_v39  ;;  %13263 = vmatpush3.xpose.msk.msra.mxu0 %vm977_vm2, %v15056_v35 }
 0x24d   :  { %13248 = vmatpush3.xpose.msk.msra.mxu1 %vm977_vm2, %v15074_v41  ;;  %13249 = vmatprep.mubr.msk.f32.mxu1 %vm14309_vm1, %v17182_v45  ;;  %v15160_v53 = vpop.f32.mrf.mxu1 }
 0x24e   :  { %13264 = vmatprep.mubr.msk.f32.mxu0 %vm14309_vm1, %v17182_v45  ;;  %13257 = vmatprep.subr.mxu1 %v17182_v45 }
 0x24f   :  { %13265 = vmatmul.mubr.msk.f32.vlgmr.msra.gmra.mxu0 %vm977_vm2, %v15090_v1  ;;  %13272 = vmatprep.subr.mxu0 %v17182_v45  ;;  %v15164_v55 = vpop.f32.mrf.mxu1 }
 0x250   :  { %13250 = vmatmul.mubr.msk.f32.vlgmr.msra.gmra.mxu1 %vm977_vm2, %v15101_v18  ;;  %13273 = vmatpush3.msra.mxu0 %v15097_v5 }
 0x251   :  { %13258 = vmatpush3.xpose.msk.msra.mxu1 %vm977_vm2, %v15107_v28  ;;  %13259 = vmatprep.mubr.msk.f32.mxu1 %vm14309_vm1, %v17182_v45  ;;  %v15168_v57 = vpop.f32.mrf.mxu1 }
 0x252   :  { %13267 = vmatprep.subr.mxu1 %v17182_v45  ;;  %13274 = vmatprep.mubr.msk.f32.mxu0 %vm14309_vm1, %v17182_v45 }
 0x253   :  { %13282 = vmatprep.subr.mxu0 %v17182_v45  ;;  %v15172_v60 = vpop.f32.mrf.mxu1 }
 0x254   :  { %13260 = vmatmul.mubr.msk.f32.vlgmr.msra.gmra.mxu1 %vm977_vm2, %v15121_v36 }
 0x255   :  { %13268 = vmatpush3.xpose.msk.msra.mxu1 %vm977_vm2, %v15127_v43  ;;  %13269 = vmatprep.mubr.msk.f32.mxu1 %vm14309_vm1, %v17182_v45 }
 0x256   :  { %13277 = vmatprep.subr.mxu1 %v17182_v45 }
 0x258   :  { %13270 = vmatmul.mubr.msk.f32.vlgmr.msra.gmra.mxu1 %vm977_vm2, %v15138_v46 }
 0x259   :  { %13278 = vmatpush3.msra.mxu1 %v15142_v47  ;;  %13279 = vmatprep.mubr.msk.f32.mxu1 %vm14309_vm1, %v17182_v45 }
 0x25a   :  { %13287 = vmatprep.subr.mxu1 %v17182_v45 }
 0x2f1   :  { %v1050_v62 = vpop.f32.mrf.mxu1 }
 0x2f2   :  { %v2194_v63 = vmul.f32 0.2236068, %v1050_v62 }
 0x2f3   :  { %v13196_v7 = vpop.f32.mrf.mxu1 }
 0x2f4   :  { %v2210_v10 = vmul.f32 1.442695, %v2194_v63 }
 0x2f6   :  { %13951 = vpow2.f32 %v2210_v10  ;;  %v1126_v11 = vpop.f32.mrf.mxu1 }
 0x2f7   :  { %v2195_v15 = vmul.f32 0.2236068, %v1126_v11 }
 0x2f8   :  { %v13201_v19 = vpop.f32.mrf.mxu1 }
 0x2f9   :  { %v2212_v21 = vmul.f32 1.442695, %v2195_v15  ;;  %v1354_v24 = vpop.f32.mrf.mxu0 }
 0x2fa   :  { %v2198_v25 = vmul.f32 0.2236068, %v1354_v24 }
 0x2fb   :  { %13953 = vpow2.f32 %v2212_v21  ;;  %v1202_v30 = vpop.f32.mrf.mxu1  ;;  %v13216_v32 = vpop.f32.mrf.mxu0 }
 0x2fc   :  { %v2196_v34 = vmul.f32 0.2236068, %v1202_v30  ;;  %v2218_v62 = vmul.f32 1.442695, %v2198_v25 }
 0x2fd   :  { %v13206_v40 = vpop.f32.mrf.mxu1 }
 0x2fe   :  { %v2214_v45 = vmul.f32 1.442695, %v2196_v34  ;;  %v1506_v14 = vpop.f32.mrf.mxu0 }
 0x2ff   :  { %v2200_v48 = vmul.f32 0.2236068, %v1506_v14 }
 0x300   :  { %13955 = vpow2.f32 %v2214_v45  ;;  %v1278_v63 = vpop.f32.mrf.mxu1  ;;  %v13226_v7 = vpop.f32.mrf.mxu0 }
 0x301   :  { %v2197_v10 = vmul.f32 0.2236068, %v1278_v63  ;;  %13957 = vpow2.f32 %v2218_v62  ;;  %v2222_v11 = vmul.f32 1.442695, %v2200_v48 }
 0x302   :  { %v13211_v19 = vpop.f32.mrf.mxu1 }
 0x303   :  { %v15178_v15 = vpop.eup %13951  ;;  %v2216_v24 = vmul.f32 1.442695, %v2197_v10  ;;  %v1658_v21 = vpop.f32.mrf.mxu0 }
 0x304   :  { %17277 = vst [vmem:[#allocation35_spill] sm:$0xff] %v15178_v15  ;;  %v1430_v37 = vpop.f32.mrf.mxu1  ;;  %v2202_v32 = vmul.f32 0.2236068, %v1658_v21  ;;  %v2243_v30 = vsel %vm2242_vm3, %v15178_v15, 0.0 }
 0x305   :  { %13959 = vpow2.f32 %v2216_v24  ;;  %v2199_v25 = vmul.f32 0.2236068, %v1430_v37  ;;  %v13236_v14 = vpop.f32.mrf.mxu0  ;;  %2244 = vadd.xlane.f32.xlu1 %v2243_v30 }
 0x306   :  { %13961 = vpow2.f32 %v2222_v11  ;;  %v2226_v45 = vmul.f32 1.442695, %v2202_v32  ;;  %v13221_v34 = vpop.f32.mrf.mxu1 }
 0x307   :  { %v2220_v40 = vmul.f32 1.442695, %v2199_v25  ;;  %v1810_v62 = vpop.f32.mrf.mxu0 }
 0x308   :  { %v15182_v48 = vpop.eup %13953  ;;  %v2204_v63 = vmul.f32 0.2236068, %v1810_v62  ;;  %v1582_v7 = vpop.f32.mrf.mxu1 }
 0x309   :  { %17278 = vst [vmem:[#allocation36_spill] sm:$0xff] %v15182_v48  ;;  %13963 = vpow2.f32 %v2220_v40  ;;  %v2201_v10 = vmul.f32 0.2236068, %v1582_v7  ;;  %v13246_v19 = vpop.f32.mrf.mxu0  ;;  %v2246_v21 = vsel %vm2242_vm3, %v15182_v48, 0.0 }
 0x30a   :  { %13965 = vpow2.f32 %v2226_v45  ;;  %v2230_v24 = vmul.f32 1.442695, %v2204_v63  ;;  %v13231_v37 = vpop.f32.mrf.mxu1  ;;  %2247 = vadd.xlane.f32.xlu0 %v2246_v21 }
 0x30b   :  { %v2224_v30 = vmul.f32 1.442695, %v2201_v10  ;;  %v1962_v11 = vpop.f32.mrf.mxu0 }
 0x30c   :  { %v2206_v32 = vmul.f32 0.2236068, %v1962_v11  ;;  %v1734_v14 = vpop.f32.mrf.mxu1 }
 0x30d   :  { %v15186_v25 = vpop.eup %13955  ;;  %13967 = vpow2.f32 %v2224_v30  ;;  %v2203_v34 = vmul.f32 0.2236068, %v1734_v14  ;;  %v13256_v62 = vpop.f32.mrf.mxu0 }
 0x30e   :  { %13969 = vpow2.f32 %v2230_v24  ;;  %v2234_v40 = vmul.f32 1.442695, %v2206_v32  ;;  %v13241_v7 = vpop.f32.mrf.mxu1  ;;  %v2249_v19 = vsel %vm2242_vm3, %v15186_v25, 0.0  ;;  %v15190_v48 = vpop.eup %13957 }
 0x30f   :  { %v2228_v45 = vmul.f32 1.442695, %v2203_v34  ;;  %2250 = vadd.xlane.f32.xlu0 %v2249_v19  ;;  %v2114_v63 = vpop.f32.mrf.mxu0  ;;  %v2255_v32 = vsel %vm2242_vm3, %v15190_v48, 0.0 }
 0x310   :  { %v1886_v10 = vpop.f32.mrf.mxu1  ;;  %v2208_v21 = vmul.f32 0.2236068, %v2114_v63 }
 0x311   :  { %13971 = vpow2.f32 %v2228_v45  ;;  %v2205_v37 = vmul.f32 0.2236068, %v1886_v10  ;;  %v13266_v11 = vpop.f32.mrf.mxu0 }
 0x312   :  { %v15192_v15 = vpop.eup %13959  ;;  %13973 = vpow2.f32 %v2234_v40  ;;  %v2238_v30 = vmul.f32 1.442695, %v2208_v21  ;;  %v13251_v24 = vpop.f32.mrf.mxu1 }
 0x313   :  { %v15196_v14 = vpop.eup %13961  ;;  %v2232_v62 = vmul.f32 1.442695, %v2205_v37  ;;  %2256 = vadd.xlane.f32.xlu0 %v2255_v32  ;;  %v2252_v34 = vsel %vm2242_vm3, %v15192_v15, 0.0 }
 0x314   :  { %2253 = vadd.xlane.f32.xlu1 %v2252_v34  ;;  %v2038_v7 = vpop.f32.mrf.mxu1  ;;  %v2261_v63 = vsel %vm2242_vm3, %v15196_v14, 0.0 }
 0x315   :  { %13975 = vpow2.f32 %v2232_v62  ;;  %v2207_v19 = vmul.f32 0.2236068, %v2038_v7 }
 0x316   :  { %v15200_v45 = vpop.eup %13963  ;;  %13977 = vpow2.f32 %v2238_v30  ;;  %v13261_v40 = vpop.f32.mrf.mxu1 }
 0x317   :  { %v15204_v10 = vpop.eup %13965  ;;  %v2236_v21 = vmul.f32 1.442695, %v2207_v19  ;;  %2262 = vadd.xlane.f32.xlu0 %v2261_v63  ;;  %v2258_v37 = vsel %vm2242_vm3, %v15200_v45, 0.0 }
 0x318   :  { %2259 = vadd.xlane.f32.xlu1 %v2258_v37  ;;  %v2190_v11 = vpop.f32.mrf.mxu1  ;;  %v2267_v30 = vsel %vm2242_vm3, %v15204_v10, 0.0 }
 0x319   :  { %13979 = vpow2.f32 %v2236_v21  ;;  %v2209_v24 = vmul.f32 0.2236068, %v2190_v11 }
 0x31a   :  { %v15208_v32 = vpop.eup %13967  ;;  %v13271_v62 = vpop.f32.mrf.mxu1 }
 0x31b   :  { %v15212_v34 = vpop.eup %13969  ;;  %v2240_v7 = vmul.f32 1.442695, %v2209_v24  ;;  %2268 = vadd.xlane.f32.xlu0 %v2267_v30  ;;  %v2264_v19 = vsel %vm2242_vm3, %v15208_v32, 0.0 }
 0x31c   :  { %2265 = vadd.xlane.f32.xlu1 %v2264_v19  ;;  %v2273_v63 = vsel %vm2242_vm3, %v15212_v34, 0.0 }
 0x31d   :  { %13981 = vpow2.f32 %v2240_v7 }
 0x31e   :  { %v15216_v40 = vpop.eup %13971 }
 0x31f   :  { %v15220_v21 = vpop.eup %13973  ;;  %2274 = vadd.xlane.f32.xlu0 %v2273_v63  ;;  %v2270_v37 = vsel %vm2242_vm3, %v15216_v40, 0.0 }
 0x320   :  { %17279 = vst [vmem:[#allocation37_spill] sm:$0xff] %v15220_v21  ;;  %2271 = vadd.xlane.f32.xlu1 %v2270_v37  ;;  %v2279_v24 = vsel %vm2242_vm3, %v15220_v21, 0.0 }
 0x322   :  { %v15224_v11 = vpop.eup %13975 }
 0x323   :  { %v15228_v62 = vpop.eup %13977  ;;  %2280 = vadd.xlane.f32.xlu0 %v2279_v24  ;;  %v2276_v30 = vsel %vm2242_vm3, %v15224_v11, 0.0  ;;  %v15288_v24 = vadd.f32 %v15150_v49, %v15086_v42  ;;  %v15306_v49 = vadd.f32 %v15086_v42, %v15170_v58  ;;  %v15330_v58 = vadd.f32 %v15174_v6, %v15086_v42 }
 0x324   :  { %2277 = vadd.xlane.f32.xlu1 %v2276_v30  ;;  %v2285_v19 = vsel %vm2242_vm3, %v15228_v62, 0.0  ;;  %v15292_v30 = vadd.f32 %v15086_v42, %v15162_v54  ;;  %v15348_v6 = vadd.f32 %v15086_v42, %v15164_v55 }
 0x325   :  { %17281 = vst [vmem:[#allocation39_spill] sm:$0xff] %v15288_v24  ;;  %17284 = vst [vmem:[#allocation42_spill] sm:$0xff] %v15306_v49 }
 0x326   :  { %v15232_v7 = vpop.eup %13979  ;;  %17282 = vst [vmem:[#allocation40_spill] sm:$0xff] %v15292_v30  ;;  %17287 = vst [vmem:[#allocation45_spill] sm:$0xff] %v15330_v58 }
 0x327   :  { %v2282_v63 = vsel %vm2242_vm3, %v15232_v7, 0.0  ;;  %2286 = vadd.xlane.f32.xlu0 %v2285_v19  ;;  %v15294_v19 = vpop.permute.xlu1 %3523  ;;  %17290 = vst [vmem:[#allocation48_spill] sm:$0xff] %v15348_v6 }
 0x328   :  { %2283 = vadd.xlane.f32.xlu1 %v2282_v63  ;;  %v15316_v63 = vadd.f32 %v15166_v56, %v15086_v42  ;;  %v15334_v56 = vadd.f32 %v15086_v42, %v15156_v51 }
 0x32a   :  { %v15238_v37 = vpop.eup %13981  ;;  %17285 = vst [vmem:[#allocation43_spill] sm:$0xff] %v15316_v63  ;;  %17288 = vst [vmem:[#allocation46_spill] sm:$0xff] %v15334_v56 }
 0x32b   :  { %v2288_v21 = vsel %vm2242_vm3, %v15238_v37, 0.0  ;;  %v15312_v54 = vpop.permute.xlu1 %3679 }
 0x32c   :  { %2289 = vadd.xlane.f32.xlu1 %v2288_v21  ;;  %v15280_v21 = vadd.f32 %v15086_v42, %v15154_v0  ;;  %v15302_v0 = vadd.f32 %v15158_v52, %v15086_v42  ;;  %v15320_v52 = vadd.f32 %v15086_v42, %v15176_v13  ;;  %v15344_v13 = vadd.f32 %v15152_v50, %v15086_v42 }
 0x32d   :  { %v15364_v50 = vadd.f32 %v15086_v42, %v15172_v60 }
 0x32e   :  { %17280 = vst [vmem:[#allocation38_spill] sm:$0xff] %v15280_v21  ;;  %17283 = vst [vmem:[#allocation41_spill] sm:$0xff] %v15302_v0 }
 0x32f   :  { %17286 = vst [vmem:[#allocation44_spill] sm:$0xff] %v15320_v52  ;;  %17289 = vst [vmem:[#allocation47_spill] sm:$0xff] %v15344_v13 }
 0x330   :  { %17292 = vst [vmem:[#allocation50_spill] sm:$0xff] %v15364_v50 }
 0x33d   :  { %4149 = vrot.lane.b32.xlu1 %v14992_v17, %s14310_s20  ;;  %4069 = vrot.lane.b32.xlu0 %v15040_v31, %s14310_s20 }
 0x341   :  { %4147 = vrot.lane.b32.xlu1 %v15013_v23, %s14310_s20  ;;  %4227 = vrot.lane.b32.xlu0 %v15046_v33, %s14310_s20 }
 0x345   :  { %4305 = vrot.lane.b32.xlu1 %v15009_v22, %s14310_s20  ;;  %4225 = vrot.lane.b32.xlu0 %v15068_v39, %s14310_s20 }
 0x349   :  { %4303 = vrot.lane.b32.xlu1 %v15032_v27, %s14310_s20  ;;  %4383 = vrot.lane.b32.xlu0 %v15074_v41, %s14310_s20 }
 0x34d   :  { %4461 = vrot.lane.b32.xlu1 %v15028_v26, %s14310_s20  ;;  %4381 = vrot.lane.b32.xlu0 %v15101_v18, %s14310_s20 }
 0x351   :  { %4459 = vrot.lane.b32.xlu1 %v15060_v38, %s14310_s20  ;;  %4539 = vrot.lane.b32.xlu0 %v15107_v28, %s14310_s20 }
 0x355   :  { %4617 = vrot.lane.b32.xlu1 %v15056_v35, %s14310_s20  ;;  %4537 = vrot.lane.b32.xlu0 %v15121_v36, %s14310_s20 }
 0x359   :  { %4615 = vrot.lane.b32.xlu1 %v15090_v1, %s14310_s20  ;;  %4695 = vrot.lane.b32.xlu0 %v15127_v43, %s14310_s20  ;;  %v15376_v1 = vadd.f32 %v15168_v57, %v15086_v42 }
 0x35b   :  { %17293 = vst [vmem:[#allocation51_spill] sm:$0xff] %v15376_v1 }
 0x35d   :  { %4993 = vrot.lane.b32.xlu1 %v15142_v47, %s14310_s20  ;;  %4693 = vrot.lane.b32.xlu0 %v15138_v46, %s14310_s20  ;;  %v15336_v46 = vpop.permute.xlu1 %3835  ;;  %v15360_v47 = vadd.f32 %v15160_v53, %v15086_v42 }
 0x35f   :  { %17291 = vst [vmem:[#allocation49_spill] sm:$0xff] %v15360_v47 }
 0x361   :  { %5070 = vrot.lane.b32.xlu1 %v15280_v21, %s14310_s20  ;;  %4916 = vrot.lane.b32.xlu0 %v15097_v5, %s14310_s20  ;;  %v15322_v5 = vpop.permute.xlu0 %3601  ;;  %v15356_v51 = vpop.permute.xlu1 %3991 }
 0x365   :  { %5224 = vrot.lane.b32.xlu1 %v15292_v30, %s14310_s20  ;;  %5147 = vrot.lane.b32.xlu0 %v15288_v24, %s14310_s20  ;;  %v15350_v43 = vpop.permute.xlu0 %3757  ;;  %v15372_v36 = vpop.permute.xlu1 %3603 }
 0x369   :  { %5378 = vrot.lane.b32.xlu1 %v15306_v49, %s14310_s20  ;;  %5301 = vrot.lane.b32.xlu0 %v15302_v0, %s14310_s20  ;;  %v15366_v55 = vpop.permute.xlu0 %3913  ;;  %v15384_v60 = vpop.permute.xlu1 %3681 }
 0x36d   :  { %5532 = vrot.lane.b32.xlu1 %v15320_v52, %s14310_s20  ;;  %5455 = vrot.lane.b32.xlu0 %v15316_v63, %s14310_s20  ;;  %v15378_v53 = vpop.permute.xlu0 %3525  ;;  %v15392_v42 = vpop.permute.xlu1 %3837 }
 0x371   :  { %5686 = vrot.lane.b32.xlu1 %v15334_v56, %s14310_s20  ;;  %5609 = vrot.lane.b32.xlu0 %v15330_v58, %s14310_s20  ;;  %v15390_v28 = vpop.permute.xlu0 %3759 }
 0x375   :  { %5840 = vrot.lane.b32.xlu1 %v15348_v6, %s14310_s20  ;;  %5763 = vrot.lane.b32.xlu0 %v15344_v13, %s14310_s20  ;;  %v15398_v57 = vpop.permute.xlu0 %3915 }
 0x379   :  { %5994 = vrot.lane.b32.xlu1 %v15364_v50, %s14310_s20  ;;  %5917 = vrot.lane.b32.xlu0 %v15360_v47, %s14310_s20 }
 0x37d   :  { %6230 = vrot.lane.b32.xlu1 %v14927_v61, %s14311_s8  ;;  %6071 = vrot.lane.b32.xlu0 %v15376_v1, %s14310_s20  ;;  %v17295_v61 = vld [vmem:[#allocation10_spill] sm:$0xff] }
 0x381   :  { %6228 = vrot.lane.b32.xlu1 %v14869_v16, %s14311_s8  ;;  %6308 = vrot.lane.b32.xlu0 %v14924_v59, %s14311_s8  ;;  %v15404_v16 = vpop.permute.xlu1 %3993 }
 0x385   :  { %6386 = vrot.lane.b32.xlu1 %v14940_v3, %s14311_s8  ;;  %6306 = vrot.lane.b32.xlu0 %v14866_v4, %s14311_s8  ;;  %v15410_v3 = vpop.permute.xlu0 %4071 }
 0x389   :  { %6384 = vrot.lane.b32.xlu1 %v14879_v29, %s14311_s8  ;;  %6464 = vrot.lane.b32.xlu0 %v14937_v2, %s14311_s8 }
 0x38d   :  { %6542 = vrot.lane.b32.xlu1 %v14953_v8, %s14311_s8  ;;  %6462 = vrot.lane.b32.xlu0 %v14874_v20, %s14311_s8  ;;  %v17294_v8 = vld [vmem:[#allocation8_spill] sm:$0xff] }
 0x38e   :  { %v2245_v59 = vpop.xlane.xlu1 %2244 }
 0x38f   :  { %v2291_v4 = vadd.f32 1e-08, %v2245_v59  ;;  %v17296_v59 = vld [vmem:[#allocation18_spill] sm:$0xff] }
 0x391   :  { %13983 = vrcp.f32 %v2291_v4  ;;  %6540 = vrot.lane.b32.xlu1 %v14889_v44, %s14311_s8  ;;  %6620 = vrot.lane.b32.xlu0 %v14957_v9, %s14311_s8 }
 0x393   :  { %v2248_v2 = vpop.xlane.xlu0 %2247 }
 0x394   :  { %v2292_v29 = vadd.f32 1e-08, %v2248_v2 }
 0x395   :  { %6698 = vrot.lane.b32.xlu1 %v14970_v12, %s14311_s8  ;;  %6618 = vrot.lane.b32.xlu0 %v17294_v8, %s14311_s8  ;;  %v17297_v12 = vld [vmem:[#allocation35_spill] sm:$0xff] }
 0x396   :  { %13985 = vrcp.f32 %v2292_v29 }
 0x398   :  { %v2251_v20 = vpop.xlane.xlu0 %2250 }
 0x399   :  { %6696 = vrot.lane.b32.xlu1 %v17295_v61, %s14311_s8  ;;  %v2293_v4 = vadd.f32 1e-08, %v2251_v20  ;;  %6776 = vrot.lane.b32.xlu0 %v17296_v59, %s14311_s8  ;;  %v17298_v20 = vmov 0.0  }
 0x39b   :  { %13987 = vrcp.f32 %v2293_v4 }
 0x39c   :  { %v2257_v44 = vpop.xlane.xlu0 %2256 }
 0x39d   :  { %v2254_v9 = vpop.xlane.xlu1 %2253  ;;  %v2295_v35 = vadd.f32 1e-08, %v2257_v44 }
 0x39e   :  { %v13984_v2 = vpop.eup %13983  ;;  %v2294_v18 = vadd.f32 1e-08, %v2254_v9  ;;  %v17299_v9 = vld [vmem:[#allocation36_spill] sm:$0xff] }
 0x39f   :  { %13989 = vrcp.f32 %v2295_v35  ;;  %v2323_v38 = vmul.f32 %v13984_v2, %v17297_v12 }
 0x3a0   :  { %13991 = vrcp.f32 %v2294_v18  ;;  %v2263_v8 = vpop.xlane.xlu0 %2262 }
 0x3a1   :  { %v2260_v29 = vpop.xlane.xlu1 %2259  ;;  %v2297_v41 = vadd.f32 1e-08, %v2263_v8  ;;  %13275 = vmatmul.mubr.msk.f32.vlgmr.msra.gmra.mxu0 %vm2242_vm3, %v2323_v38 }
 0x3a2   :  { %v2296_v61 = vadd.f32 1e-08, %v2260_v29  ;;  %13283 = vmatpush3.msra.mxu0 %v15280_v21  ;;  %13284 = vmatprep.mubr.msk.f32.mxu0 %vm14309_vm1, %v17298_v20 }
 0x3a3   :  { %v13986_v4 = vpop.eup %13985  ;;  %13993 = vrcp.f32 %v2297_v41  ;;  %13292 = vmatprep.subr.mxu0 %v17298_v20 }
 0x3a4   :  { %13995 = vrcp.f32 %v2296_v61  ;;  %v2269_v44 = vpop.xlane.xlu0 %2268  ;;  %v2324_v12 = vmul.f32 %v13986_v4, %v17299_v9 }
 0x3a5   :  { %v2266_v35 = vpop.xlane.xlu1 %2265  ;;  %v2299_v18 = vadd.f32 1e-08, %v2269_v44 }
 0x3a6   :  { %v2298_v2 = vadd.f32 1e-08, %v2266_v35  ;;  %13280 = vmatmul.mubr.msk.f32.vlgmr.msra.gmra.mxu1 %vm2242_vm3, %v2324_v12 }
 0x3a7   :  { %13997 = vrcp.f32 %v2299_v18  ;;  %13288 = vmatpush3.msra.mxu1 %v15288_v24  ;;  %13289 = vmatprep.mubr.msk.f32.mxu1 %vm14309_vm1, %v17298_v20 }
 0x3a8   :  { %v13988_v8 = vpop.eup %13987  ;;  %13999 = vrcp.f32 %v2298_v2  ;;  %v2275_v38 = vpop.xlane.xlu0 %2274  ;;  %13297 = vmatprep.subr.mxu1 %v17298_v20 }
 0x3a9   :  { %v2272_v61 = vpop.xlane.xlu1 %2271  ;;  %v2301_v41 = vadd.f32 1e-08, %v2275_v38  ;;  %v2325_v29 = vmul.f32 %v13988_v8, %v15186_v25 }
 0x3aa   :  { %v2300_v4 = vadd.f32 1e-08, %v2272_v61 }
 0x3ab   :  { %14001 = vrcp.f32 %v2301_v41  ;;  %13285 = vmatmul.mubr.msk.f32.vlgmr.msra.gmra.mxu0 %vm2242_vm3, %v2325_v29 }
 0x3ac   :  { %v13990_v44 = vpop.eup %13989  ;;  %14003 = vrcp.f32 %v2300_v4  ;;  %13293 = vmatpush3.msra.mxu0 %v15292_v30  ;;  %v2281_v9 = vpop.xlane.xlu0 %2280  ;;  %13294 = vmatprep.mubr.msk.f32.mxu0 %vm14309_vm1, %v17298_v20 }
 0x3ad   :  { %v13992_v12 = vpop.eup %13991  ;;  %v2278_v35 = vpop.xlane.xlu1 %2277  ;;  %v2303_v18 = vadd.f32 1e-08, %v2281_v9  ;;  %13302 = vmatprep.subr.mxu0 %v17298_v20  ;;  %v2327_v2 = vmul.f32 %v13990_v44, %v15190_v48 }
 0x3ae   :  { %v2302_v25 = vadd.f32 1e-08, %v2278_v35  ;;  %v2326_v8 = vmul.f32 %v13992_v12, %v15192_v15 }
 0x3af   :  { %14005 = vrcp.f32 %v2303_v18  ;;  %13295 = vmatmul.mubr.msk.f32.vlgmr.msra.gmra.mxu0 %vm2242_vm3, %v2327_v2 }
 0x3b0   :  { %v13994_v38 = vpop.eup %13993  ;;  %14007 = vrcp.f32 %v2302_v25  ;;  %13290 = vmatmul.mubr.msk.f32.vlgmr.msra.gmra.mxu1 %vm2242_vm3, %v2326_v8  ;;  %13303 = vmatpush3.msra.mxu0 %v15306_v49  ;;  %v2287_v61 = vpop.xlane.xlu0 %2286 }
 0x3b1   :  { %v13996_v41 = vpop.eup %13995  ;;  %13298 = vmatpush3.msra.mxu1 %v15302_v0  ;;  %v2284_v29 = vpop.xlane.xlu1 %2283  ;;  %v2305_v4 = vadd.f32 1e-08, %v2287_v61  ;;  %13299 = vmatprep.mubr.msk.f32.mxu1 %vm14309_vm1, %v17298_v20  ;;  %v2329_v15 = vmul.f32 %v13994_v38, %v15196_v14 }
 0x3b2   :  { %v2304_v48 = vadd.f32 1e-08, %v2284_v29  ;;  %13304 = vmatprep.mubr.msk.f32.mxu0 %vm14309_vm1, %v17298_v20  ;;  %13307 = vmatprep.subr.mxu1 %v17298_v20  ;;  %v2328_v44 = vmul.f32 %v13996_v41, %v15200_v45 }
 0x3b3   :  { %14009 = vrcp.f32 %v2305_v4  ;;  %13312 = vmatprep.subr.mxu0 %v17298_v20  ;;  %13305 = vmatmul.mubr.msk.f32.vlgmr.msra.gmra.mxu0 %vm2242_vm3, %v2329_v15 }
 0x3b4   :  { %v13998_v9 = vpop.eup %13997  ;;  %14011 = vrcp.f32 %v2304_v48  ;;  %13300 = vmatmul.mubr.msk.f32.vlgmr.msra.gmra.mxu1 %vm2242_vm3, %v2328_v44  ;;  %13313 = vmatpush3.msra.mxu0 %v15320_v52  ;;  %v15459_v14 = vpop.permute.xlu0 %4069 }
 0x3b5   :  { %v14000_v12 = vpop.eup %13999  ;;  %13308 = vmatpush3.msra.mxu1 %v15316_v63  ;;  %v2290_v35 = vpop.xlane.xlu1 %2289  ;;  %13309 = vmatprep.mubr.msk.f32.mxu1 %vm14309_vm1, %v17298_v20  ;;  %v2331_v45 = vmul.f32 %v13998_v9, %v15204_v10 }
 0x3b6   :  { %v2306_v18 = vadd.f32 1e-08, %v2290_v35  ;;  %13314 = vmatprep.mubr.msk.f32.mxu0 %vm14309_vm1, %v17298_v20  ;;  %13317 = vmatprep.subr.mxu1 %v17298_v20  ;;  %v2330_v2 = vmul.f32 %v14000_v12, %v15208_v32 }
 0x3b7   :  { %13322 = vmatprep.subr.mxu0 %v17298_v20  ;;  %13315 = vmatmul.mubr.msk.f32.vlgmr.msra.gmra.mxu0 %vm2242_vm3, %v2331_v45 }
 0x3b8   :  { %v14002_v25 = vpop.eup %14001  ;;  %14013 = vrcp.f32 %v2306_v18  ;;  %13310 = vmatmul.mubr.msk.f32.vlgmr.msra.gmra.mxu1 %vm2242_vm3, %v2330_v2  ;;  %13323 = vmatpush3.msra.mxu0 %v15334_v56  ;;  %v15473_v8 = vpop.permute.xlu0 %4227 }
 0x3b9   :  { %v14004_v10 = vpop.eup %14003  ;;  %13318 = vmatpush3.msra.mxu1 %v15330_v58  ;;  %v15476_v38 = vpop.permute.xlu1 %4149  ;;  %13319 = vmatprep.mubr.msk.f32.mxu1 %vm14309_vm1, %v17298_v20  ;;  %v2333_v32 = vmul.f32 %v14002_v25, %v15212_v34  ;;  %v17300_v34 = vld [vmem:[#allocation37_spill] sm:$0xff] }
 0x3ba   :  { %13324 = vmatprep.mubr.msk.f32.mxu0 %vm14309_vm1, %v17298_v20  ;;  %13327 = vmatprep.subr.mxu1 %v17298_v20  ;;  %v2332_v61 = vmul.f32 %v14004_v10, %v15216_v40 }
 0x3bb   :  { %13332 = vmatprep.subr.mxu0 %v17298_v20  ;;  %13325 = vmatmul.mubr.msk.f32.vlgmr.msra.gmra.mxu0 %vm2242_vm3, %v2333_v32 }
 0x3bc   :  { %v14006_v41 = vpop.eup %14005  ;;  %13320 = vmatmul.mubr.msk.f32.vlgmr.msra.gmra.mxu1 %vm2242_vm3, %v2332_v61  ;;  %13333 = vmatpush3.msra.mxu0 %v15348_v6  ;;  %v15489_v29 = vpop.permute.xlu0 %4225 }
 0x3bd   :  { %v14008_v4 = vpop.eup %14007  ;;  %13328 = vmatpush3.msra.mxu1 %v15344_v13  ;;  %13329 = vmatprep.mubr.msk.f32.mxu1 %vm14309_vm1, %v17298_v20  ;;  %v2335_v15 = vmul.f32 %v14006_v41, %v17300_v34  ;;  %v15495_v40 = vpop.permute.xlu1 %4147 }
 0x3be   :  { %13334 = vmatprep.mubr.msk.f32.mxu0 %vm14309_vm1, %v17298_v20  ;;  %13337 = vmatprep.subr.mxu1 %v17298_v20  ;;  %v2334_v48 = vmul.f32 %v14008_v4, %v15224_v11 }
 0x3bf   :  { %13342 = vmatprep.subr.mxu0 %v17298_v20  ;;  %13335 = vmatmul.mubr.msk.f32.vlgmr.msra.gmra.mxu0 %vm2242_vm3, %v2335_v15 }
 0x3c0   :  { %v14010_v44 = vpop.eup %14009  ;;  %13330 = vmatmul.mubr.msk.f32.vlgmr.msra.gmra.mxu1 %vm2242_vm3, %v2334_v48  ;;  %13343 = vmatpush3.msra.mxu0 %v15364_v50  ;;  %v15505_v9 = vpop.permute.xlu0 %4383 }
 0x3c1   :  { %v14012_v12 = vpop.eup %14011  ;;  %13338 = vmatpush3.msra.mxu1 %v15360_v47  ;;  %13339 = vmatprep.mubr.msk.f32.mxu1 %vm14309_vm1, %v17298_v20  ;;  %v2337_v35 = vmul.f32 %v14010_v44, %v15228_v62  ;;  %v4306_v45 = vpop.permute.xlu1 %4305 }
 0x3c2   :  { %13344 = vmatprep.mubr.msk.f32.mxu0 %vm14309_vm1, %v17298_v20  ;;  %13347 = vmatprep.subr.mxu1 %v17298_v20  ;;  %v2336_v11 = vmul.f32 %v14012_v12, %v15232_v7 }
 0x3c3   :  { %13352 = vmatprep.subr.mxu0 %v17298_v20  ;;  %13345 = vmatmul.mubr.msk.f32.vlgmr.msra.gmra.mxu0 %vm2242_vm3, %v2337_v35 }
 0x3c4   :  { %13340 = vmatmul.mubr.msk.f32.vlgmr.msra.gmra.mxu1 %vm2242_vm3, %v2336_v11  ;;  %13353 = vmatpush3.xpose.msk.msra.mxu0 %vm977_vm2, %v15378_v53  ;;  %v15521_v62 = vpop.permute.xlu0 %4381 }
 0x3c5   :  { %v14014_v18 = vpop.eup %14013  ;;  %13348 = vmatpush3.msra.mxu1 %v15376_v1  ;;  %13349 = vmatprep.mubr.msk.f32.mxu1 %vm14309_vm1, %v17298_v20  ;;  %v4304_v53 = vpop.permute.xlu1 %4303 }
 0x3c6   :  { %13354 = vmatprep.mubr.msk.f32.mxu0 %vm14309_vm1, %v17298_v20  ;;  %13357 = vmatprep.subr.mxu1 %v17298_v20  ;;  %v2338_v7 = vmul.f32 %v14014_v18, %v15238_v37 }
 0x3c7   :  { %13362 = vmatprep.subr.mxu0 %v17298_v20  ;;  %13355 = vmatmul.mubr.msk.f32.vlgmr.msra.gmra.mxu0 %vm977_vm2, %v15294_v19 }
 0x3c8   :  { %13350 = vmatmul.mubr.msk.f32.vlgmr.msra.gmra.mxu1 %vm2242_vm3, %v2338_v7  ;;  %13363 = vmatpush3.xpose.msk.msra.mxu0 %vm977_vm2, %v15384_v60  ;;  %v4540_v37 = vpop.permute.xlu0 %4539 }
 0x3c9   :  { %13358 = vmatpush3.xpose.msk.msra.mxu1 %vm977_vm2, %v15372_v36  ;;  %13359 = vmatprep.mubr.msk.f32.mxu1 %vm14309_vm1, %v17298_v20 }
 0x3ca   :  { %13364 = vmatprep.mubr.msk.f32.mxu0 %vm14309_vm1, %v17298_v20  ;;  %13367 = vmatprep.subr.mxu1 %v17298_v20 }
 0x3cb   :  { %13372 = vmatprep.subr.mxu0 %v17298_v20  ;;  %13365 = vmatmul.mubr.msk.f32.vlgmr.msra.gmra.mxu0 %vm977_vm2, %v15312_v54 }
 0x3cc   :  { %13360 = vmatmul.mubr.msk.f32.vlgmr.msra.gmra.mxu1 %vm977_vm2, %v15322_v5  ;;  %13373 = vmatpush3.xpose.msk.msra.mxu0 %vm977_vm2, %v15392_v42  ;;  %v4462_v5 = vpop.permute.xlu1 %4461 }
 0x3cd   :  { %13368 = vmatpush3.xpose.msk.msra.mxu1 %vm977_vm2, %v15390_v28  ;;  %13369 = vmatprep.mubr.msk.f32.mxu1 %vm14309_vm1, %v17298_v20  ;;  %v4538_v28 = vpop.permute.xlu0 %4537 }
 0x3ce   :  { %13374 = vmatprep.mubr.msk.f32.mxu0 %vm14309_vm1, %v17298_v20  ;;  %13377 = vmatprep.subr.mxu1 %v17298_v20 }
 0x3cf   :  { %13382 = vmatprep.subr.mxu0 %v17298_v20  ;;  %13375 = vmatmul.mubr.msk.f32.vlgmr.msra.gmra.mxu0 %vm977_vm2, %v15336_v46 }
 0x3d0   :  { %13370 = vmatmul.mubr.msk.f32.vlgmr.msra.gmra.mxu1 %vm977_vm2, %v15350_v43  ;;  %13383 = vmatpush3.xpose.msk.msra.mxu0 %vm977_vm2, %v15404_v16  ;;  %v4460_v16 = vpop.permute.xlu1 %4459 }
 0x3d1   :  { %13378 = vmatpush3.xpose.msk.msra.mxu1 %vm977_vm2, %v15398_v57  ;;  %13379 = vmatprep.mubr.msk.f32.mxu1 %vm14309_vm1, %v17298_v20  ;;  %v4696_v36 = vpop.permute.xlu0 %4695 }
 0x3d2   :  { %13384 = vmatprep.mubr.msk.f32.mxu0 %vm14309_vm1, %v17298_v20  ;;  %13387 = vmatprep.subr.mxu1 %v17298_v20 }
 0x3d3   :  { %13392 = vmatprep.subr.mxu0 %v17298_v20  ;;  %13385 = vmatmul.mubr.msk.f32.vlgmr.msra.gmra.mxu0 %vm977_vm2, %v15356_v51 }
 0x3d4   :  { %13380 = vmatmul.mubr.msk.f32.vlgmr.msra.gmra.mxu1 %vm977_vm2, %v15366_v55  ;;  %13393 = vmatpush3.xpose.msk.msra.mxu0 %vm977_vm2, %v15476_v38 }
 0x3d5   :  { %13388 = vmatpush3.xpose.msk.msra.mxu1 %vm977_vm2, %v15410_v3  ;;  %13389 = vmatprep.mubr.msk.f32.mxu1 %vm14309_vm1, %v17298_v20  ;;  %v4618_v3 = vpop.permute.xlu1 %4617  ;;  %v4694_v43 = vpop.permute.xlu0 %4693 }
 0x3d6   :  { %13394 = vmatprep.mubr.msk.f32.mxu0 %vm14309_vm1, %v17298_v20  ;;  %13397 = vmatprep.subr.mxu1 %v17298_v20 }
 0x3d7   :  { %13402 = vmatprep.subr.mxu0 %v17298_v20  ;;  %13395 = vmatmul.mubr.msk.f32.vlgmr.msra.gmra.mxu0 %vm977_vm2, %v15495_v40 }
 0x3d8   :  { %13390 = vmatmul.mubr.msk.f32.vlgmr.msra.gmra.mxu1 %vm977_vm2, %v15459_v14  ;;  %13403 = vmatpush3.xpose.msk.msra.mxu0 %vm977_vm2, %v4306_v45 }
 0x3d9   :  { %13398 = vmatpush3.xpose.msk.msra.mxu1 %vm977_vm2, %v15473_v8  ;;  %13399 = vmatprep.mubr.msk.f32.mxu1 %vm14309_vm1, %v17298_v20  ;;  %v4616_v46 = vpop.permute.xlu1 %4615  ;;  %v4917_v19 = vpop.permute.xlu0 %4916 }
 0x3da   :  { %13404 = vmatprep.mubr.msk.f32.mxu0 %vm14309_vm1, %v17298_v20  ;;  %13407 = vmatprep.subr.mxu1 %v17298_v20 }
 0x3db   :  { %13412 = vmatprep.subr.mxu0 %v17298_v20  ;;  %13405 = vmatmul.mubr.msk.f32.vlgmr.msra.gmra.mxu0 %vm977_vm2, %v4304_v53 }
 0x3dc   :  { %13400 = vmatmul.mubr.msk.f32.vlgmr.msra.gmra.mxu1 %vm977_vm2, %v15489_v29  ;;  %13413 = vmatpush3.xpose.msk.msra.mxu0 %vm977_vm2, %v4462_v5 }
 0x3dd   :  { %13408 = vmatpush3.xpose.msk.msra.mxu1 %vm977_vm2, %v15505_v9  ;;  %13409 = vmatprep.mubr.msk.f32.mxu1 %vm14309_vm1, %v17298_v20  ;;  %v4994_v54 = vpop.permute.xlu1 %4993 }
 0x3de   :  { %13414 = vmatprep.mubr.msk.f32.mxu0 %vm14309_vm1, %v17298_v20  ;;  %13417 = vmatprep.subr.mxu1 %v17298_v20 }
 0x3df   :  { %13422 = vmatprep.subr.mxu0 %v17298_v20  ;;  %13415 = vmatmul.mubr.msk.f32.vlgmr.msra.gmra.mxu0 %vm977_vm2, %v4460_v16 }
 0x3e0   :  { %13410 = vmatmul.mubr.msk.f32.vlgmr.msra.gmra.mxu1 %vm977_vm2, %v15521_v62  ;;  %13423 = vmatpush3.xpose.msk.msra.mxu0 %vm977_vm2, %v4618_v3 }
 0x3e1   :  { %13418 = vmatpush3.xpose.msk.msra.mxu1 %vm977_vm2, %v4540_v37  ;;  %13419 = vmatprep.mubr.msk.f32.mxu1 %vm14309_vm1, %v17298_v20 }
 0x3e2   :  { %13424 = vmatprep.mubr.msk.f32.mxu0 %vm14309_vm1, %v17298_v20  ;;  %13427 = vmatprep.subr.mxu1 %v17298_v20 }
 0x3e3   :  { %13432 = vmatprep.subr.mxu0 %v17298_v20  ;;  %13425 = vmatmul.mubr.msk.f32.vlgmr.msra.gmra.mxu0 %vm977_vm2, %v4616_v46 }
 0x3e4   :  { %13420 = vmatmul.mubr.msk.f32.vlgmr.msra.gmra.mxu1 %vm977_vm2, %v4538_v28  ;;  %13433 = vmatpush3.msra.mxu0 %v4917_v19 }
 0x3e5   :  { %13428 = vmatpush3.xpose.msk.msra.mxu1 %vm977_vm2, %v4696_v36  ;;  %13429 = vmatprep.mubr.msk.f32.mxu1 %vm14309_vm1, %v17298_v20 }
 0x3e6   :  { %13437 = vmatprep.subr.mxu1 %v17298_v20  ;;  %13434 = vmatprep.mubr.msk.f32.mxu0 %vm14309_vm1, %v17298_v20 }
 0x3e7   :  { %13442 = vmatprep.subr.mxu0 %v17298_v20 }
 0x3e8   :  { %13430 = vmatmul.mubr.msk.f32.vlgmr.msra.gmra.mxu1 %vm977_vm2, %v4694_v43 }
 0x3e9   :  { %13438 = vmatpush3.msra.mxu1 %v4994_v54  ;;  %13439 = vmatprep.mubr.msk.f32.mxu1 %vm14309_vm1, %v17298_v20 }
 0x3ea   :  { %13447 = vmatprep.subr.mxu1 %v17298_v20 }
 0x461   :  { %v2408_v51 = vpop.f32.mrf.mxu0 }
 0x462   :  { %3507 = vst.msk [vmem:[#allocation2] sm:$0xff] %vm977_vm2, %v2408_v51 }
 0x463   :  { %v13276_v55 = vpop.f32.mrf.mxu0 }
 0x466   :  { %v2481_v60 = vpop.f32.mrf.mxu1 }
 0x467   :  { %3508 = vst.msk [vmem:[#allocation2 + $0x8] sm:$0xff] %vm977_vm2, %v2481_v60 }
 0x468   :  { %v13281_v42 = vpop.f32.mrf.mxu1 }
 0x46b   :  { %v2554_v57 = vpop.f32.mrf.mxu0 }
 0x46c   :  { %3509 = vst.msk [vmem:[#allocation2 + $0x10] sm:$0xff] %vm977_vm2, %v2554_v57 }
 0x46d   :  { %v13286_v14 = vpop.f32.mrf.mxu0 }
 0x46f   :  { %v2700_v2 = vpop.f32.mrf.mxu0 }
 0x470   :  { %v2627_v25 = vpop.f32.mrf.mxu1  ;;  %3511 = vst.msk [vmem:[#allocation2 + $0x20] sm:$0xff] %vm977_vm2, %v2700_v2 }
 0x471   :  { %3510 = vst.msk [vmem:[#allocation2 + $0x18] sm:$0xff] %vm977_vm2, %v2627_v25  ;;  %v13296_v8 = vpop.f32.mrf.mxu0 }
 0x472   :  { %v13291_v10 = vpop.f32.mrf.mxu1 }
 0x473   :  { %v2846_v38 = vpop.f32.mrf.mxu0 }
 0x474   :  { %v2773_v32 = vpop.f32.mrf.mxu1  ;;  %3513 = vst.msk [vmem:[#allocation2 + $0x30] sm:$0xff] %vm977_vm2, %v2846_v38 }
 0x475   :  { %3512 = vst.msk [vmem:[#allocation2 + $0x28] sm:$0xff] %vm977_vm2, %v2773_v32  ;;  %v13306_v61 = vpop.f32.mrf.mxu0 }
 0x476   :  { %v13301_v41 = vpop.f32.mrf.mxu1 }
 0x477   :  { %v2992_v29 = vpop.f32.mrf.mxu0 }
 0x478   :  { %v2919_v4 = vpop.f32.mrf.mxu1  ;;  %3515 = vst.msk [vmem:[#allocation2 + $0x40] sm:$0xff] %vm977_vm2, %v2992_v29 }
 0x479   :  { %3514 = vst.msk [vmem:[#allocation2 + $0x38] sm:$0xff] %vm977_vm2, %v2919_v4  ;;  %v13316_v34 = vpop.f32.mrf.mxu0 }
 0x47a   :  { %v13311_v15 = vpop.f32.mrf.mxu1 }
 0x47b   :  { %v3138_v40 = vpop.f32.mrf.mxu0 }
 0x47c   :  { %v3065_v48 = vpop.f32.mrf.mxu1  ;;  %3517 = vst.msk [vmem:[#allocation2 + $0x50] sm:$0xff] %vm977_vm2, %v3138_v40 }
 0x47d   :  { %3516 = vst.msk [vmem:[#allocation2 + $0x48] sm:$0xff] %vm977_vm2, %v3065_v48  ;;  %v13326_v44 = vpop.f32.mrf.mxu0 }
 0x47e   :  { %v13321_v9 = vpop.f32.mrf.mxu1 }
 0x47f   :  { %v3284_v12 = vpop.f32.mrf.mxu0 }
 0x480   :  { %v3211_v35 = vpop.f32.mrf.mxu1  ;;  %3519 = vst.msk [vmem:[#allocation2 + $0x60] sm:$0xff] %vm977_vm2, %v3284_v12 }
 0x481   :  { %3518 = vst.msk [vmem:[#allocation2 + $0x58] sm:$0xff] %vm977_vm2, %v3211_v35  ;;  %v13336_v11 = vpop.f32.mrf.mxu0 }
 0x482   :  { %v13331_v45 = vpop.f32.mrf.mxu1 }
 0x483   :  { %v3430_v18 = vpop.f32.mrf.mxu0 }
 0x484   :  { %v3357_v62 = vpop.f32.mrf.mxu1  ;;  %3521 = vst.msk [vmem:[#allocation2 + $0x70] sm:$0xff] %vm977_vm2, %v3430_v18 }
 0x485   :  { %3520 = vst.msk [vmem:[#allocation2 + $0x68] sm:$0xff] %vm977_vm2, %v3357_v62  ;;  %v13346_v7 = vpop.f32.mrf.mxu0 }
 0x486   :  { %v13341_v53 = vpop.f32.mrf.mxu1 }
 0x487   :  { %v3597_v37 = vpop.f32.mrf.mxu0 }
 0x488   :  { %v3503_v5 = vpop.f32.mrf.mxu1  ;;  %v4771_v28 = vmul.f32 0.2236068, %v3597_v37 }
 0x489   :  { %3522 = vst.msk [vmem:[#allocation2 + $0x78] sm:$0xff] %vm977_vm2, %v3503_v5  ;;  %v13356_v16 = vpop.f32.mrf.mxu0 }
 0x48a   :  { %v4787_v36 = vmul.f32 1.442695, %v4771_v28  ;;  %v13351_v3 = vpop.f32.mrf.mxu1 }
 0x48b   :  { %v3753_v43 = vpop.f32.mrf.mxu0 }
 0x48c   :  { %14015 = vpow2.f32 %v4787_v36  ;;  %v3675_v46 = vpop.f32.mrf.mxu1  ;;  %v4773_v19 = vmul.f32 0.2236068, %v3753_v43 }
 0x48d   :  { %v4772_v54 = vmul.f32 0.2236068, %v3675_v46  ;;  %v13366_v51 = vpop.f32.mrf.mxu0 }
 0x48e   :  { %v4791_v55 = vmul.f32 1.442695, %v4773_v19  ;;  %v13361_v60 = vpop.f32.mrf.mxu1 }
 0x48f   :  { %v4789_v42 = vmul.f32 1.442695, %v4772_v54  ;;  %v3909_v57 = vpop.f32.mrf.mxu0 }
 0x490   :  { %v3831_v14 = vpop.f32.mrf.mxu1  ;;  %v4775_v2 = vmul.f32 0.2236068, %v3909_v57 }
 0x491   :  { %14017 = vpow2.f32 %v4789_v42  ;;  %v4774_v25 = vmul.f32 0.2236068, %v3831_v14  ;;  %v13376_v8 = vpop.f32.mrf.mxu0 }
 0x492   :  { %14019 = vpow2.f32 %v4791_v55  ;;  %v4795_v10 = vmul.f32 1.442695, %v4775_v2  ;;  %v13371_v38 = vpop.f32.mrf.mxu1 }
 0x493   :  { %v4793_v32 = vmul.f32 1.442695, %v4774_v25  ;;  %v4065_v61 = vpop.f32.mrf.mxu0 }
 0x494   :  { %v3987_v41 = vpop.f32.mrf.mxu1  ;;  %v4777_v29 = vmul.f32 0.2236068, %v4065_v61 }
 0x495   :  { %14021 = vpow2.f32 %v4793_v32  ;;  %v4776_v4 = vmul.f32 0.2236068, %v3987_v41  ;;  %v13386_v34 = vpop.f32.mrf.mxu0 }
 0x496   :  { %14023 = vpow2.f32 %v4795_v10  ;;  %v13381_v15 = vpop.f32.mrf.mxu1  ;;  %v4799_v48 = vmul.f32 1.442695, %v4777_v29 }
 0x497   :  { %v4797_v40 = vmul.f32 1.442695, %v4776_v4  ;;  %v4221_v44 = vpop.f32.mrf.mxu0 }
 0x498   :  { %v4143_v9 = vpop.f32.mrf.mxu1  ;;  %v4779_v12 = vmul.f32 0.2236068, %v4221_v44 }
 0x499   :  { %v15650_v35 = vpop.eup %14015  ;;  %14025 = vpow2.f32 %v4797_v40  ;;  %v4778_v11 = vmul.f32 0.2236068, %v4143_v9  ;;  %v13396_v45 = vpop.f32.mrf.mxu0 }
 0x49a   :  { %v13391_v18 = vpop.f32.mrf.mxu1  ;;  %v4819_v62 = vsel %vm2242_vm3, %v15650_v35, 0.0  ;;  %14027 = vpow2.f32 %v4799_v48  ;;  %v4803_v53 = vmul.f32 1.442695, %v4779_v12 }
 0x49b   :  { %v4801_v7 = vmul.f32 1.442695, %v4778_v11  ;;  %4820 = vadd.xlane.f32.xlu1 %v4819_v62  ;;  %v4377_v37 = vpop.f32.mrf.mxu0 }
 0x49c   :  { %v4299_v5 = vpop.f32.mrf.mxu1  ;;  %v4781_v28 = vmul.f32 0.2236068, %v4377_v37 }
 0x49d   :  { %14029 = vpow2.f32 %v4801_v7  ;;  %v4780_v16 = vmul.f32 0.2236068, %v4299_v5  ;;  %v13406_v36 = vpop.f32.mrf.mxu0 }
 0x49e   :  { %v15654_v3 = vpop.eup %14017  ;;  %v13401_v43 = vpop.f32.mrf.mxu1  ;;  %14031 = vpow2.f32 %v4803_v53  ;;  %v4807_v54 = vmul.f32 1.442695, %v4781_v28 }
 0x49f   :  { %v15656_v46 = vpop.eup %14019  ;;  %v4805_v19 = vmul.f32 1.442695, %v4780_v16  ;;  %v4822_v51 = vsel %vm2242_vm3, %v15654_v3, 0.0  ;;  %v4533_v55 = vpop.f32.mrf.mxu0 }
 0x4a0   :  { %4823 = vadd.xlane.f32.xlu0 %v4822_v51  ;;  %v4455_v60 = vpop.f32.mrf.mxu1  ;;  %v4783_v42 = vmul.f32 0.2236068, %v4533_v55  ;;  %v4825_v8 = vsel %vm2242_vm3, %v15656_v46, 0.0 }
 0x4a1   :  { %14033 = vpow2.f32 %v4805_v19  ;;  %v4782_v57 = vmul.f32 0.2236068, %v4455_v60  ;;  %v13416_v14 = vpop.f32.mrf.mxu0 }
 0x4a2   :  { %v15660_v2 = vpop.eup %14021  ;;  %v13411_v25 = vpop.f32.mrf.mxu1  ;;  %14035 = vpow2.f32 %v4807_v54  ;;  %v4811_v32 = vmul.f32 1.442695, %v4783_v42 }
 0x4a3   :  { %v15664_v10 = vpop.eup %14023  ;;  %v4809_v38 = vmul.f32 1.442695, %v4782_v57  ;;  %v4828_v61 = vsel %vm2242_vm3, %v15660_v2, 0.0  ;;  %v4689_v41 = vpop.f32.mrf.mxu0 }
 0x4a4   :  { %4829 = vadd.xlane.f32.xlu1 %v4828_v61  ;;  %4826 = vadd.xlane.f32.xlu0 %v4825_v8  ;;  %v4611_v29 = vpop.f32.mrf.mxu1  ;;  %v4785_v4 = vmul.f32 0.2236068, %v4689_v41  ;;  %v4831_v44 = vsel %vm2242_vm3, %v15664_v10, 0.0  ;;  %v15714_v41 = vpop.permute.xlu1 %5070 }
 0x4a5   :  { %14037 = vpow2.f32 %v4809_v38  ;;  %v4784_v34 = vmul.f32 0.2236068, %v4611_v29  ;;  %v13426_v15 = vpop.f32.mrf.mxu0 }
 0x4a6   :  { %v15668_v40 = vpop.eup %14025  ;;  %v13421_v48 = vpop.f32.mrf.mxu1  ;;  %14039 = vpow2.f32 %v4811_v32  ;;  %v4815_v12 = vmul.f32 1.442695, %v4785_v4 }
 0x4a7   :  { %v4813_v9 = vmul.f32 1.442695, %v4784_v34  ;;  %v4834_v11 = vsel %vm2242_vm3, %v15668_v40, 0.0  ;;  %v15674_v45 = vpop.eup %14027  ;;  %v15728_v4 = vpop.permute.xlu0 %5147 }
 0x4a8   :  { %4835 = vadd.xlane.f32.xlu1 %v4834_v11  ;;  %4832 = vadd.xlane.f32.xlu0 %v4831_v44  ;;  %v4767_v18 = vpop.f32.mrf.mxu1  ;;  %v4837_v5 = vsel %vm2242_vm3, %v15674_v45, 0.0  ;;  %v15720_v29 = vpop.permute.xlu1 %5224  ;;  %v17301_v44 = vld [vmem:[#allocation26_spill] sm:$0xff] }
 0x4a9   :  { %14041 = vpow2.f32 %v4813_v9  ;;  %v4786_v62 = vmul.f32 0.2236068, %v4767_v18  ;;  %v17302_v9 = vld [vmem:[#allocation24_spill] sm:$0xff] }
 0x4aa   :  { %v15676_v7 = vpop.eup %14029  ;;  %v13431_v53 = vpop.f32.mrf.mxu1  ;;  %14043 = vpow2.f32 %v4815_v12  ;;  %v17303_v12 = vld [vmem:[#allocation29_spill] sm:$0xff] }
 0x4ab   :  { %v4817_v37 = vmul.f32 1.442695, %v4786_v62  ;;  %v4840_v28 = vsel %vm2242_vm3, %v15676_v7, 0.0  ;;  %v15682_v16 = vpop.eup %14031  ;;  %v15736_v15 = vpop.permute.xlu0 %5301  ;;  %v17304_v62 = vld [vmem:[#allocation23_spill] sm:$0xff]  ;;  %v17305_v53 = vld [vmem:[#allocation30_spill] sm:$0xff] }
 0x4ac   :  { %4838 = vadd.xlane.f32.xlu0 %v4837_v5  ;;  %4841 = vadd.xlane.f32.xlu1 %v4840_v28  ;;  %v4843_v43 = vsel %vm2242_vm3, %v15682_v16, 0.0  ;;  %v15730_v34 = vpop.permute.xlu1 %5378  ;;  %v17306_v5 = vld [vmem:[#allocation27_spill] sm:$0xff] }
 0x4ad   :  { %14045 = vpow2.f32 %v4817_v37 }
 0x4ae   :  { %v15684_v36 = vpop.eup %14033 }
 0x4af   :  { %v4846_v19 = vsel %vm2242_vm3, %v15684_v36, 0.0  ;;  %v15690_v54 = vpop.eup %14035  ;;  %v15748_v11 = vpop.permute.xlu0 %5455 }
 0x4b0   :  { %4844 = vadd.xlane.f32.xlu0 %v4843_v43  ;;  %4847 = vadd.xlane.f32.xlu1 %v4846_v19  ;;  %v4849_v55 = vsel %vm2242_vm3, %v15690_v54, 0.0  ;;  %v15740_v48 = vpop.permute.xlu1 %5532  ;;  %v17307_v43 = vld [vmem:[#allocation31_spill] sm:$0xff]  ;;  %v17308_v19 = vld [vmem:[#allocation34_spill] sm:$0xff] }
 0x4b2   :  { %v15692_v51 = vpop.eup %14037 }
 0x4b3   :  { %v4852_v60 = vsel %vm2242_vm3, %v15692_v51, 0.0  ;;  %v15698_v42 = vpop.eup %14039  ;;  %v15756_v37 = vpop.permute.xlu0 %5609 }
 0x4b4   :  { %4850 = vadd.xlane.f32.xlu0 %v4849_v55  ;;  %4853 = vadd.xlane.f32.xlu1 %v4852_v60  ;;  %v4855_v14 = vsel %vm2242_vm3, %v15698_v42, 0.0  ;;  %v15750_v18 = vpop.permute.xlu1 %5686  ;;  %v17309_v55 = vld [vmem:[#allocation32_spill] sm:$0xff] }
 0x4b6   :  { %v15700_v57 = vpop.eup %14041 }
 0x4b7   :  { %v4858_v25 = vsel %vm2242_vm3, %v15700_v57, 0.0  ;;  %v15706_v8 = vpop.eup %14043  ;;  %v15768_v60 = vpop.permute.xlu0 %5763 }
 0x4b8   :  { %4856 = vadd.xlane.f32.xlu0 %v4855_v14  ;;  %4859 = vadd.xlane.f32.xlu1 %v4858_v25  ;;  %v4861_v32 = vsel %vm2242_vm3, %v15706_v8, 0.0  ;;  %v15760_v28 = vpop.permute.xlu1 %5840  ;;  %v17310_v25 = vld [vmem:[#allocation33_spill] sm:$0xff] }
 0x4ba   :  { %v15708_v38 = vpop.eup %14045 }
 0x4bb   :  { %v4864_v61 = vsel %vm2242_vm3, %v15708_v38, 0.0 }
 0x4bc   :  { %4862 = vadd.xlane.f32.xlu0 %v4861_v32  ;;  %4865 = vadd.xlane.f32.xlu1 %v4864_v61  ;;  %v15770_v14 = vpop.permute.xlu1 %5994  ;;  %v15776_v32 = vpop.permute.xlu0 %5917 }
 0x4c0   :  { %v15780_v61 = vpop.permute.xlu1 %6230 }
 0x4cd   :  { %6854 = vrot.lane.b32.xlu1 %v14992_v17, %s14311_s8 }
 0x4d1   :  { %6852 = vrot.lane.b32.xlu1 %v15013_v23, %s14311_s8 }
 0x4d2   :  { %6774 = vrot.lane.b32.xlu0 %v15040_v31, %s14311_s8 }
 0x4d5   :  { %7010 = vrot.lane.b32.xlu1 %v15009_v22, %s14311_s8 }
 0x4d6   :  { %6932 = vrot.lane.b32.xlu0 %v15046_v33, %s14311_s8 }
 0x4d9   :  { %7008 = vrot.lane.b32.xlu1 %v15032_v27, %s14311_s8 }
 0x4da   :  { %6930 = vrot.lane.b32.xlu0 %v15068_v39, %s14311_s8 }
 0x4dd   :  { %7166 = vrot.lane.b32.xlu1 %v15028_v26, %s14311_s8 }
 0x4de   :  { %7088 = vrot.lane.b32.xlu0 %v17301_v44, %s14311_s8 }
 0x4e1   :  { %7164 = vrot.lane.b32.xlu1 %v17302_v9, %s14311_s8 }
 0x4e2   :  { %7086 = vrot.lane.b32.xlu0 %v17303_v12, %s14311_s8  ;;  %v17322_v12 = vld [vmem:[#allocation17_spill] sm:$0xff] }
 0x4e5   :  { %7322 = vrot.lane.b32.xlu1 %v17304_v62, %s14311_s8 }
 0x4e6   :  { %7244 = vrot.lane.b32.xlu0 %v17305_v53, %s14311_s8 }
 0x4e9   :  { %7320 = vrot.lane.b32.xlu1 %v17306_v5, %s14311_s8 }
 0x4ea   :  { %7242 = vrot.lane.b32.xlu0 %v17307_v43, %s14311_s8  ;;  %v17319_v43 = vld [vmem:[#allocation13_spill] sm:$0xff] }
 0x4ed   :  { %7696 = vrot.lane.b32.xlu1 %v17308_v19, %s14311_s8  ;;  %v17311_v19 = vld [vmem:[#allocation28_spill] sm:$0xff] }
 0x4ee   :  { %7400 = vrot.lane.b32.xlu0 %v17309_v55, %s14311_s8  ;;  %v15790_v55 = vpop.permute.xlu1 %6228 }
 0x4f1   :  { %7772 = vrot.lane.b32.xlu1 %v15280_v21, %s14311_s8  ;;  %v15788_v21 = vpop.permute.xlu0 %6071 }
 0x4f2   :  { %7398 = vrot.lane.b32.xlu0 %v17310_v25, %s14311_s8 }
 0x4f5   :  { %7924 = vrot.lane.b32.xlu1 %v15292_v30, %s14311_s8  ;;  %v15796_v30 = vpop.permute.xlu0 %6308 }
 0x4f6   :  { %7620 = vrot.lane.b32.xlu0 %v17311_v19, %s14311_s8  ;;  %v15800_v19 = vpop.permute.xlu1 %6386 }
 0x4f9   :  { %8076 = vrot.lane.b32.xlu1 %v15306_v49, %s14311_s8 }
 0x4fa   :  { %7848 = vrot.lane.b32.xlu0 %v15288_v24, %s14311_s8  ;;  %v15810_v24 = vpop.permute.xlu1 %6384 }
 0x4fd   :  { %8228 = vrot.lane.b32.xlu1 %v15320_v52, %s14311_s8  ;;  %v15808_v52 = vpop.permute.xlu0 %6306 }
 0x4fe   :  { %8000 = vrot.lane.b32.xlu0 %v15302_v0, %s14311_s8  ;;  %v17314_v0 = vld [vmem:[#allocation14_spill] sm:$0xff] }
 0x501   :  { %8380 = vrot.lane.b32.xlu1 %v15334_v56, %s14311_s8  ;;  %v15816_v56 = vpop.permute.xlu0 %6464 }
 0x502   :  { %8152 = vrot.lane.b32.xlu0 %v15316_v63, %s14311_s8  ;;  %v17312_v63 = vld [vmem:[#allocation12_spill] sm:$0xff] }
 0x505   :  { %8532 = vrot.lane.b32.xlu1 %v15348_v6, %s14311_s8  ;;  %v15820_v6 = vpop.permute.xlu1 %6542 }
 0x506   :  { %8304 = vrot.lane.b32.xlu0 %v15330_v58, %s14311_s8  ;;  %v17313_v58 = vld [vmem:[#allocation5_spill] sm:$0xff] }
 0x509   :  { %8684 = vrot.lane.b32.xlu1 %v15364_v50, %s14311_s8  ;;  %v15828_v50 = vpop.permute.xlu0 %6462 }
 0x50a   :  { %8456 = vrot.lane.b32.xlu0 %v15344_v13, %s14311_s8  ;;  %v15830_v13 = vpop.permute.xlu1 %6540 }
 0x50d   :  { %8919 = vrot.lane.b32.xlu1 %v17312_v63, %s14312_s1  ;;  %v17315_v63 = vld [vmem:[#allocation11_spill] sm:$0xff]  ;;  %v15836_v49 = vpop.permute.xlu0 %6620 }
 0x50e   :  { %8608 = vrot.lane.b32.xlu0 %v15360_v47, %s14311_s8  ;;  %v17316_v47 = vld [vmem:[#allocation7_spill] sm:$0xff]  ;;  %v15840_v25 = vpop.permute.xlu1 %6698 }
 0x511   :  { %8917 = vrot.lane.b32.xlu1 %v17313_v58, %s14312_s1  ;;  %v17317_v58 = vld [vmem:[#allocation4_spill] sm:$0xff] }
 0x512   :  { %8760 = vrot.lane.b32.xlu0 %v15376_v1, %s14311_s8  ;;  %v17318_v1 = vld [vmem:[#allocation15_spill] sm:$0xff]  ;;  %v15850_v5 = vpop.permute.xlu1 %6696 }
 0x515   :  { %9075 = vrot.lane.b32.xlu1 %v17314_v0, %s14312_s1  ;;  %v15848_v0 = vpop.permute.xlu0 %6618 }
 0x516   :  { %8997 = vrot.lane.b32.xlu0 %v17315_v63, %s14312_s1  ;;  %v17320_v63 = vld [vmem:[#allocation9_spill] sm:$0xff] }
 0x519   :  { %9073 = vrot.lane.b32.xlu1 %v17316_v47, %s14312_s1  ;;  %v17321_v47 = vld [vmem:[#allocation6_spill] sm:$0xff]  ;;  %v15856_v62 = vpop.permute.xlu0 %6776 }
 0x51a   :  { %8995 = vrot.lane.b32.xlu0 %v17317_v58, %s14312_s1 }
 0x51d   :  { %9231 = vrot.lane.b32.xlu1 %v17318_v1, %s14312_s1  ;;  %v17323_v1 = vld [vmem:[#allocation16_spill] sm:$0xff] }
 0x51e   :  { %9153 = vrot.lane.b32.xlu0 %v17319_v43, %s14312_s1  ;;  %v17324_v43 = vld [vmem:[#allocation10_spill] sm:$0xff] }
 0x521   :  { %9229 = vrot.lane.b32.xlu1 %v17320_v63, %s14312_s1  ;;  %v17325_v63 = vld [vmem:[#allocation8_spill] sm:$0xff] }
 0x522   :  { %9151 = vrot.lane.b32.xlu0 %v17321_v47, %s14312_s1 }
 0x524   :  { %v4821_v53 = vpop.xlane.xlu1 %4820 }
 0x525   :  { %v4867_v58 = vadd.f32 1e-08, %v4821_v53  ;;  %9387 = vrot.lane.b32.xlu1 %v17322_v12, %s14312_s1 }
 0x526   :  { %9309 = vrot.lane.b32.xlu0 %v17323_v1, %s14312_s1 }
 0x527   :  { %14047 = vrcp.f32 %v4867_v58 }
 0x529   :  { %9385 = vrot.lane.b32.xlu1 %v17324_v43, %s14312_s1  ;;  %v4824_v9 = vpop.xlane.xlu0 %4823 }
 0x52a   :  { %v4868_v44 = vadd.f32 1e-08, %v4824_v9  ;;  %9307 = vrot.lane.b32.xlu0 %v17325_v63, %s14312_s1 }
 0x52c   :  { %14049 = vrcp.f32 %v4868_v44 }
 0x52d   :  { %v4830_v47 = vpop.xlane.xlu1 %4829  ;;  %v4827_v26 = vpop.xlane.xlu0 %4826 }
 0x52e   :  { %v4870_v39 = vadd.f32 1e-08, %v4830_v47  ;;  %v4869_v53 = vadd.f32 1e-08, %v4827_v26  ;;  %9465 = vrot.lane.b32.xlu0 %v17296_v59, %s14312_s1 }
 0x530   :  { %14051 = vrcp.f32 %v4870_v39 }
 0x531   :  { %14053 = vrcp.f32 %v4869_v53  ;;  %v4836_v12 = vpop.xlane.xlu1 %4835  ;;  %v4833_v58 = vpop.xlane.xlu0 %4832 }
 0x532   :  { %v4872_v1 = vadd.f32 1e-08, %v4836_v12  ;;  %v4871_v27 = vadd.f32 1e-08, %v4833_v58 }
 0x534   :  { %v14048_v43 = vpop.eup %14047  ;;  %14055 = vrcp.f32 %v4872_v1 }
 0x535   :  { %14057 = vrcp.f32 %v4871_v27  ;;  %v4842_v9 = vpop.xlane.xlu1 %4841  ;;  %v4839_v33 = vpop.xlane.xlu0 %4838  ;;  %v4899_v44 = vmul.f32 %v14048_v43, %v15650_v35 }
 0x536   :  { %v4874_v63 = vadd.f32 1e-08, %v4842_v9  ;;  %v4873_v22 = vadd.f32 1e-08, %v4839_v33 }
 0x537   :  { %13435 = vmatmul.mubr.msk.f32.vlgmr.msra.gmra.mxu0 %vm2242_vm3, %v4899_v44 }
 0x538   :  { %14059 = vrcp.f32 %v4874_v63  ;;  %13443 = vmatpush3.msra.mxu0 %v15714_v41  ;;  %13444 = vmatprep.mubr.msk.f32.mxu0 %vm14309_vm1, %v17298_v20 }
 0x539   :  { %v14050_v26 = vpop.eup %14049  ;;  %14061 = vrcp.f32 %v4873_v22  ;;  %v4848_v39 = vpop.xlane.xlu1 %4847  ;;  %13452 = vmatprep.subr.mxu0 %v17298_v20 }
 0x53a   :  { %v4845_v59 = vpop.xlane.xlu0 %4844  ;;  %v4876_v27 = vadd.f32 1e-08, %v4848_v39  ;;  %v4900_v35 = vmul.f32 %v14050_v26, %v15654_v3 }
 0x53b   :  { %v4875_v47 = vadd.f32 1e-08, %v4845_v59 }
 0x53c   :  { %14063 = vrcp.f32 %v4876_v27  ;;  %13440 = vmatmul.mubr.msk.f32.vlgmr.msra.gmra.mxu1 %vm2242_vm3, %v4900_v35 }
 0x53d   :  { %v14052_v33 = vpop.eup %14051  ;;  %14065 = vrcp.f32 %v4875_v47  ;;  %13448 = vmatpush3.msra.mxu1 %v15728_v4  ;;  %v4854_v41 = vpop.xlane.xlu1 %4853  ;;  %13449 = vmatprep.mubr.msk.f32.mxu1 %vm14309_vm1, %v17298_v20 }
 0x53e   :  { %v4851_v53 = vpop.xlane.xlu0 %4850  ;;  %v14054_v22 = vpop.eup %14053  ;;  %v4878_v12 = vadd.f32 1e-08, %v4854_v41  ;;  %13457 = vmatprep.subr.mxu1 %v17298_v20  ;;  %v4902_v1 = vmul.f32 %v14052_v33, %v15660_v2 }
 0x53f   :  { %v4877_v58 = vadd.f32 1e-08, %v4851_v53  ;;  %v4901_v3 = vmul.f32 %v14054_v22, %v15656_v46 }
 0x540   :  { %14067 = vrcp.f32 %v4878_v12  ;;  %13450 = vmatmul.mubr.msk.f32.vlgmr.msra.gmra.mxu1 %vm2242_vm3, %v4902_v1 }
 0x541   :  { %v14056_v43 = vpop.eup %14055  ;;  %14069 = vrcp.f32 %v4877_v58  ;;  %13445 = vmatmul.mubr.msk.f32.vlgmr.msra.gmra.mxu0 %vm2242_vm3, %v4901_v3  ;;  %13458 = vmatpush3.msra.mxu1 %v15736_v15  ;;  %v4860_v4 = vpop.xlane.xlu1 %4859 }
 0x542   :  { %v4857_v9 = vpop.xlane.xlu0 %4856  ;;  %v14058_v44 = vpop.eup %14057  ;;  %13453 = vmatpush3.msra.mxu0 %v15720_v29  ;;  %v4880_v63 = vadd.f32 1e-08, %v4860_v4  ;;  %13454 = vmatprep.mubr.msk.f32.mxu0 %vm14309_vm1, %v17298_v20  ;;  %v4904_v46 = vmul.f32 %v14056_v43, %v15668_v40 }
 0x543   :  { %v4879_v26 = vadd.f32 1e-08, %v4857_v9  ;;  %13459 = vmatprep.mubr.msk.f32.mxu1 %vm14309_vm1, %v17298_v20  ;;  %13462 = vmatprep.subr.mxu0 %v17298_v20  ;;  %v4903_v2 = vmul.f32 %v14058_v44, %v15664_v10 }
 0x544   :  { %14071 = vrcp.f32 %v4880_v63  ;;  %13467 = vmatprep.subr.mxu1 %v17298_v20  ;;  %13460 = vmatmul.mubr.msk.f32.vlgmr.msra.gmra.mxu1 %vm2242_vm3, %v4904_v46 }
 0x545   :  { %v14060_v29 = vpop.eup %14059  ;;  %14073 = vrcp.f32 %v4879_v26  ;;  %13455 = vmatmul.mubr.msk.f32.vlgmr.msra.gmra.mxu0 %vm2242_vm3, %v4903_v2  ;;  %13468 = vmatpush3.msra.mxu1 %v15748_v11  ;;  %v4866_v15 = vpop.xlane.xlu1 %4865 }
 0x546   :  { %v4863_v40 = vpop.xlane.xlu0 %4862  ;;  %v14062_v39 = vpop.eup %14061  ;;  %13463 = vmatpush3.msra.mxu0 %v15730_v34  ;;  %v4882_v59 = vadd.f32 1e-08, %v4866_v15  ;;  %13464 = vmatprep.mubr.msk.f32.mxu0 %vm14309_vm1, %v17298_v20  ;;  %v4906_v10 = vmul.f32 %v14060_v29, %v15676_v7 }
 0x547   :  { %v4881_v27 = vadd.f32 1e-08, %v4863_v40  ;;  %13469 = vmatprep.mubr.msk.f32.mxu1 %vm14309_vm1, %v17298_v20  ;;  %13472 = vmatprep.subr.mxu0 %v17298_v20  ;;  %v4905_v47 = vmul.f32 %v14062_v39, %v15674_v45 }
 0x548   :  { %14075 = vrcp.f32 %v4882_v59  ;;  %13477 = vmatprep.subr.mxu1 %v17298_v20  ;;  %13470 = vmatmul.mubr.msk.f32.vlgmr.msra.gmra.mxu1 %vm2242_vm3, %v4906_v10 }
 0x549   :  { %v14064_v34 = vpop.eup %14063  ;;  %14077 = vrcp.f32 %v4881_v27  ;;  %13465 = vmatmul.mubr.msk.f32.vlgmr.msra.gmra.mxu0 %vm2242_vm3, %v4905_v47  ;;  %13478 = vmatpush3.msra.mxu1 %v15756_v37  ;;  %v15909_v11 = vpop.permute.xlu1 %6854 }
 0x54a   :  { %v15911_v7 = vpop.permute.xlu0 %6774  ;;  %v14066_v35 = vpop.eup %14065  ;;  %13473 = vmatpush3.msra.mxu0 %v15740_v48  ;;  %13474 = vmatprep.mubr.msk.f32.mxu0 %vm14309_vm1, %v17298_v20  ;;  %v4908_v45 = vmul.f32 %v14064_v34, %v15684_v36 }
 0x54b   :  { %13479 = vmatprep.mubr.msk.f32.mxu1 %vm14309_vm1, %v17298_v20  ;;  %13482 = vmatprep.subr.mxu0 %v17298_v20  ;;  %v4907_v33 = vmul.f32 %v14066_v35, %v15682_v16 }
 0x54c   :  { %13487 = vmatprep.subr.mxu1 %v17298_v20  ;;  %13480 = vmatmul.mubr.msk.f32.vlgmr.msra.gmra.mxu1 %vm2242_vm3, %v4908_v45 }
 0x54d   :  { %v14068_v37 = vpop.eup %14067  ;;  %13475 = vmatmul.mubr.msk.f32.vlgmr.msra.gmra.mxu0 %vm2242_vm3, %v4907_v33  ;;  %13488 = vmatpush3.msra.mxu1 %v15768_v60  ;;  %v15928_v36 = vpop.permute.xlu1 %6852 }
 0x54e   :  { %v15925_v48 = vpop.permute.xlu0 %6932  ;;  %v14070_v41 = vpop.eup %14069  ;;  %13483 = vmatpush3.msra.mxu0 %v15750_v18  ;;  %13484 = vmatprep.mubr.msk.f32.mxu0 %vm14309_vm1, %v17298_v20  ;;  %v4910_v16 = vmul.f32 %v14068_v37, %v15692_v51 }
 0x54f   :  { %13489 = vmatprep.mubr.msk.f32.mxu1 %vm14309_vm1, %v17298_v20  ;;  %13492 = vmatprep.subr.mxu0 %v17298_v20  ;;  %v4909_v53 = vmul.f32 %v14070_v41, %v15690_v54 }
 0x550   :  { %13497 = vmatprep.subr.mxu1 %v17298_v20  ;;  %13490 = vmatmul.mubr.msk.f32.vlgmr.msra.gmra.mxu1 %vm2242_vm3, %v4910_v16 }
 0x551   :  { %v14072_v60 = vpop.eup %14071  ;;  %13485 = vmatmul.mubr.msk.f32.vlgmr.msra.gmra.mxu0 %vm2242_vm3, %v4909_v53  ;;  %13498 = vmatpush3.msra.mxu1 %v15776_v32  ;;  %v15951_v12 = vpop.permute.xlu1 %7010 }
 0x552   :  { %v15941_v18 = vpop.permute.xlu0 %6930  ;;  %v14074_v22 = vpop.eup %14073  ;;  %13493 = vmatpush3.msra.mxu0 %v15760_v28  ;;  %13494 = vmatprep.mubr.msk.f32.mxu0 %vm14309_vm1, %v17298_v20  ;;  %v4912_v51 = vmul.f32 %v14072_v60, %v15700_v57 }
 0x553   :  { %13499 = vmatprep.mubr.msk.f32.mxu1 %vm14309_vm1, %v17298_v20  ;;  %13502 = vmatprep.subr.mxu0 %v17298_v20  ;;  %v4911_v54 = vmul.f32 %v14074_v22, %v15698_v42 }
 0x554   :  { %13507 = vmatprep.subr.mxu1 %v17298_v20  ;;  %13500 = vmatmul.mubr.msk.f32.vlgmr.msra.gmra.mxu1 %vm2242_vm3, %v4912_v51 }
 0x555   :  { %v14076_v32 = vpop.eup %14075  ;;  %13495 = vmatmul.mubr.msk.f32.vlgmr.msra.gmra.mxu0 %vm2242_vm3, %v4911_v54  ;;  %13508 = vmatpush3.msra.mxu1 %v15788_v21  ;;  %v7009_v21 = vpop.permute.xlu1 %7008 }
 0x556   :  { %v7089_v28 = vpop.permute.xlu0 %7088  ;;  %v14078_v57 = vpop.eup %14077  ;;  %13503 = vmatpush3.msra.mxu0 %v15770_v14  ;;  %13504 = vmatprep.mubr.msk.f32.mxu0 %vm14309_vm1, %v17298_v20  ;;  %v4914_v42 = vmul.f32 %v14076_v32, %v15708_v38 }
 0x557   :  { %13509 = vmatprep.mubr.msk.f32.mxu1 %vm14309_vm1, %v17298_v20  ;;  %13512 = vmatprep.subr.mxu0 %v17298_v20  ;;  %v4913_v58 = vmul.f32 %v14078_v57, %v15706_v8 }
 0x558   :  { %13517 = vmatprep.subr.mxu1 %v17298_v20  ;;  %13510 = vmatmul.mubr.msk.f32.vlgmr.msra.gmra.mxu1 %vm2242_vm3, %v4914_v42 }
 0x559   :  { %13505 = vmatmul.mubr.msk.f32.vlgmr.msra.gmra.mxu0 %vm2242_vm3, %v4913_v58  ;;  %13518 = vmatpush3.xpose.msk.msra.mxu1 %vm977_vm2, %v15796_v30  ;;  %v7167_v30 = vpop.permute.xlu1 %7166 }
 0x55a   :  { %13513 = vmatpush3.xpose.msk.msra.mxu0 %vm977_vm2, %v15780_v61  ;;  %13514 = vmatprep.mubr.msk.f32.mxu0 %vm14309_vm1, %v17298_v20  ;;  %v7087_v38 = vpop.permute.xlu0 %7086 }
 0x55b   :  { %13519 = vmatprep.mubr.msk.f32.mxu1 %vm14309_vm1, %v17298_v20  ;;  %13522 = vmatprep.subr.mxu0 %v17298_v20 }
 0x55c   :  { %13527 = vmatprep.subr.mxu1 %v17298_v20  ;;  %13520 = vmatmul.mubr.msk.f32.vlgmr.msra.gmra.mxu1 %vm977_vm2, %v15808_v52 }
 0x55d   :  { %13515 = vmatmul.mubr.msk.f32.vlgmr.msra.gmra.mxu0 %vm977_vm2, %v15790_v55  ;;  %13528 = vmatpush3.xpose.msk.msra.mxu1 %vm977_vm2, %v15816_v56 }
 0x55e   :  { %13523 = vmatpush3.xpose.msk.msra.mxu0 %vm977_vm2, %v15800_v19  ;;  %13524 = vmatprep.mubr.msk.f32.mxu0 %vm14309_vm1, %v17298_v20  ;;  %v7245_v52 = vpop.permute.xlu0 %7244 }
 0x55f   :  { %13529 = vmatprep.mubr.msk.f32.mxu1 %vm14309_vm1, %v17298_v20  ;;  %13532 = vmatprep.subr.mxu0 %v17298_v20 }
 0x560   :  { %13537 = vmatprep.subr.mxu1 %v17298_v20  ;;  %13530 = vmatmul.mubr.msk.f32.vlgmr.msra.gmra.mxu1 %vm977_vm2, %v15828_v50 }
 0x561   :  { %13525 = vmatmul.mubr.msk.f32.vlgmr.msra.gmra.mxu0 %vm977_vm2, %v15810_v24  ;;  %13538 = vmatpush3.xpose.msk.msra.mxu1 %vm977_vm2, %v15836_v49  ;;  %v7165_v24 = vpop.permute.xlu1 %7164 }
 0x562   :  { %13533 = vmatpush3.xpose.msk.msra.mxu0 %vm977_vm2, %v15820_v6  ;;  %13534 = vmatprep.mubr.msk.f32.mxu0 %vm14309_vm1, %v17298_v20  ;;  %v7243_v49 = vpop.permute.xlu0 %7242 }
 0x563   :  { %13539 = vmatprep.mubr.msk.f32.mxu1 %vm14309_vm1, %v17298_v20  ;;  %13542 = vmatprep.subr.mxu0 %v17298_v20 }
 0x564   :  { %13547 = vmatprep.subr.mxu1 %v17298_v20  ;;  %13540 = vmatmul.mubr.msk.f32.vlgmr.msra.gmra.mxu1 %vm977_vm2, %v15848_v0 }
 0x565   :  { %13535 = vmatmul.mubr.msk.f32.vlgmr.msra.gmra.mxu0 %vm977_vm2, %v15830_v13  ;;  %13548 = vmatpush3.xpose.msk.msra.mxu1 %vm977_vm2, %v15856_v62  ;;  %v7323_v56 = vpop.permute.xlu1 %7322 }
 0x566   :  { %13543 = vmatpush3.xpose.msk.msra.mxu0 %vm977_vm2, %v15840_v25  ;;  %13544 = vmatprep.mubr.msk.f32.mxu0 %vm14309_vm1, %v17298_v20  ;;  %v7401_v13 = vpop.permute.xlu0 %7400 }
 0x567   :  { %13549 = vmatprep.mubr.msk.f32.mxu1 %vm14309_vm1, %v17298_v20  ;;  %13552 = vmatprep.subr.mxu0 %v17298_v20 }
 0x568   :  { %13557 = vmatprep.subr.mxu1 %v17298_v20  ;;  %13550 = vmatmul.mubr.msk.f32.vlgmr.msra.gmra.mxu1 %vm977_vm2, %v15911_v7 }
 0x569   :  { %13545 = vmatmul.mubr.msk.f32.vlgmr.msra.gmra.mxu0 %vm977_vm2, %v15850_v5  ;;  %13558 = vmatpush3.xpose.msk.msra.mxu1 %vm977_vm2, %v15925_v48  ;;  %v7321_v6 = vpop.permute.xlu1 %7320 }
 0x56a   :  { %13553 = vmatpush3.xpose.msk.msra.mxu0 %vm977_vm2, %v15909_v11  ;;  %13554 = vmatprep.mubr.msk.f32.mxu0 %vm14309_vm1, %v17298_v20  ;;  %v7399_v50 = vpop.permute.xlu0 %7398 }
 0x56b   :  { %13559 = vmatprep.mubr.msk.f32.mxu1 %vm14309_vm1, %v17298_v20  ;;  %13562 = vmatprep.subr.mxu0 %v17298_v20 }
 0x56c   :  { %13567 = vmatprep.subr.mxu1 %v17298_v20  ;;  %13560 = vmatmul.mubr.msk.f32.vlgmr.msra.gmra.mxu1 %vm977_vm2, %v15941_v18 }
 0x56d   :  { %13555 = vmatmul.mubr.msk.f32.vlgmr.msra.gmra.mxu0 %vm977_vm2, %v15928_v36  ;;  %13568 = vmatpush3.xpose.msk.msra.mxu1 %vm977_vm2, %v7089_v28  ;;  %v7697_v8 = vpop.permute.xlu1 %7696 }
 0x56e   :  { %13563 = vmatpush3.xpose.msk.msra.mxu0 %vm977_vm2, %v15951_v12  ;;  %13564 = vmatprep.mubr.msk.f32.mxu0 %vm14309_vm1, %v17298_v20  ;;  %v7621_v62 = vpop.permute.xlu0 %7620 }
 0x56f   :  { %13569 = vmatprep.mubr.msk.f32.mxu1 %vm14309_vm1, %v17298_v20  ;;  %13572 = vmatprep.subr.mxu0 %v17298_v20 }
 0x570   :  { %13577 = vmatprep.subr.mxu1 %v17298_v20  ;;  %13570 = vmatmul.mubr.msk.f32.vlgmr.msra.gmra.mxu1 %vm977_vm2, %v7087_v38 }
 0x571   :  { %13565 = vmatmul.mubr.msk.f32.vlgmr.msra.gmra.mxu0 %vm977_vm2, %v7009_v21  ;;  %13578 = vmatpush3.xpose.msk.msra.mxu1 %vm977_vm2, %v7245_v52 }
 0x572   :  { %13573 = vmatpush3.xpose.msk.msra.mxu0 %vm977_vm2, %v7167_v30  ;;  %13574 = vmatprep.mubr.msk.f32.mxu0 %vm14309_vm1, %v17298_v20 }
 0x573   :  { %13579 = vmatprep.mubr.msk.f32.mxu1 %vm14309_vm1, %v17298_v20  ;;  %13582 = vmatprep.subr.mxu0 %v17298_v20 }
 0x574   :  { %13587 = vmatprep.subr.mxu1 %v17298_v20  ;;  %13580 = vmatmul.mubr.msk.f32.vlgmr.msra.gmra.mxu1 %vm977_vm2, %v7243_v49 }
 0x575   :  { %13575 = vmatmul.mubr.msk.f32.vlgmr.msra.gmra.mxu0 %vm977_vm2, %v7165_v24  ;;  %13588 = vmatpush3.xpose.msk.msra.mxu1 %vm977_vm2, %v7401_v13 }
 0x576   :  { %13583 = vmatpush3.xpose.msk.msra.mxu0 %vm977_vm2, %v7323_v56  ;;  %13584 = vmatprep.mubr.msk.f32.mxu0 %vm14309_vm1, %v17298_v20 }
 0x577   :  { %13589 = vmatprep.mubr.msk.f32.mxu1 %vm14309_vm1, %v17298_v20  ;;  %13592 = vmatprep.subr.mxu0 %v17298_v20 }
 0x578   :  { %13597 = vmatprep.subr.mxu1 %v17298_v20  ;;  %13590 = vmatmul.mubr.msk.f32.vlgmr.msra.gmra.mxu1 %vm977_vm2, %v7399_v50 }
 0x579   :  { %13585 = vmatmul.mubr.msk.f32.vlgmr.msra.gmra.mxu0 %vm977_vm2, %v7321_v6  ;;  %13598 = vmatpush3.msra.mxu1 %v7697_v8 }
 0x57a   :  { %13593 = vmatpush3.msra.mxu0 %v7621_v62  ;;  %13594 = vmatprep.mubr.msk.f32.mxu0 %vm14309_vm1, %v17298_v20 }
 0x57b   :  { %13599 = vmatprep.mubr.msk.f32.mxu1 %vm14309_vm1, %v17298_v20  ;;  %13602 = vmatprep.subr.mxu0 %v17298_v20 }
 0x57c   :  { %13607 = vmatprep.subr.mxu1 %v17298_v20 }
 0x5f7   :  { %v16075_v5 = vpop.f32.mrf.mxu0 }
 0x5f9   :  { %v13436_v19 = vpop.f32.mrf.mxu0 }
 0x5fc   :  { %v16077_v55 = vpop.f32.mrf.mxu1 }
 0x5fe   :  { %v13441_v14 = vpop.f32.mrf.mxu1 }
 0x600   :  { %v16079_v25 = vpop.f32.mrf.mxu1 }
 0x601   :  { %17326 = vst [vmem:[#allocation18_spill] sm:$0xff] %v16079_v25  ;;  %v16081_v61 = vpop.f32.mrf.mxu0 }
 0x602   :  { %17327 = vst [vmem:[#allocation35_spill] sm:$0xff] %v16081_v61  ;;  %v13451_v0 = vpop.f32.mrf.mxu1 }
 0x603   :  { %v13446_v1 = vpop.f32.mrf.mxu0 }
 0x604   :  { %v16083_v3 = vpop.f32.mrf.mxu1 }
 0x605   :  { %17328 = vst [vmem:[#allocation36_spill] sm:$0xff] %v16083_v3  ;;  %v16085_v43 = vpop.f32.mrf.mxu0 }
 0x606   :  { %17329 = vst [vmem:[#allocation37_spill] sm:$0xff] %v16085_v43  ;;  %v13461_v4 = vpop.f32.mrf.mxu1 }
 0x607   :  { %v13456_v9 = vpop.f32.mrf.mxu0 }
 0x608   :  { %v16087_v44 = vpop.f32.mrf.mxu1 }
 0x609   :  { %17330 = vst [vmem:[#allocation12_spill] sm:$0xff] %v16087_v44  ;;  %v16089_v63 = vpop.f32.mrf.mxu0 }
 0x60a   :  { %17331 = vst [vmem:[#allocation5_spill] sm:$0xff] %v16089_v63  ;;  %v13471_v26 = vpop.f32.mrf.mxu1 }
 0x60b   :  { %v13466_v46 = vpop.f32.mrf.mxu0 }
 0x60c   :  { %v16091_v2 = vpop.f32.mrf.mxu1 }
 0x60d   :  { %17332 = vst [vmem:[#allocation14_spill] sm:$0xff] %v16091_v2  ;;  %v16093_v29 = vpop.f32.mrf.mxu0 }
 0x60e   :  { %17333 = vst [vmem:[#allocation11_spill] sm:$0xff] %v16093_v29  ;;  %v13481_v15 = vpop.f32.mrf.mxu1 }
 0x60f   :  { %v13476_v40 = vpop.f32.mrf.mxu0 }
 0x610   :  { %v16095_v39 = vpop.f32.mrf.mxu1 }
 0x611   :  { %17334 = vst [vmem:[#allocation7_spill] sm:$0xff] %v16095_v39  ;;  %v16097_v59 = vpop.f32.mrf.mxu0 }
 0x612   :  { %17335 = vst [vmem:[#allocation4_spill] sm:$0xff] %v16097_v59  ;;  %v13491_v27 = vpop.f32.mrf.mxu1 }
 0x613   :  { %v13486_v10 = vpop.f32.mrf.mxu0 }
 0x614   :  { %v16099_v47 = vpop.f32.mrf.mxu1 }
 0x615   :  { %17336 = vst [vmem:[#allocation15_spill] sm:$0xff] %v16099_v47  ;;  %v16101_v34 = vpop.f32.mrf.mxu0 }
 0x616   :  { %17337 = vst [vmem:[#allocation13_spill] sm:$0xff] %v16101_v34  ;;  %v13501_v11 = vpop.f32.mrf.mxu1 }
 0x617   :  { %v13496_v7 = vpop.f32.mrf.mxu0 }
 0x618   :  { %v16103_v35 = vpop.f32.mrf.mxu1 }
 0x619   :  { %17338 = vst [vmem:[#allocation9_spill] sm:$0xff] %v16103_v35  ;;  %v16105_v45 = vpop.f32.mrf.mxu0 }
 0x61a   :  { %17339 = vst [vmem:[#allocation6_spill] sm:$0xff] %v16105_v45  ;;  %v13511_v33 = vpop.f32.mrf.mxu1 }
 0x61b   :  { %v13506_v37 = vpop.f32.mrf.mxu0 }
 0x61c   :  { %v6380_v48 = vpop.f32.mrf.mxu1 }
 0x61d   :  { %v6302_v41 = vpop.f32.mrf.mxu0  ;;  %v7477_v36 = vmul.f32 0.2236068, %v6380_v48 }
 0x61e   :  { %v7476_v16 = vmul.f32 0.2236068, %v6302_v41  ;;  %v13521_v53 = vpop.f32.mrf.mxu1 }
 0x61f   :  { %v7494_v60 = vmul.f32 1.442695, %v7477_v36  ;;  %v13516_v18 = vpop.f32.mrf.mxu0 }
 0x620   :  { %v7492_v22 = vmul.f32 1.442695, %v7476_v16  ;;  %v6536_v51 = vpop.f32.mrf.mxu1 }
 0x621   :  { %14079 = vpow2.f32 %v7494_v60  ;;  %v6458_v54 = vpop.f32.mrf.mxu0  ;;  %v7479_v12 = vmul.f32 0.2236068, %v6536_v51 }
 0x622   :  { %14081 = vpow2.f32 %v7492_v22  ;;  %v7478_v32 = vmul.f32 0.2236068, %v6458_v54  ;;  %v13531_v28 = vpop.f32.mrf.mxu1 }
 0x623   :  { %v7498_v57 = vmul.f32 1.442695, %v7479_v12  ;;  %v13526_v42 = vpop.f32.mrf.mxu0 }
 0x624   :  { %v7496_v58 = vmul.f32 1.442695, %v7478_v32  ;;  %v6692_v21 = vpop.f32.mrf.mxu1 }
 0x625   :  { %14083 = vpow2.f32 %v7498_v57  ;;  %v6614_v38 = vpop.f32.mrf.mxu0  ;;  %v7481_v30 = vmul.f32 0.2236068, %v6692_v21 }
 0x626   :  { %14085 = vpow2.f32 %v7496_v58  ;;  %v7480_v52 = vmul.f32 0.2236068, %v6614_v38  ;;  %v13541_v24 = vpop.f32.mrf.mxu1 }
 0x627   :  { %v7502_v49 = vmul.f32 1.442695, %v7481_v30  ;;  %v13536_v56 = vpop.f32.mrf.mxu0 }
 0x628   :  { %v7500_v13 = vmul.f32 1.442695, %v7480_v52  ;;  %v6848_v6 = vpop.f32.mrf.mxu1 }
 0x629   :  { %14087 = vpow2.f32 %v7502_v49  ;;  %v6770_v50 = vpop.f32.mrf.mxu0  ;;  %v7483_v8 = vmul.f32 0.2236068, %v6848_v6 }
 0x62a   :  { %14089 = vpow2.f32 %v7500_v13  ;;  %v7482_v62 = vmul.f32 0.2236068, %v6770_v50  ;;  %v13551_v19 = vpop.f32.mrf.mxu1 }
 0x62b   :  { %v7506_v14 = vmul.f32 1.442695, %v7483_v8  ;;  %v13546_v0 = vpop.f32.mrf.mxu0 }
 0x62c   :  { %v7504_v1 = vmul.f32 1.442695, %v7482_v62  ;;  %v7004_v4 = vpop.f32.mrf.mxu1 }
 0x62d   :  { %14091 = vpow2.f32 %v7506_v14  ;;  %v6926_v9 = vpop.f32.mrf.mxu0  ;;  %v7485_v26 = vmul.f32 0.2236068, %v7004_v4 }
 0x62e   :  { %v16107_v46 = vpop.eup %14079  ;;  %14093 = vpow2.f32 %v7504_v1  ;;  %v7484_v15 = vmul.f32 0.2236068, %v6926_v9  ;;  %v13561_v40 = vpop.f32.mrf.mxu1 }
 0x62f   :  { %v16109_v27 = vpop.eup %14081  ;;  %v7510_v10 = vmul.f32 1.442695, %v7485_v26  ;;  %v13556_v11 = vpop.f32.mrf.mxu0  ;;  %v7527_v7 = vsel %vm2242_vm3, %v16107_v46, 0.0 }
 0x630   :  { %v7508_v33 = vmul.f32 1.442695, %v7484_v15  ;;  %7528 = vadd.xlane.f32.xlu0 %v7527_v7  ;;  %v7524_v37 = vsel %vm2242_vm3, %v16109_v27, 0.0  ;;  %v7160_v48 = vpop.f32.mrf.mxu1 }
 0x631   :  { %14095 = vpow2.f32 %v7510_v10  ;;  %7525 = vadd.xlane.f32.xlu1 %v7524_v37  ;;  %v7082_v41 = vpop.f32.mrf.mxu0  ;;  %v7487_v36 = vmul.f32 0.2236068, %v7160_v48 }
 0x632   :  { %v16115_v16 = vpop.eup %14083  ;;  %14097 = vpow2.f32 %v7508_v33  ;;  %v7486_v53 = vmul.f32 0.2236068, %v7082_v41  ;;  %v13571_v60 = vpop.f32.mrf.mxu1 }
 0x633   :  { %v16117_v18 = vpop.eup %14085  ;;  %v7514_v22 = vmul.f32 1.442695, %v7487_v36  ;;  %v13566_v51 = vpop.f32.mrf.mxu0  ;;  %v7533_v54 = vsel %vm2242_vm3, %v16115_v16, 0.0 }
 0x634   :  { %v7512_v12 = vmul.f32 1.442695, %v7486_v53  ;;  %v7530_v32 = vsel %vm2242_vm3, %v16117_v18, 0.0  ;;  %v7316_v28 = vpop.f32.mrf.mxu1 }
 0x635   :  { %14099 = vpow2.f32 %v7514_v22  ;;  %7534 = vadd.xlane.f32.xlu1 %v7533_v54  ;;  %7531 = vadd.xlane.f32.xlu0 %v7530_v32  ;;  %v7238_v57 = vpop.f32.mrf.mxu0  ;;  %v7489_v42 = vmul.f32 0.2236068, %v7316_v28  ;;  %v16173_v28 = vpop.permute.xlu1 %7772 }
 0x636   :  { %v16123_v58 = vpop.eup %14087  ;;  %14101 = vpow2.f32 %v7512_v12  ;;  %v7488_v21 = vmul.f32 0.2236068, %v7238_v57  ;;  %v13581_v38 = vpop.f32.mrf.mxu1  ;;  %v17340_v57 = vld [vmem:[#allocation19_spill] sm:$0xff] }
 0x637   :  { %v16125_v30 = vpop.eup %14089  ;;  %v7518_v52 = vmul.f32 1.442695, %v7489_v42  ;;  %v13576_v24 = vpop.f32.mrf.mxu0  ;;  %v7539_v49 = vsel %vm2242_vm3, %v16123_v58, 0.0 }
 0x638   :  { %v7516_v56 = vmul.f32 1.442695, %v7488_v21  ;;  %v7536_v13 = vsel %vm2242_vm3, %v16125_v30, 0.0  ;;  %v7472_v6 = vpop.f32.mrf.mxu1  ;;  %v16181_v42 = vpop.permute.xlu0 %7848  ;;  %v17341_v21 = vld [vmem:[#allocation22_spill] sm:$0xff] }
 0x639   :  { %14103 = vpow2.f32 %v7518_v52  ;;  %7540 = vadd.xlane.f32.xlu1 %v7539_v49  ;;  %7537 = vadd.xlane.f32.xlu0 %v7536_v13  ;;  %v7394_v50 = vpop.f32.mrf.mxu0  ;;  %v7491_v8 = vmul.f32 0.2236068, %v7472_v6  ;;  %v16185_v38 = vpop.permute.xlu1 %7924  ;;  %v17343_v52 = vld [vmem:[#allocation25_spill] sm:$0xff]  ;;  %v17345_v49 = vld [vmem:[#allocation26_spill] sm:$0xff] }
 0x63a   :  { %v16131_v62 = vpop.eup %14091  ;;  %14105 = vpow2.f32 %v7516_v56  ;;  %v7490_v19 = vmul.f32 0.2236068, %v7394_v50  ;;  %v13591_v14 = vpop.f32.mrf.mxu1  ;;  %v17346_v56 = vld [vmem:[#allocation24_spill] sm:$0xff]  ;;  %v17347_v6 = vld [vmem:[#allocation29_spill] sm:$0xff] }
 0x63b   :  { %v16133_v0 = vpop.eup %14093  ;;  %v7522_v1 = vmul.f32 1.442695, %v7491_v8  ;;  %v13586_v4 = vpop.f32.mrf.mxu0  ;;  %v7545_v9 = vsel %vm2242_vm3, %v16131_v62, 0.0  ;;  %v17348_v8 = vld [vmem:[#allocation23_spill] sm:$0xff] }
 0x63c   :  { %v7520_v26 = vmul.f32 1.442695, %v7490_v19  ;;  %v7542_v15 = vsel %vm2242_vm3, %v16133_v0, 0.0  ;;  %v17349_v19 = vld [vmem:[#allocation30_spill] sm:$0xff]  ;;  %v17350_v4 = vld [vmem:[#allocation27_spill] sm:$0xff] }
 0x63d   :  { %14107 = vpow2.f32 %v7522_v1  ;;  %7543 = vadd.xlane.f32.xlu0 %v7542_v15  ;;  %7546 = vadd.xlane.f32.xlu1 %v7545_v9  ;;  %v16193_v24 = vpop.permute.xlu1 %8076  ;;  %v17351_v9 = vld [vmem:[#allocation31_spill] sm:$0xff] }
 0x63e   :  { %v16139_v40 = vpop.eup %14095  ;;  %14109 = vpow2.f32 %v7520_v26  ;;  %v17352_v26 = vld [vmem:[#allocation34_spill] sm:$0xff] }
 0x63f   :  { %v16141_v10 = vpop.eup %14097  ;;  %v7551_v11 = vsel %vm2242_vm3, %v16139_v40, 0.0 }
 0x640   :  { %v7548_v7 = vsel %vm2242_vm3, %v16141_v10, 0.0 }
 0x641   :  { %7549 = vadd.xlane.f32.xlu0 %v7548_v7  ;;  %7552 = vadd.xlane.f32.xlu1 %v7551_v11  ;;  %v16205_v50 = vpop.permute.xlu1 %8228  ;;  %v17353_v11 = vld [vmem:[#allocation32_spill] sm:$0xff] }
 0x642   :  { %v16147_v33 = vpop.eup %14099 }
 0x643   :  { %v16149_v37 = vpop.eup %14101  ;;  %v7557_v48 = vsel %vm2242_vm3, %v16147_v33, 0.0 }
 0x644   :  { %v7554_v41 = vsel %vm2242_vm3, %v16149_v37, 0.0 }
 0x645   :  { %7555 = vadd.xlane.f32.xlu0 %v7554_v41  ;;  %7558 = vadd.xlane.f32.xlu1 %v7557_v48  ;;  %v16213_v1 = vpop.permute.xlu1 %8380  ;;  %v17354_v48 = vld [vmem:[#allocation38_spill] sm:$0xff]  ;;  %v17355_v41 = vld [vmem:[#allocation33_spill] sm:$0xff] }
 0x646   :  { %v16155_v36 = vpop.eup %14103 }
 0x647   :  { %v16157_v53 = vpop.eup %14105  ;;  %v7563_v60 = vsel %vm2242_vm3, %v16155_v36, 0.0 }
 0x648   :  { %v7560_v22 = vsel %vm2242_vm3, %v16157_v53, 0.0 }
 0x649   :  { %7561 = vadd.xlane.f32.xlu0 %v7560_v22  ;;  %7564 = vadd.xlane.f32.xlu1 %v7563_v60  ;;  %v16225_v7 = vpop.permute.xlu1 %8532 }
 0x64a   :  { %v16163_v51 = vpop.eup %14107 }
 0x64b   :  { %v16165_v54 = vpop.eup %14109  ;;  %v7569_v12 = vsel %vm2242_vm3, %v16163_v51, 0.0 }
 0x64c   :  { %v7566_v32 = vsel %vm2242_vm3, %v16165_v54, 0.0 }
 0x64d   :  { %7567 = vadd.xlane.f32.xlu0 %v7566_v32  ;;  %7570 = vadd.xlane.f32.xlu1 %v7569_v12  ;;  %v16233_v22 = vpop.permute.xlu1 %8684  ;;  %v17356_v12 = vld [vmem:[#allocation40_spill] sm:$0xff] }
 0x64e   :  { %v17357_v32 = vld [vmem:[#allocation28_spill] sm:$0xff] }
 0x65e   :  { %9543 = vrot.lane.b32.xlu1 %v14992_v17, %s14312_s1  ;;  %v17342_v17 = vld [vmem:[#allocation21_spill] sm:$0xff] }
 0x662   :  { %9541 = vrot.lane.b32.xlu1 %v15013_v23, %s14312_s1  ;;  %v16191_v23 = vpop.permute.xlu0 %8000 }
 0x663   :  { %9463 = vrot.lane.b32.xlu0 %v15040_v31, %s14312_s1  ;;  %v17344_v31 = vld [vmem:[#allocation20_spill] sm:$0xff] }
 0x666   :  { %9699 = vrot.lane.b32.xlu1 %v17340_v57, %s14312_s1  ;;  %v16201_v13 = vpop.permute.xlu0 %8152  ;;  %v17358_v57 = vld [vmem:[#allocation42_spill] sm:$0xff] }
 0x667   :  { %9621 = vrot.lane.b32.xlu0 %v17341_v21, %s14312_s1 }
 0x66a   :  { %9697 = vrot.lane.b32.xlu1 %v17342_v17, %s14312_s1  ;;  %v16211_v14 = vpop.permute.xlu0 %8304  ;;  %v17359_v17 = vld [vmem:[#allocation39_spill] sm:$0xff] }
 0x66b   :  { %9619 = vrot.lane.b32.xlu0 %v17343_v52, %s14312_s1  ;;  %v16245_v52 = vpop.permute.xlu1 %8919 }
 0x66e   :  { %9855 = vrot.lane.b32.xlu1 %v17344_v31, %s14312_s1  ;;  %v16221_v15 = vpop.permute.xlu0 %8456  ;;  %v17360_v31 = vld [vmem:[#allocation44_spill] sm:$0xff] }
 0x66f   :  { %9777 = vrot.lane.b32.xlu0 %v17345_v49, %s14312_s1  ;;  %v17361_v49 = vld [vmem:[#allocation41_spill] sm:$0xff] }
 0x672   :  { %9853 = vrot.lane.b32.xlu1 %v17346_v56, %s14312_s1  ;;  %v16231_v60 = vpop.permute.xlu0 %8608 }
 0x673   :  { %9775 = vrot.lane.b32.xlu0 %v17347_v6, %s14312_s1  ;;  %v16253_v6 = vpop.permute.xlu1 %8917 }
 0x676   :  { %10011 = vrot.lane.b32.xlu1 %v17348_v8, %s14312_s1  ;;  %v16241_v21 = vpop.permute.xlu0 %8760  ;;  %v17362_v8 = vld [vmem:[#allocation46_spill] sm:$0xff] }
 0x677   :  { %9933 = vrot.lane.b32.xlu0 %v17349_v19, %s14312_s1  ;;  %v17363_v19 = vld [vmem:[#allocation43_spill] sm:$0xff] }
 0x67a   :  { %10009 = vrot.lane.b32.xlu1 %v17350_v4, %s14312_s1  ;;  %v16251_v56 = vpop.permute.xlu0 %8997  ;;  %v17364_v4 = vld [vmem:[#allocation48_spill] sm:$0xff] }
 0x67b   :  { %9931 = vrot.lane.b32.xlu0 %v17351_v9, %s14312_s1 }
 0x67e   :  { %10385 = vrot.lane.b32.xlu1 %v17352_v26, %s14312_s1  ;;  %v16261_v9 = vpop.permute.xlu0 %8995  ;;  %v17365_v26 = vld [vmem:[#allocation45_spill] sm:$0xff] }
 0x67f   :  { %10089 = vrot.lane.b32.xlu0 %v17353_v11, %s14312_s1  ;;  %v16265_v11 = vpop.permute.xlu1 %9075 }
 0x682   :  { %10461 = vrot.lane.b32.xlu1 %v17354_v48, %s14312_s1  ;;  %v17366_v48 = vld [vmem:[#allocation47_spill] sm:$0xff] }
 0x683   :  { %10087 = vrot.lane.b32.xlu0 %v17355_v41, %s14312_s1  ;;  %v16269_v41 = vpop.permute.xlu0 %9153 }
 0x686   :  { %10613 = vrot.lane.b32.xlu1 %v17356_v12, %s14312_s1  ;;  %v16271_v12 = vpop.permute.xlu1 %9073 }
 0x687   :  { %10309 = vrot.lane.b32.xlu0 %v17357_v32, %s14312_s1  ;;  %v17367_v32 = vld [vmem:[#allocation49_spill] sm:$0xff] }
 0x68a   :  { %10765 = vrot.lane.b32.xlu1 %v17358_v57, %s14312_s1  ;;  %v16275_v57 = vpop.permute.xlu0 %9151 }
 0x68b   :  { %10537 = vrot.lane.b32.xlu0 %v17359_v17, %s14312_s1  ;;  %v16277_v17 = vpop.permute.xlu1 %9231 }
 0x68e   :  { %10917 = vrot.lane.b32.xlu1 %v17360_v31, %s14312_s1  ;;  %v16279_v31 = vpop.permute.xlu0 %9309 }
 0x68f   :  { %10689 = vrot.lane.b32.xlu0 %v17361_v49, %s14312_s1  ;;  %v16281_v49 = vpop.permute.xlu1 %9229 }
 0x692   :  { %11069 = vrot.lane.b32.xlu1 %v17362_v8, %s14312_s1  ;;  %v16283_v8 = vpop.permute.xlu0 %9307 }
 0x693   :  { %10841 = vrot.lane.b32.xlu0 %v17363_v19, %s14312_s1  ;;  %v16285_v19 = vpop.permute.xlu1 %9387 }
 0x696   :  { %11221 = vrot.lane.b32.xlu1 %v17364_v4, %s14312_s1  ;;  %v16287_v4 = vpop.permute.xlu0 %9465 }
 0x697   :  { %10993 = vrot.lane.b32.xlu0 %v17365_v26, %s14312_s1  ;;  %v16289_v26 = vpop.permute.xlu1 %9385 }
 0x69b   :  { %11145 = vrot.lane.b32.xlu0 %v17366_v48, %s14312_s1 }
 0x69f   :  { %11297 = vrot.lane.b32.xlu0 %v17367_v32, %s14312_s1 }
 0x6b9   :  { %v7529_v48 = vpop.xlane.xlu0 %7528 }
 0x6ba   :  { %v7526_v35 = vpop.xlane.xlu1 %7525  ;;  %v7573_v45 = vadd.f32 1e-08, %v7529_v48 }
 0x6bb   :  { %v7572_v32 = vadd.f32 1e-08, %v7526_v35 }
 0x6bc   :  { %14111 = vrcp.f32 %v7573_v45 }
 0x6bd   :  { %14113 = vrcp.f32 %v7572_v32 }
 0x6be   :  { %v7535_v47 = vpop.xlane.xlu1 %7534  ;;  %v7532_v34 = vpop.xlane.xlu0 %7531 }
 0x6bf   :  { %v7575_v39 = vadd.f32 1e-08, %v7535_v47  ;;  %v7574_v59 = vadd.f32 1e-08, %v7532_v34 }
 0x6c1   :  { %14115 = vrcp.f32 %v7575_v39 }
 0x6c2   :  { %14117 = vrcp.f32 %v7574_v59  ;;  %v7541_v2 = vpop.xlane.xlu1 %7540  ;;  %v7538_v29 = vpop.xlane.xlu0 %7537 }
 0x6c3   :  { %v7577_v44 = vadd.f32 1e-08, %v7541_v2  ;;  %v7576_v63 = vadd.f32 1e-08, %v7538_v29 }
 0x6c5   :  { %14119 = vrcp.f32 %v7577_v44 }
 0x6c6   :  { %14121 = vrcp.f32 %v7576_v63  ;;  %v7547_v3 = vpop.xlane.xlu1 %7546  ;;  %v7544_v43 = vpop.xlane.xlu0 %7543 }
 0x6c7   :  { %v7579_v25 = vadd.f32 1e-08, %v7547_v3  ;;  %v7578_v61 = vadd.f32 1e-08, %v7544_v43 }
 0x6c9   :  { %v14112_v48 = vpop.eup %14111  ;;  %14123 = vrcp.f32 %v7579_v25 }
 0x6ca   :  { %v14114_v35 = vpop.eup %14113  ;;  %v7605_v45 = vmul.f32 %v14112_v48, %v16107_v46  ;;  %14125 = vrcp.f32 %v7578_v61  ;;  %v7553_v47 = vpop.xlane.xlu1 %7552 }
 0x6cb   :  { %v7550_v34 = vpop.xlane.xlu0 %7549  ;;  %v7581_v39 = vadd.f32 1e-08, %v7553_v47  ;;  %v7604_v32 = vmul.f32 %v14114_v35, %v16109_v27 }
 0x6cc   :  { %v7580_v59 = vadd.f32 1e-08, %v7550_v34  ;;  %13600 = vmatmul.mubr.msk.f32.vlgmr.msra.gmra.mxu1 %vm2242_vm3, %v7605_v45 }
 0x6cd   :  { %14127 = vrcp.f32 %v7581_v39  ;;  %13595 = vmatmul.mubr.msk.f32.vlgmr.msra.gmra.mxu0 %vm2242_vm3, %v7604_v32  ;;  %13608 = vmatpush3.msra.mxu1 %v16181_v42 }
 0x6ce   :  { %v14116_v3 = vpop.eup %14115  ;;  %14129 = vrcp.f32 %v7580_v59  ;;  %13603 = vmatpush3.msra.mxu0 %v16173_v28  ;;  %v7559_v25 = vpop.xlane.xlu1 %7558  ;;  %13604 = vmatprep.mubr.msk.f32.mxu0 %vm14309_vm1, %v17298_v20 }
 0x6cf   :  { %v7556_v43 = vpop.xlane.xlu0 %7555  ;;  %v14118_v61 = vpop.eup %14117  ;;  %v7607_v44 = vmul.f32 %v14116_v3, %v16115_v16  ;;  %v7583_v63 = vadd.f32 1e-08, %v7559_v25  ;;  %13609 = vmatprep.mubr.msk.f32.mxu1 %vm14309_vm1, %v17298_v20  ;;  %13612 = vmatprep.subr.mxu0 %v17298_v20 }
 0x6d0   :  { %v7582_v2 = vadd.f32 1e-08, %v7556_v43  ;;  %13617 = vmatprep.subr.mxu1 %v17298_v20  ;;  %v7606_v29 = vmul.f32 %v14118_v61, %v16117_v18 }
 0x6d1   :  { %14131 = vrcp.f32 %v7583_v63  ;;  %13610 = vmatmul.mubr.msk.f32.vlgmr.msra.gmra.mxu1 %vm2242_vm3, %v7607_v44 }
 0x6d2   :  { %v14120_v46 = vpop.eup %14119  ;;  %14133 = vrcp.f32 %v7582_v2  ;;  %13605 = vmatmul.mubr.msk.f32.vlgmr.msra.gmra.mxu0 %vm2242_vm3, %v7606_v29  ;;  %13618 = vmatpush3.msra.mxu1 %v16191_v23  ;;  %v7565_v27 = vpop.xlane.xlu1 %7564 }
 0x6d3   :  { %v7562_v16 = vpop.xlane.xlu0 %7561  ;;  %v14122_v28 = vpop.eup %14121  ;;  %v7609_v42 = vmul.f32 %v14120_v46, %v16123_v58  ;;  %13613 = vmatpush3.msra.mxu0 %v16185_v38  ;;  %v7585_v48 = vadd.f32 1e-08, %v7565_v27  ;;  %13614 = vmatprep.mubr.msk.f32.mxu0 %vm14309_vm1, %v17298_v20 }
 0x6d4   :  { %v7584_v35 = vadd.f32 1e-08, %v7562_v16  ;;  %13619 = vmatprep.mubr.msk.f32.mxu1 %vm14309_vm1, %v17298_v20  ;;  %13622 = vmatprep.subr.mxu0 %v17298_v20  ;;  %v7608_v18 = vmul.f32 %v14122_v28, %v16125_v30 }
 0x6d5   :  { %14135 = vrcp.f32 %v7585_v48  ;;  %13627 = vmatprep.subr.mxu1 %v17298_v20  ;;  %13620 = vmatmul.mubr.msk.f32.vlgmr.msra.gmra.mxu1 %vm2242_vm3, %v7609_v42 }
 0x6d6   :  { %v14124_v58 = vpop.eup %14123  ;;  %14137 = vrcp.f32 %v7584_v35  ;;  %13615 = vmatmul.mubr.msk.f32.vlgmr.msra.gmra.mxu0 %vm2242_vm3, %v7608_v18  ;;  %13628 = vmatpush3.msra.mxu1 %v16201_v13  ;;  %v7571_v38 = vpop.xlane.xlu1 %7570 }
 0x6d7   :  { %v7568_v23 = vpop.xlane.xlu0 %7567  ;;  %v14126_v45 = vpop.eup %14125  ;;  %v7611_v47 = vmul.f32 %v14124_v58, %v16131_v62  ;;  %13623 = vmatpush3.msra.mxu0 %v16193_v24  ;;  %v7587_v34 = vadd.f32 1e-08, %v7571_v38  ;;  %13624 = vmatprep.mubr.msk.f32.mxu0 %vm14309_vm1, %v17298_v20 }
 0x6d8   :  { %v7586_v30 = vadd.f32 1e-08, %v7568_v23  ;;  %13629 = vmatprep.mubr.msk.f32.mxu1 %vm14309_vm1, %v17298_v20  ;;  %13632 = vmatprep.subr.mxu0 %v17298_v20  ;;  %v7610_v39 = vmul.f32 %v14126_v45, %v16133_v0 }
 0x6d9   :  { %14139 = vrcp.f32 %v7587_v34  ;;  %13637 = vmatprep.subr.mxu1 %v17298_v20  ;;  %13630 = vmatmul.mubr.msk.f32.vlgmr.msra.gmra.mxu1 %vm2242_vm3, %v7611_v47 }
 0x6da   :  { %v14128_v62 = vpop.eup %14127  ;;  %14141 = vrcp.f32 %v7586_v30  ;;  %13625 = vmatmul.mubr.msk.f32.vlgmr.msra.gmra.mxu0 %vm2242_vm3, %v7610_v39  ;;  %13638 = vmatpush3.msra.mxu1 %v16211_v14  ;;  %v16332_v24 = vpop.permute.xlu1 %9543 }
 0x6db   :  { %v16334_v13 = vpop.permute.xlu0 %9463  ;;  %v14130_v59 = vpop.eup %14129  ;;  %v7613_v32 = vmul.f32 %v14128_v62, %v16139_v40  ;;  %13633 = vmatpush3.msra.mxu0 %v16205_v50  ;;  %13634 = vmatprep.mubr.msk.f32.mxu0 %vm14309_vm1, %v17298_v20 }
 0x6dc   :  { %13639 = vmatprep.mubr.msk.f32.mxu1 %vm14309_vm1, %v17298_v20  ;;  %13642 = vmatprep.subr.mxu0 %v17298_v20  ;;  %v7612_v0 = vmul.f32 %v14130_v59, %v16141_v10 }
 0x6dd   :  { %13647 = vmatprep.subr.mxu1 %v17298_v20  ;;  %13640 = vmatmul.mubr.msk.f32.vlgmr.msra.gmra.mxu1 %vm2242_vm3, %v7613_v32 }
 0x6de   :  { %v14132_v14 = vpop.eup %14131  ;;  %13635 = vmatmul.mubr.msk.f32.vlgmr.msra.gmra.mxu0 %vm2242_vm3, %v7612_v0  ;;  %13648 = vmatpush3.msra.mxu1 %v16221_v15  ;;  %v16352_v25 = vpop.permute.xlu1 %9541 }
 0x6df   :  { %v16348_v40 = vpop.permute.xlu0 %9621  ;;  %v14134_v50 = vpop.eup %14133  ;;  %v7615_v3 = vmul.f32 %v14132_v14, %v16147_v33  ;;  %13643 = vmatpush3.msra.mxu0 %v16213_v1  ;;  %13644 = vmatprep.mubr.msk.f32.mxu0 %vm14309_vm1, %v17298_v20 }
 0x6e0   :  { %v7614_v10 = vmul.f32 %v14134_v50, %v16149_v37  ;;  %13649 = vmatprep.mubr.msk.f32.mxu1 %vm14309_vm1, %v17298_v20  ;;  %13652 = vmatprep.subr.mxu0 %v17298_v20 }
 0x6e1   :  { %13657 = vmatprep.subr.mxu1 %v17298_v20  ;;  %13650 = vmatmul.mubr.msk.f32.vlgmr.msra.gmra.mxu1 %vm2242_vm3, %v7615_v3 }
 0x6e2   :  { %v14136_v15 = vpop.eup %14135  ;;  %13645 = vmatmul.mubr.msk.f32.vlgmr.msra.gmra.mxu0 %vm2242_vm3, %v7614_v10  ;;  %13658 = vmatpush3.msra.mxu1 %v16231_v60  ;;  %v16374_v61 = vpop.permute.xlu1 %9699 }
 0x6e3   :  { %v16364_v33 = vpop.permute.xlu0 %9619  ;;  %v14138_v1 = vpop.eup %14137  ;;  %v7617_v43 = vmul.f32 %v14136_v15, %v16155_v36  ;;  %13653 = vmatpush3.msra.mxu0 %v16225_v7  ;;  %13654 = vmatprep.mubr.msk.f32.mxu0 %vm14309_vm1, %v17298_v20 }
 0x6e4   :  { %v7616_v37 = vmul.f32 %v14138_v1, %v16157_v53  ;;  %13659 = vmatprep.mubr.msk.f32.mxu1 %vm14309_vm1, %v17298_v20  ;;  %13662 = vmatprep.subr.mxu0 %v17298_v20 }
 0x6e5   :  { %13667 = vmatprep.subr.mxu1 %v17298_v20  ;;  %13660 = vmatmul.mubr.msk.f32.vlgmr.msra.gmra.mxu1 %vm2242_vm3, %v7617_v43 }
 0x6e6   :  { %v14140_v60 = vpop.eup %14139  ;;  %13655 = vmatmul.mubr.msk.f32.vlgmr.msra.gmra.mxu0 %vm2242_vm3, %v7616_v37  ;;  %13668 = vmatpush3.msra.mxu1 %v16241_v21 }
 0x6e7   :  { %v9778_v36 = vpop.permute.xlu0 %9777  ;;  %v14142_v7 = vpop.eup %14141  ;;  %v7619_v53 = vmul.f32 %v14140_v60, %v16163_v51  ;;  %13663 = vmatpush3.msra.mxu0 %v16233_v22  ;;  %13664 = vmatprep.mubr.msk.f32.mxu0 %vm14309_vm1, %v17298_v20 }
 0x6e8   :  { %v7618_v44 = vmul.f32 %v14142_v7, %v16165_v54  ;;  %13669 = vmatprep.mubr.msk.f32.mxu1 %vm14309_vm1, %v17298_v20  ;;  %13672 = vmatprep.subr.mxu0 %v17298_v20  ;;  %v9698_v51 = vpop.permute.xlu1 %9697 }
 0x6e9   :  { %13677 = vmatprep.subr.mxu1 %v17298_v20  ;;  %13670 = vmatmul.mubr.msk.f32.vlgmr.msra.gmra.mxu1 %vm2242_vm3, %v7619_v53 }
 0x6ea   :  { %13665 = vmatmul.mubr.msk.f32.vlgmr.msra.gmra.mxu0 %vm2242_vm3, %v7618_v44  ;;  %13678 = vmatpush3.xpose.msk.msra.mxu1 %vm977_vm2, %v16251_v56 }
 0x6eb   :  { %13673 = vmatpush3.xpose.msk.msra.mxu0 %vm977_vm2, %v16245_v52  ;;  %13674 = vmatprep.mubr.msk.f32.mxu0 %vm14309_vm1, %v17298_v20  ;;  %v9776_v54 = vpop.permute.xlu0 %9775 }
 0x6ec   :  { %13679 = vmatprep.mubr.msk.f32.mxu1 %vm14309_vm1, %v17298_v20  ;;  %13682 = vmatprep.subr.mxu0 %v17298_v20  ;;  %v9856_v22 = vpop.permute.xlu1 %9855 }
 0x6ed   :  { %13687 = vmatprep.subr.mxu1 %v17298_v20  ;;  %13680 = vmatmul.mubr.msk.f32.vlgmr.msra.gmra.mxu1 %vm977_vm2, %v16261_v9 }
 0x6ee   :  { %13675 = vmatmul.mubr.msk.f32.vlgmr.msra.gmra.mxu0 %vm977_vm2, %v16253_v6  ;;  %13688 = vmatpush3.xpose.msk.msra.mxu1 %vm977_vm2, %v16269_v41 }
 0x6ef   :  { %13683 = vmatpush3.xpose.msk.msra.mxu0 %vm977_vm2, %v16265_v11  ;;  %13684 = vmatprep.mubr.msk.f32.mxu0 %vm14309_vm1, %v17298_v20  ;;  %v9934_v21 = vpop.permute.xlu0 %9933 }
 0x6f0   :  { %13689 = vmatprep.mubr.msk.f32.mxu1 %vm14309_vm1, %v17298_v20  ;;  %13692 = vmatprep.subr.mxu0 %v17298_v20  ;;  %v9854_v52 = vpop.permute.xlu1 %9853 }
 0x6f1   :  { %13697 = vmatprep.subr.mxu1 %v17298_v20  ;;  %13690 = vmatmul.mubr.msk.f32.vlgmr.msra.gmra.mxu1 %vm977_vm2, %v16275_v57 }
 0x6f2   :  { %13685 = vmatmul.mubr.msk.f32.vlgmr.msra.gmra.mxu0 %vm977_vm2, %v16271_v12  ;;  %13698 = vmatpush3.xpose.msk.msra.mxu1 %vm977_vm2, %v16279_v31 }
 0x6f3   :  { %13693 = vmatpush3.xpose.msk.msra.mxu0 %vm977_vm2, %v16277_v17  ;;  %13694 = vmatprep.mubr.msk.f32.mxu0 %vm14309_vm1, %v17298_v20  ;;  %v9932_v56 = vpop.permute.xlu0 %9931 }
 0x6f4   :  { %13699 = vmatprep.mubr.msk.f32.mxu1 %vm14309_vm1, %v17298_v20  ;;  %13702 = vmatprep.subr.mxu0 %v17298_v20  ;;  %v10012_v6 = vpop.permute.xlu1 %10011 }
 0x6f5   :  { %13707 = vmatprep.subr.mxu1 %v17298_v20  ;;  %13700 = vmatmul.mubr.msk.f32.vlgmr.msra.gmra.mxu1 %vm977_vm2, %v16283_v8 }
 0x6f6   :  { %13695 = vmatmul.mubr.msk.f32.vlgmr.msra.gmra.mxu0 %vm977_vm2, %v16281_v49  ;;  %13708 = vmatpush3.xpose.msk.msra.mxu1 %vm977_vm2, %v16287_v4 }
 0x6f7   :  { %13703 = vmatpush3.xpose.msk.msra.mxu0 %vm977_vm2, %v16285_v19  ;;  %13704 = vmatprep.mubr.msk.f32.mxu0 %vm14309_vm1, %v17298_v20  ;;  %v10090_v9 = vpop.permute.xlu0 %10089 }
 0x6f8   :  { %13709 = vmatprep.mubr.msk.f32.mxu1 %vm14309_vm1, %v17298_v20  ;;  %13712 = vmatprep.subr.mxu0 %v17298_v20  ;;  %v10010_v11 = vpop.permute.xlu1 %10009 }
 0x6f9   :  { %13717 = vmatprep.subr.mxu1 %v17298_v20  ;;  %13710 = vmatmul.mubr.msk.f32.vlgmr.msra.gmra.mxu1 %vm977_vm2, %v16334_v13 }
 0x6fa   :  { %13705 = vmatmul.mubr.msk.f32.vlgmr.msra.gmra.mxu0 %vm977_vm2, %v16289_v26  ;;  %13718 = vmatpush3.xpose.msk.msra.mxu1 %vm977_vm2, %v16348_v40 }
 0x6fb   :  { %13713 = vmatpush3.xpose.msk.msra.mxu0 %vm977_vm2, %v16332_v24  ;;  %13714 = vmatprep.mubr.msk.f32.mxu0 %vm14309_vm1, %v17298_v20  ;;  %v10088_v41 = vpop.permute.xlu0 %10087 }
 0x6fc   :  { %13719 = vmatprep.mubr.msk.f32.mxu1 %vm14309_vm1, %v17298_v20  ;;  %13722 = vmatprep.subr.mxu0 %v17298_v20  ;;  %v10386_v12 = vpop.permute.xlu1 %10385 }
 0x6fd   :  { %13727 = vmatprep.subr.mxu1 %v17298_v20  ;;  %13720 = vmatmul.mubr.msk.f32.vlgmr.msra.gmra.mxu1 %vm977_vm2, %v16364_v33 }
 0x6fe   :  { %13715 = vmatmul.mubr.msk.f32.vlgmr.msra.gmra.mxu0 %vm977_vm2, %v16352_v25  ;;  %13728 = vmatpush3.xpose.msk.msra.mxu1 %vm977_vm2, %v9778_v36 }
 0x6ff   :  { %13723 = vmatpush3.xpose.msk.msra.mxu0 %vm977_vm2, %v16374_v61  ;;  %13724 = vmatprep.mubr.msk.f32.mxu0 %vm14309_vm1, %v17298_v20  ;;  %v10310_v57 = vpop.permute.xlu0 %10309 }
 0x700   :  { %13729 = vmatprep.mubr.msk.f32.mxu1 %vm14309_vm1, %v17298_v20  ;;  %13732 = vmatprep.subr.mxu0 %v17298_v20 }
 0x701   :  { %13737 = vmatprep.subr.mxu1 %v17298_v20  ;;  %13730 = vmatmul.mubr.msk.f32.vlgmr.msra.gmra.mxu1 %vm977_vm2, %v9776_v54 }
 0x702   :  { %13725 = vmatmul.mubr.msk.f32.vlgmr.msra.gmra.mxu0 %vm977_vm2, %v9698_v51  ;;  %13738 = vmatpush3.xpose.msk.msra.mxu1 %vm977_vm2, %v9934_v21 }
 0x703   :  { %13733 = vmatpush3.xpose.msk.msra.mxu0 %vm977_vm2, %v9856_v22  ;;  %13734 = vmatprep.mubr.msk.f32.mxu0 %vm14309_vm1, %v17298_v20 }
 0x704   :  { %13739 = vmatprep.mubr.msk.f32.mxu1 %vm14309_vm1, %v17298_v20  ;;  %13742 = vmatprep.subr.mxu0 %v17298_v20 }
 0x705   :  { %13747 = vmatprep.subr.mxu1 %v17298_v20  ;;  %13740 = vmatmul.mubr.msk.f32.vlgmr.msra.gmra.mxu1 %vm977_vm2, %v9932_v56 }
 0x706   :  { %13735 = vmatmul.mubr.msk.f32.vlgmr.msra.gmra.mxu0 %vm977_vm2, %v9854_v52  ;;  %13748 = vmatpush3.xpose.msk.msra.mxu1 %vm977_vm2, %v10090_v9 }
 0x707   :  { %13743 = vmatpush3.xpose.msk.msra.mxu0 %vm977_vm2, %v10012_v6  ;;  %13744 = vmatprep.mubr.msk.f32.mxu0 %vm14309_vm1, %v17298_v20 }
 0x708   :  { %13749 = vmatprep.mubr.msk.f32.mxu1 %vm14309_vm1, %v17298_v20  ;;  %13752 = vmatprep.subr.mxu0 %v17298_v20 }
 0x709   :  { %13757 = vmatprep.subr.mxu1 %v17298_v20  ;;  %13750 = vmatmul.mubr.msk.f32.vlgmr.msra.gmra.mxu1 %vm977_vm2, %v10088_v41 }
 0x70a   :  { %13745 = vmatmul.mubr.msk.f32.vlgmr.msra.gmra.mxu0 %vm977_vm2, %v10010_v11  ;;  %13758 = vmatpush3.msra.mxu1 %v10386_v12 }
 0x70b   :  { %13753 = vmatpush3.msra.mxu0 %v10310_v57  ;;  %13754 = vmatprep.mubr.msk.f32.mxu0 %vm14309_vm1, %v17298_v20 }
 0x70c   :  { %13759 = vmatprep.mubr.msk.f32.mxu1 %vm14309_vm1, %v17298_v20  ;;  %13762 = vmatprep.subr.mxu0 %v17298_v20 }
 0x70d   :  { %13767 = vmatprep.subr.mxu1 %v17298_v20 }
 0x78c   :  { %v16498_v17 = vpop.f32.mrf.mxu1 }
 0x78d   :  { %v16500_v31 = vpop.f32.mrf.mxu0 }
 0x78e   :  { %v13601_v49 = vpop.f32.mrf.mxu1 }
 0x78f   :  { %v13596_v8 = vpop.f32.mrf.mxu0 }
 0x791   :  { %v16502_v19 = vpop.f32.mrf.mxu1 }
 0x792   :  { %v16504_v4 = vpop.f32.mrf.mxu0 }
 0x793   :  { %v13611_v26 = vpop.f32.mrf.mxu1 }
 0x794   :  { %v13606_v63 = vpop.f32.mrf.mxu0 }
 0x795   :  { %v16506_v2 = vpop.f32.mrf.mxu1 }
 0x796   :  { %v16508_v29 = vpop.f32.mrf.mxu0 }
 0x797   :  { %v13621_v46 = vpop.f32.mrf.mxu1 }
 0x798   :  { %v13616_v27 = vpop.f32.mrf.mxu0 }
 0x799   :  { %v16510_v16 = vpop.f32.mrf.mxu1 }
 0x79a   :  { %v16512_v28 = vpop.f32.mrf.mxu0 }
 0x79b   :  { %v13631_v42 = vpop.f32.mrf.mxu1 }
 0x79c   :  { %v13626_v48 = vpop.f32.mrf.mxu0 }
 0x79d   :  { %v16514_v35 = vpop.f32.mrf.mxu1 }
 0x79e   :  { %v16516_v18 = vpop.f32.mrf.mxu0 }
 0x79f   :  { %v13641_v58 = vpop.f32.mrf.mxu1 }
 0x7a0   :  { %v13636_v38 = vpop.f32.mrf.mxu0 }
 0x7a1   :  { %v16518_v23 = vpop.f32.mrf.mxu1 }
 0x7a2   :  { %v16520_v45 = vpop.f32.mrf.mxu0 }
 0x7a3   :  { %v13651_v47 = vpop.f32.mrf.mxu1 }
 0x7a4   :  { %v13646_v34 = vpop.f32.mrf.mxu0 }
 0x7a5   :  { %v16522_v30 = vpop.f32.mrf.mxu1 }
 0x7a6   :  { %v16524_v39 = vpop.f32.mrf.mxu0 }
 0x7a7   :  { %v13661_v62 = vpop.f32.mrf.mxu1 }
 0x7a8   :  { %v13656_v24 = vpop.f32.mrf.mxu0 }
 0x7a9   :  { %v16526_v13 = vpop.f32.mrf.mxu1 }
 0x7aa   :  { %v16528_v59 = vpop.f32.mrf.mxu0 }
 0x7ab   :  { %v13671_v32 = vpop.f32.mrf.mxu1 }
 0x7ac   :  { %v13666_v0 = vpop.f32.mrf.mxu0 }
 0x7ad   :  { %v9069_v14 = vpop.f32.mrf.mxu1 }
 0x7ae   :  { %v8991_v40 = vpop.f32.mrf.mxu0  ;;  %v10166_v50 = vmul.f32 0.2236068, %v9069_v14 }
 0x7af   :  { %v10165_v3 = vmul.f32 0.2236068, %v8991_v40  ;;  %v13681_v25 = vpop.f32.mrf.mxu1 }
 0x7b0   :  { %v10183_v10 = vmul.f32 1.442695, %v10166_v50  ;;  %v13676_v15 = vpop.f32.mrf.mxu0 }
 0x7b1   :  { %v10181_v33 = vmul.f32 1.442695, %v10165_v3  ;;  %v9225_v1 = vpop.f32.mrf.mxu1 }
 0x7b2   :  { %14143 = vpow2.f32 %v10183_v10  ;;  %v9147_v43 = vpop.f32.mrf.mxu0  ;;  %v10168_v37 = vmul.f32 0.2236068, %v9225_v1 }
 0x7b3   :  { %14145 = vpow2.f32 %v10181_v33  ;;  %v10167_v61 = vmul.f32 0.2236068, %v9147_v43  ;;  %v13691_v60 = vpop.f32.mrf.mxu1 }
 0x7b4   :  { %v10187_v36 = vmul.f32 1.442695, %v10168_v37  ;;  %v13686_v7 = vpop.f32.mrf.mxu0 }
 0x7b5   :  { %v10185_v53 = vmul.f32 1.442695, %v10167_v61  ;;  %v9381_v44 = vpop.f32.mrf.mxu1 }
 0x7b6   :  { %14147 = vpow2.f32 %v10187_v36  ;;  %v9303_v51 = vpop.f32.mrf.mxu0  ;;  %v10170_v54 = vmul.f32 0.2236068, %v9381_v44 }
 0x7b7   :  { %14149 = vpow2.f32 %v10185_v53  ;;  %v10169_v22 = vmul.f32 0.2236068, %v9303_v51  ;;  %v13701_v21 = vpop.f32.mrf.mxu1 }
 0x7b8   :  { %v10191_v52 = vmul.f32 1.442695, %v10170_v54  ;;  %v13696_v56 = vpop.f32.mrf.mxu0 }
 0x7b9   :  { %v10189_v6 = vmul.f32 1.442695, %v10169_v22  ;;  %v9537_v9 = vpop.f32.mrf.mxu1 }
 0x7ba   :  { %14151 = vpow2.f32 %v10191_v52  ;;  %v9459_v11 = vpop.f32.mrf.mxu0  ;;  %v10172_v41 = vmul.f32 0.2236068, %v9537_v9 }
 0x7bb   :  { %14153 = vpow2.f32 %v10189_v6  ;;  %v10171_v12 = vmul.f32 0.2236068, %v9459_v11  ;;  %v13711_v57 = vpop.f32.mrf.mxu1 }
 0x7bc   :  { %v10195_v49 = vmul.f32 1.442695, %v10172_v41  ;;  %v13706_v8 = vpop.f32.mrf.mxu0 }
 0x7bd   :  { %v10193_v26 = vmul.f32 1.442695, %v10171_v12  ;;  %v9693_v63 = vpop.f32.mrf.mxu1 }
 0x7be   :  { %14155 = vpow2.f32 %v10195_v49  ;;  %v9615_v46 = vpop.f32.mrf.mxu0  ;;  %v10174_v27 = vmul.f32 0.2236068, %v9693_v63 }
 0x7bf   :  { %v16530_v42 = vpop.eup %14143  ;;  %14157 = vpow2.f32 %v10193_v26  ;;  %v10173_v48 = vmul.f32 0.2236068, %v9615_v46  ;;  %v13721_v58 = vpop.f32.mrf.mxu1 }
 0x7c0   :  { %v16532_v38 = vpop.eup %14145  ;;  %v10199_v47 = vmul.f32 1.442695, %v10174_v27  ;;  %v13716_v34 = vpop.f32.mrf.mxu0  ;;  %v10216_v62 = vsel %vm2242_vm3, %v16530_v42, 0.0 }
 0x7c1   :  { %v10197_v24 = vmul.f32 1.442695, %v10173_v48  ;;  %10217 = vadd.xlane.f32.xlu0 %v10216_v62  ;;  %v10213_v32 = vsel %vm2242_vm3, %v16532_v38, 0.0  ;;  %v9849_v0 = vpop.f32.mrf.mxu1 }
 0x7c2   :  { %14159 = vpow2.f32 %v10199_v47  ;;  %10214 = vadd.xlane.f32.xlu1 %v10213_v32  ;;  %v9771_v14 = vpop.f32.mrf.mxu0  ;;  %v10176_v40 = vmul.f32 0.2236068, %v9849_v0 }
 0x7c3   :  { %v16538_v50 = vpop.eup %14147  ;;  %14161 = vpow2.f32 %v10197_v24  ;;  %v10175_v3 = vmul.f32 0.2236068, %v9771_v14  ;;  %v13731_v25 = vpop.f32.mrf.mxu1 }
 0x7c4   :  { %v16540_v10 = vpop.eup %14149  ;;  %v10203_v15 = vmul.f32 1.442695, %v10176_v40  ;;  %v13726_v33 = vpop.f32.mrf.mxu0  ;;  %v10222_v1 = vsel %vm2242_vm3, %v16538_v50, 0.0 }
 0x7c5   :  { %v10201_v43 = vmul.f32 1.442695, %v10175_v3  ;;  %v10219_v37 = vsel %vm2242_vm3, %v16540_v10, 0.0  ;;  %v10005_v61 = vpop.f32.mrf.mxu1 }
 0x7c6   :  { %14163 = vpow2.f32 %v10203_v15  ;;  %10223 = vadd.xlane.f32.xlu1 %v10222_v1  ;;  %10220 = vadd.xlane.f32.xlu0 %v10219_v37  ;;  %v9927_v60 = vpop.f32.mrf.mxu0  ;;  %v10178_v36 = vmul.f32 0.2236068, %v10005_v61  ;;  %v17368_v37 = vld [vmem:[#allocation50_spill] sm:$0xff]  ;;  %v17369_v61 = vld [vmem:[#allocation51_spill] sm:$0xff] }
 0x7c7   :  { %v16546_v7 = vpop.eup %14151  ;;  %14165 = vpow2.f32 %v10201_v43  ;;  %v10177_v53 = vmul.f32 0.2236068, %v9927_v60  ;;  %v13741_v44 = vpop.f32.mrf.mxu1  ;;  %v17370_v60 = vld [vmem:[#allocation35_spill] sm:$0xff] }
 0x7c8   :  { %v16548_v51 = vpop.eup %14153  ;;  %v10207_v54 = vmul.f32 1.442695, %v10178_v36  ;;  %v13736_v22 = vpop.f32.mrf.mxu0  ;;  %v10228_v21 = vsel %vm2242_vm3, %v16546_v7, 0.0  ;;  %v17372_v36 = vld [vmem:[#allocation37_spill] sm:$0xff] }
 0x7c9   :  { %v10205_v52 = vmul.f32 1.442695, %v10177_v53  ;;  %v10225_v56 = vsel %vm2242_vm3, %v16548_v51, 0.0  ;;  %v10161_v6 = vpop.f32.mrf.mxu1  ;;  %v17382_v53 = vld [vmem:[#allocation6_spill] sm:$0xff] }
 0x7ca   :  { %14167 = vpow2.f32 %v10207_v54  ;;  %10229 = vadd.xlane.f32.xlu1 %v10228_v21  ;;  %10226 = vadd.xlane.f32.xlu0 %v10225_v56  ;;  %v10083_v9 = vpop.f32.mrf.mxu0  ;;  %v10180_v11 = vmul.f32 0.2236068, %v10161_v6 }
 0x7cb   :  { %v16554_v41 = vpop.eup %14155  ;;  %14169 = vpow2.f32 %v10205_v52  ;;  %v10179_v12 = vmul.f32 0.2236068, %v10083_v9  ;;  %v13751_v57 = vpop.f32.mrf.mxu1 }
 0x7cc   :  { %v16556_v49 = vpop.eup %14157  ;;  %v10211_v8 = vmul.f32 1.442695, %v10180_v11  ;;  %v13746_v26 = vpop.f32.mrf.mxu0  ;;  %v10234_v63 = vsel %vm2242_vm3, %v16554_v41, 0.0 }
 0x7cd   :  { %v10209_v46 = vmul.f32 1.442695, %v10179_v12  ;;  %v10231_v27 = vsel %vm2242_vm3, %v16556_v49, 0.0 }
 0x7ce   :  { %14171 = vpow2.f32 %v10211_v8  ;;  %10232 = vadd.xlane.f32.xlu0 %v10231_v27  ;;  %10235 = vadd.xlane.f32.xlu1 %v10234_v63 }
 0x7cf   :  { %v16562_v48 = vpop.eup %14159  ;;  %14173 = vpow2.f32 %v10209_v46 }
 0x7d0   :  { %v16564_v58 = vpop.eup %14161  ;;  %v10240_v47 = vsel %vm2242_vm3, %v16562_v48, 0.0 }
 0x7d1   :  { %v10237_v34 = vsel %vm2242_vm3, %v16564_v58, 0.0 }
 0x7d2   :  { %10238 = vadd.xlane.f32.xlu0 %v10237_v34  ;;  %10241 = vadd.xlane.f32.xlu1 %v10240_v47 }
 0x7d3   :  { %v16570_v62 = vpop.eup %14163 }
 0x7d4   :  { %v16572_v24 = vpop.eup %14165  ;;  %v10246_v32 = vsel %vm2242_vm3, %v16570_v62, 0.0 }
 0x7d5   :  { %v10243_v0 = vsel %vm2242_vm3, %v16572_v24, 0.0 }
 0x7d6   :  { %10244 = vadd.xlane.f32.xlu0 %v10243_v0  ;;  %10247 = vadd.xlane.f32.xlu1 %v10246_v32 }
 0x7d7   :  { %v16578_v14 = vpop.eup %14167 }
 0x7d8   :  { %v16580_v40 = vpop.eup %14169  ;;  %v10252_v3 = vsel %vm2242_vm3, %v16578_v14, 0.0 }
 0x7d9   :  { %v10249_v25 = vsel %vm2242_vm3, %v16580_v40, 0.0 }
 0x7da   :  { %10250 = vadd.xlane.f32.xlu0 %v10249_v25  ;;  %10253 = vadd.xlane.f32.xlu1 %v10252_v3 }
 0x7db   :  { %v16586_v15 = vpop.eup %14171 }
 0x7dc   :  { %v16588_v33 = vpop.eup %14173  ;;  %v10258_v1 = vsel %vm2242_vm3, %v16586_v15, 0.0 }
 0x7dd   :  { %v10255_v43 = vsel %vm2242_vm3, %v16588_v33, 0.0 }
 0x7de   :  { %10256 = vadd.xlane.f32.xlu0 %v10255_v43  ;;  %10259 = vadd.xlane.f32.xlu1 %v10258_v1 }
 0x7ef   :  { %11373 = vrot.lane.b32.xlu1 %v17368_v37, %s14312_s1 }
 0x7f3   :  { %6163 = vrot.lane.b32.xlu1 %v16075_v5, %s14312_s1  ;;  %v17371_v5 = vld [vmem:[#allocation18_spill] sm:$0xff] }
 0x7f4   :  { %11449 = vrot.lane.b32.xlu0 %v17369_v61, %s14312_s1 }
 0x7f7   :  { %8852 = vrot.lane.b32.xlu1 %v16500_v31, %s14311_s8  ;;  %v17375_v31 = vld [vmem:[#allocation12_spill] sm:$0xff] }
 0x7f8   :  { %6165 = vrot.lane.b32.xlu0 %v16077_v55, %s14312_s1  ;;  %v17373_v55 = vld [vmem:[#allocation36_spill] sm:$0xff] }
 0x7fb   :  { %6167 = vrot.lane.b32.xlu1 %v17370_v60, %s14312_s1 }
 0x7fc   :  { %8854 = vrot.lane.b32.xlu0 %v16498_v17, %s14311_s8  ;;  %v17374_v17 = vld [vmem:[#allocation5_spill] sm:$0xff] }
 0x7ff   :  { %8856 = vrot.lane.b32.xlu1 %v16504_v4, %s14311_s8  ;;  %v17377_v4 = vld [vmem:[#allocation14_spill] sm:$0xff] }
 0x800   :  { %6169 = vrot.lane.b32.xlu0 %v17371_v5, %s14312_s1 }
 0x803   :  { %6171 = vrot.lane.b32.xlu1 %v17372_v36, %s14312_s1 }
 0x804   :  { %8858 = vrot.lane.b32.xlu0 %v16502_v19, %s14311_s8  ;;  %v17376_v19 = vld [vmem:[#allocation11_spill] sm:$0xff] }
 0x807   :  { %8860 = vrot.lane.b32.xlu1 %v16508_v29, %s14311_s8  ;;  %v17379_v29 = vld [vmem:[#allocation7_spill] sm:$0xff] }
 0x808   :  { %6173 = vrot.lane.b32.xlu0 %v17373_v55, %s14312_s1 }
 0x80b   :  { %6175 = vrot.lane.b32.xlu1 %v17374_v17, %s14312_s1 }
 0x80c   :  { %8862 = vrot.lane.b32.xlu0 %v16506_v2, %s14311_s8  ;;  %v17378_v2 = vld [vmem:[#allocation4_spill] sm:$0xff] }
 0x80f   :  { %8864 = vrot.lane.b32.xlu1 %v16512_v28, %s14311_s8  ;;  %v10538_v28 = vpop.permute.xlu0 %10537 }
 0x810   :  { %6177 = vrot.lane.b32.xlu0 %v17375_v31, %s14312_s1 }
 0x813   :  { %6179 = vrot.lane.b32.xlu1 %v17376_v19, %s14312_s1 }
 0x814   :  { %8866 = vrot.lane.b32.xlu0 %v16510_v16, %s14311_s8  ;;  %v17380_v16 = vld [vmem:[#allocation13_spill] sm:$0xff] }
 0x817   :  { %8868 = vrot.lane.b32.xlu1 %v16516_v18, %s14311_s8  ;;  %v17381_v18 = vld [vmem:[#allocation15_spill] sm:$0xff] }
 0x818   :  { %6181 = vrot.lane.b32.xlu0 %v17377_v4, %s14312_s1 }
 0x81b   :  { %6183 = vrot.lane.b32.xlu1 %v17378_v2, %s14312_s1 }
 0x81c   :  { %8870 = vrot.lane.b32.xlu0 %v16514_v35, %s14311_s8  ;;  %v10462_v35 = vpop.permute.xlu1 %10461 }
 0x81f   :  { %8872 = vrot.lane.b32.xlu1 %v16520_v45, %s14311_s8  ;;  %v16656_v45 = vpop.permute.xlu0 %10689 }
 0x820   :  { %6185 = vrot.lane.b32.xlu0 %v17379_v29, %s14312_s1  ;;  %v16658_v44 = vpop.permute.xlu1 %10613 }
 0x823   :  { %6187 = vrot.lane.b32.xlu1 %v17380_v16, %s14312_s1 }
 0x824   :  { %8874 = vrot.lane.b32.xlu0 %v16518_v23, %s14311_s8  ;;  %v17383_v23 = vld [vmem:[#allocation9_spill] sm:$0xff]  ;;  %v16668_v54 = vpop.permute.xlu1 %10765 }
 0x827   :  { %8876 = vrot.lane.b32.xlu1 %v16524_v39, %s14311_s8  ;;  %v16664_v39 = vpop.permute.xlu0 %10841 }
 0x828   :  { %6189 = vrot.lane.b32.xlu0 %v17381_v18, %s14312_s1 }
 0x82b   :  { %6191 = vrot.lane.b32.xlu1 %v17382_v53, %s14312_s1  ;;  %v16670_v22 = vpop.permute.xlu0 %10993 }
 0x82c   :  { %8878 = vrot.lane.b32.xlu0 %v16522_v30, %s14311_s8  ;;  %v16672_v30 = vpop.permute.xlu1 %10917 }
 0x82f   :  { %8880 = vrot.lane.b32.xlu1 %v16528_v59, %s14311_s8  ;;  %v16674_v21 = vpop.permute.xlu0 %11145 }
 0x830   :  { %6193 = vrot.lane.b32.xlu0 %v17383_v23, %s14312_s1  ;;  %v16676_v52 = vpop.permute.xlu1 %11069 }
 0x833   :  { %v16678_v56 = vpop.permute.xlu0 %11297 }
 0x834   :  { %8882 = vrot.lane.b32.xlu0 %v16526_v13, %s14311_s8  ;;  %v16680_v59 = vpop.permute.xlu1 %11221 }
 0x84a   :  { %v10218_v6 = vpop.xlane.xlu0 %10217 }
 0x84b   :  { %v10215_v9 = vpop.xlane.xlu1 %10214  ;;  %v10262_v11 = vadd.f32 1e-08, %v10218_v6 }
 0x84c   :  { %v10261_v12 = vadd.f32 1e-08, %v10215_v9 }
 0x84d   :  { %14175 = vrcp.f32 %v10262_v11 }
 0x84e   :  { %14177 = vrcp.f32 %v10261_v12 }
 0x84f   :  { %v10224_v13 = vpop.xlane.xlu1 %10223  ;;  %v10221_v57 = vpop.xlane.xlu0 %10220 }
 0x850   :  { %v10264_v8 = vadd.f32 1e-08, %v10224_v13  ;;  %v10263_v26 = vadd.f32 1e-08, %v10221_v57 }
 0x852   :  { %14179 = vrcp.f32 %v10264_v8 }
 0x853   :  { %14181 = vrcp.f32 %v10263_v26  ;;  %v10230_v63 = vpop.xlane.xlu1 %10229  ;;  %v10227_v46 = vpop.xlane.xlu0 %10226 }
 0x854   :  { %v10266_v27 = vadd.f32 1e-08, %v10230_v63  ;;  %v10265_v47 = vadd.f32 1e-08, %v10227_v46 }
 0x856   :  { %14183 = vrcp.f32 %v10266_v27 }
 0x857   :  { %14185 = vrcp.f32 %v10265_v47  ;;  %v10236_v34 = vpop.xlane.xlu1 %10235  ;;  %v10233_v32 = vpop.xlane.xlu0 %10232 }
 0x858   :  { %v10268_v0 = vadd.f32 1e-08, %v10236_v34  ;;  %v10267_v3 = vadd.f32 1e-08, %v10233_v32 }
 0x85a   :  { %v14176_v25 = vpop.eup %14175  ;;  %14187 = vrcp.f32 %v10268_v0 }
 0x85b   :  { %v14178_v1 = vpop.eup %14177  ;;  %v10294_v43 = vmul.f32 %v14176_v25, %v16530_v42  ;;  %14189 = vrcp.f32 %v10267_v3  ;;  %v10242_v37 = vpop.xlane.xlu1 %10241 }
 0x85c   :  { %v10239_v61 = vpop.xlane.xlu0 %10238  ;;  %v10293_v60 = vmul.f32 %v14178_v1, %v16532_v38  ;;  %v10270_v5 = vadd.f32 1e-08, %v10242_v37 }
 0x85d   :  { %v10269_v36 = vadd.f32 1e-08, %v10239_v61  ;;  %13760 = vmatmul.mubr.msk.f32.vlgmr.msra.gmra.mxu1 %vm2242_vm3, %v10294_v43 }
 0x85e   :  { %14191 = vrcp.f32 %v10270_v5  ;;  %13755 = vmatmul.mubr.msk.f32.vlgmr.msra.gmra.mxu0 %vm2242_vm3, %v10293_v60  ;;  %13768 = vmatpush3.msra.mxu1 %v10538_v28 }
 0x85f   :  { %v14180_v55 = vpop.eup %14179  ;;  %14193 = vrcp.f32 %v10269_v36  ;;  %13763 = vmatpush3.msra.mxu0 %v10462_v35  ;;  %v10248_v17 = vpop.xlane.xlu1 %10247  ;;  %13764 = vmatprep.mubr.msk.f32.mxu0 %vm14309_vm1, %v17298_v20 }
 0x860   :  { %v10245_v31 = vpop.xlane.xlu0 %10244  ;;  %v14182_v42 = vpop.eup %14181  ;;  %v10296_v19 = vmul.f32 %v14180_v55, %v16538_v50  ;;  %v10272_v38 = vadd.f32 1e-08, %v10248_v17  ;;  %13769 = vmatprep.mubr.msk.f32.mxu1 %vm14309_vm1, %v17298_v20  ;;  %13772 = vmatprep.subr.mxu0 %v17298_v20 }
 0x861   :  { %v10271_v4 = vadd.f32 1e-08, %v10245_v31  ;;  %v10295_v2 = vmul.f32 %v14182_v42, %v16540_v10  ;;  %13777 = vmatprep.subr.mxu1 %v17298_v20 }
 0x862   :  { %14195 = vrcp.f32 %v10272_v38  ;;  %13770 = vmatmul.mubr.msk.f32.vlgmr.msra.gmra.mxu1 %vm2242_vm3, %v10296_v19 }
 0x863   :  { %v14184_v29 = vpop.eup %14183  ;;  %14197 = vrcp.f32 %v10271_v4  ;;  %13765 = vmatmul.mubr.msk.f32.vlgmr.msra.gmra.mxu0 %vm2242_vm3, %v10295_v2  ;;  %13778 = vmatpush3.msra.mxu1 %v16656_v45  ;;  %v10254_v50 = vpop.xlane.xlu1 %10253 }
 0x864   :  { %v10251_v16 = vpop.xlane.xlu0 %10250  ;;  %v14186_v28 = vpop.eup %14185  ;;  %v10298_v18 = vmul.f32 %v14184_v29, %v16546_v7  ;;  %13773 = vmatpush3.msra.mxu0 %v16658_v44  ;;  %v10274_v35 = vadd.f32 1e-08, %v10254_v50  ;;  %13774 = vmatprep.mubr.msk.f32.mxu0 %vm14309_vm1, %v17298_v20 }
 0x865   :  { %v10273_v10 = vadd.f32 1e-08, %v10251_v16  ;;  %v10297_v53 = vmul.f32 %v14186_v28, %v16548_v51  ;;  %13779 = vmatprep.mubr.msk.f32.mxu1 %vm14309_vm1, %v17298_v20  ;;  %13782 = vmatprep.subr.mxu0 %v17298_v20  ;;  %v11637_v16 = vld [vmem:[%s17175_s9 + $0x78] sm:$0xff]  ;;  %v11636_v28 = vld [vmem:[%s17175_s9 + $0x70] sm:$0xff] }
 0x866   :  { %14199 = vrcp.f32 %v10274_v35  ;;  %13787 = vmatprep.subr.mxu1 %v17298_v20  ;;  %13780 = vmatmul.mubr.msk.f32.vlgmr.msra.gmra.mxu1 %vm2242_vm3, %v10298_v18  ;;  %v11635_v18 = vld [vmem:[%s17175_s9 + $0x68] sm:$0xff]  ;;  %v11634_v35 = vld [vmem:[%s17175_s9 + $0x60] sm:$0xff] }
 0x867   :  { %v14188_v7 = vpop.eup %14187  ;;  %14201 = vrcp.f32 %v10273_v10  ;;  %13775 = vmatmul.mubr.msk.f32.vlgmr.msra.gmra.mxu0 %vm2242_vm3, %v10297_v53  ;;  %13788 = vmatpush3.msra.mxu1 %v16664_v39  ;;  %v10260_v45 = vpop.xlane.xlu1 %10259  ;;  %v11633_v10 = vld [vmem:[%s17175_s9 + $0x58] sm:$0xff]  ;;  %v11632_v53 = vld [vmem:[%s17175_s9 + $0x50] sm:$0xff] }
 0x868   :  { %v10257_v44 = vpop.xlane.xlu0 %10256  ;;  %v14190_v23 = vpop.eup %14189  ;;  %v10300_v51 = vmul.f32 %v14188_v7, %v16554_v41  ;;  %13783 = vmatpush3.msra.mxu0 %v16668_v54  ;;  %v10276_v6 = vadd.f32 1e-08, %v10260_v45  ;;  %13784 = vmatprep.mubr.msk.f32.mxu0 %vm14309_vm1, %v17298_v20  ;;  %v11631_v7 = vld [vmem:[%s17175_s9 + $0x48] sm:$0xff]  ;;  %v11630_v45 = vld [vmem:[%s17175_s9 + $0x40] sm:$0xff] }
 0x869   :  { %v10275_v9 = vadd.f32 1e-08, %v10257_v44  ;;  %v10299_v11 = vmul.f32 %v14190_v23, %v16556_v49  ;;  %13789 = vmatprep.mubr.msk.f32.mxu1 %vm14309_vm1, %v17298_v20  ;;  %13792 = vmatprep.subr.mxu0 %v17298_v20  ;;  %v11629_v44 = vld [vmem:[%s17175_s9 + $0x38] sm:$0xff]  ;;  %v11628_v23 = vld [vmem:[%s17175_s9 + $0x30] sm:$0xff] }
 0x86a   :  { %14203 = vrcp.f32 %v10276_v6  ;;  %13797 = vmatprep.subr.mxu1 %v17298_v20  ;;  %13790 = vmatmul.mubr.msk.f32.vlgmr.msra.gmra.mxu1 %vm2242_vm3, %v10300_v51  ;;  %v11627_v51 = vld [vmem:[%s17175_s9 + $0x28] sm:$0xff]  ;;  %v11626_v6 = vld [vmem:[%s17175_s9 + $0x20] sm:$0xff] }
 0x86b   :  { %v14192_v41 = vpop.eup %14191  ;;  %14205 = vrcp.f32 %v10275_v9  ;;  %13785 = vmatmul.mubr.msk.f32.vlgmr.msra.gmra.mxu0 %vm2242_vm3, %v10299_v11  ;;  %13798 = vmatpush3.msra.mxu1 %v16670_v22  ;;  %v11374_v39 = vpop.permute.xlu1 %11373  ;;  %v11625_v9 = vld [vmem:[%s17175_s9 + $0x18] sm:$0xff]  ;;  %v11624_v11 = vld [vmem:[%s17175_s9 + $0x10] sm:$0xff] }
 0x86c   :  { %v11450_v54 = vpop.permute.xlu0 %11449  ;;  %v14194_v12 = vpop.eup %14193  ;;  %v10302_v49 = vmul.f32 %v14192_v41, %v16562_v48  ;;  %13793 = vmatpush3.msra.mxu0 %v16672_v30  ;;  %13794 = vmatprep.mubr.msk.f32.mxu0 %vm14309_vm1, %v17298_v20  ;;  %v11623_v41 = vld [vmem:[%s17175_s9 + $0x8] sm:$0xff] }
 0x86d   :  { %v10301_v13 = vmul.f32 %v14194_v12, %v16564_v58  ;;  %13799 = vmatprep.mubr.msk.f32.mxu1 %vm14309_vm1, %v17298_v20  ;;  %13802 = vmatprep.subr.mxu0 %v17298_v20 }
 0x86e   :  { %13807 = vmatprep.subr.mxu1 %v17298_v20  ;;  %13800 = vmatmul.mubr.msk.f32.vlgmr.msra.gmra.mxu1 %vm2242_vm3, %v10302_v49 }
 0x86f   :  { %v14196_v22 = vpop.eup %14195  ;;  %13795 = vmatmul.mubr.msk.f32.vlgmr.msra.gmra.mxu0 %vm2242_vm3, %v10301_v13  ;;  %13808 = vmatpush3.msra.mxu1 %v16674_v21  ;;  %v6164_v48 = vpop.permute.xlu1 %6163 }
 0x870   :  { %v6166_v30 = vpop.permute.xlu0 %6165  ;;  %v14198_v57 = vpop.eup %14197  ;;  %v10304_v58 = vmul.f32 %v14196_v22, %v16570_v62  ;;  %13803 = vmatpush3.msra.mxu0 %v16676_v52  ;;  %6212 = vst.msk [vmem:[#allocation2] sm:$0xff] %vm6211_vm4, %v6164_v48  ;;  %13804 = vmatprep.mubr.msk.f32.mxu0 %vm14309_vm1, %v17298_v20 }
 0x871   :  { %6213 = vst.msk [vmem:[#allocation2 + $0x8] sm:$0xff] %vm6211_vm4, %v6166_v30  ;;  %v10303_v8 = vmul.f32 %v14198_v57, %v16572_v24  ;;  %13809 = vmatprep.mubr.msk.f32.mxu1 %vm14309_vm1, %v17298_v20  ;;  %13812 = vmatprep.subr.mxu0 %v17298_v20 }
 0x872   :  { %13817 = vmatprep.subr.mxu1 %v17298_v20  ;;  %13810 = vmatmul.mubr.msk.f32.vlgmr.msra.gmra.mxu1 %vm2242_vm3, %v10304_v58 }
 0x873   :  { %v14200_v62 = vpop.eup %14199  ;;  %13805 = vmatmul.mubr.msk.f32.vlgmr.msra.gmra.mxu0 %vm2242_vm3, %v10303_v8  ;;  %13818 = vmatpush3.msra.mxu1 %v16678_v56  ;;  %v8853_v21 = vpop.permute.xlu1 %8852 }
 0x874   :  { %v8855_v52 = vpop.permute.xlu0 %8854  ;;  %v14202_v26 = vpop.eup %14201  ;;  %v10306_v24 = vmul.f32 %v14200_v62, %v16578_v14  ;;  %13813 = vmatpush3.msra.mxu0 %v16680_v59  ;;  %8901 = vst.msk [vmem:[#allocation2] sm:$0xff] %vm8900_vm5, %v8853_v21  ;;  %13814 = vmatprep.mubr.msk.f32.mxu0 %vm14309_vm1, %v17298_v20 }
 0x875   :  { %8902 = vst.msk [vmem:[#allocation2 + $0x8] sm:$0xff] %vm8900_vm5, %v8855_v52  ;;  %v10305_v63 = vmul.f32 %v14202_v26, %v16580_v40  ;;  %13819 = vmatprep.mubr.msk.f32.mxu1 %vm14309_vm1, %v17298_v20  ;;  %13822 = vmatprep.subr.mxu0 %v17298_v20 }
 0x876   :  { %13827 = vmatprep.subr.mxu1 %v17298_v20  ;;  %13820 = vmatmul.mubr.msk.f32.vlgmr.msra.gmra.mxu1 %vm2242_vm3, %v10306_v24 }
 0x877   :  { %v14204_v14 = vpop.eup %14203  ;;  %13815 = vmatmul.mubr.msk.f32.vlgmr.msra.gmra.mxu0 %vm2242_vm3, %v10305_v63  ;;  %13828 = vmatpush3.msra.mxu1 %v11450_v54  ;;  %v6168_v56 = vpop.permute.xlu1 %6167 }
 0x878   :  { %v6170_v59 = vpop.permute.xlu0 %6169  ;;  %v14206_v46 = vpop.eup %14205  ;;  %v10308_v27 = vmul.f32 %v14204_v14, %v16586_v15  ;;  %13823 = vmatpush3.msra.mxu0 %v11374_v39  ;;  %6214 = vst.msk [vmem:[#allocation2 + $0x10] sm:$0xff] %vm6211_vm4, %v6168_v56  ;;  %13824 = vmatprep.mubr.msk.f32.mxu0 %vm14309_vm1, %v17298_v20  ;;  %v11622_v39 = vld [vmem:[%s17175_s9] sm:$0xff] }
 0x879   :  { %6215 = vst.msk [vmem:[#allocation2 + $0x18] sm:$0xff] %vm6211_vm4, %v6170_v59  ;;  %v10307_v40 = vmul.f32 %v14206_v46, %v16588_v33  ;;  %13829 = vmatprep.mubr.msk.f32.mxu1 %vm14309_vm1, %v17298_v20  ;;  %13832 = vmatprep.subr.mxu0 %v11637_v16 }
 0x87a   :  { %13830 = vmatmul.mubr.msk.f32.vlgmr.msra.gmra.mxu1 %vm2242_vm3, %v10308_v27 }
 0x87b   :  { %13825 = vmatmul.mubr.msk.f32.vlgmr.msra.gmra.mxu0 %vm2242_vm3, %v10307_v40  ;;  %v8857_v47 = vpop.permute.xlu1 %8856 }
 0x87c   :  { %v8859_v34 = vpop.permute.xlu0 %8858  ;;  %8903 = vst.msk [vmem:[#allocation2 + $0x10] sm:$0xff] %vm8900_vm5, %v8857_v47  ;;  %13833 = vmatpush3.msra.mxu0 %v11637_v16 }
 0x87d   :  { %8904 = vst.msk [vmem:[#allocation2 + $0x18] sm:$0xff] %vm8900_vm5, %v8859_v34  ;;  %13834 = vmatprep.subr.mxu0 %v11636_v28 }
 0x87e   :  { %13835 = vmatpush3.msra.mxu0 %v11636_v28 }
 0x87f   :  { %v6172_v15 = vpop.permute.xlu1 %6171  ;;  %13836 = vmatprep.subr.mxu0 %v11635_v18 }
 0x880   :  { %v6174_v32 = vpop.permute.xlu0 %6173  ;;  %6216 = vst.msk [vmem:[#allocation2 + $0x20] sm:$0xff] %vm6211_vm4, %v6172_v15  ;;  %13837 = vmatpush3.msra.mxu0 %v11635_v18 }
 0x881   :  { %6217 = vst.msk [vmem:[#allocation2 + $0x28] sm:$0xff] %vm6211_vm4, %v6174_v32  ;;  %13838 = vmatprep.subr.mxu0 %v11634_v35 }
 0x882   :  { %13839 = vmatpush3.msra.mxu0 %v11634_v35 }
 0x883   :  { %v8861_v33 = vpop.permute.xlu1 %8860  ;;  %13840 = vmatprep.subr.mxu0 %v11633_v10 }
 0x884   :  { %v8863_v0 = vpop.permute.xlu0 %8862  ;;  %8905 = vst.msk [vmem:[#allocation2 + $0x20] sm:$0xff] %vm8900_vm5, %v8861_v33  ;;  %13841 = vmatpush3.msra.mxu0 %v11633_v10 }
 0x885   :  { %8906 = vst.msk [vmem:[#allocation2 + $0x28] sm:$0xff] %vm8900_vm5, %v8863_v0  ;;  %13842 = vmatprep.subr.mxu0 %v11632_v53 }
 0x886   :  { %13843 = vmatpush3.msra.mxu0 %v11632_v53 }
 0x887   :  { %v6176_v20 = vpop.permute.xlu1 %6175  ;;  %13844 = vmatprep.subr.mxu0 %v11631_v7 }
 0x888   :  { %v6178_v3 = vpop.permute.xlu0 %6177  ;;  %6218 = vst.msk [vmem:[#allocation2 + $0x30] sm:$0xff] %vm6211_vm4, %v6176_v20  ;;  %13845 = vmatpush3.msra.mxu0 %v11631_v7 }
 0x889   :  { %6219 = vst.msk [vmem:[#allocation2 + $0x38] sm:$0xff] %vm6211_vm4, %v6178_v3  ;;  %13846 = vmatprep.subr.mxu0 %v11630_v45 }
 0x88a   :  { %13847 = vmatpush3.msra.mxu0 %v11630_v45 }
 0x88b   :  { %v8865_v25 = vpop.permute.xlu1 %8864  ;;  %13848 = vmatprep.subr.mxu0 %v11629_v44 }
 0x88c   :  { %v8867_v1 = vpop.permute.xlu0 %8866  ;;  %8907 = vst.msk [vmem:[#allocation2 + $0x30] sm:$0xff] %vm8900_vm5, %v8865_v25  ;;  %13849 = vmatpush3.msra.mxu0 %v11629_v44 }
 0x88d   :  { %8908 = vst.msk [vmem:[#allocation2 + $0x38] sm:$0xff] %vm8900_vm5, %v8867_v1  ;;  %13850 = vmatprep.subr.mxu0 %v11628_v23 }
 0x88e   :  { %13851 = vmatpush3.msra.mxu0 %v11628_v23 }
 0x88f   :  { %v6180_v43 = vpop.permute.xlu1 %6179  ;;  %13852 = vmatprep.subr.mxu0 %v11627_v51 }
 0x890   :  { %v6182_v37 = vpop.permute.xlu0 %6181  ;;  %6220 = vst.msk [vmem:[#allocation2 + $0x40] sm:$0xff] %vm6211_vm4, %v6180_v43  ;;  %13853 = vmatpush3.msra.mxu0 %v11627_v51 }
 0x891   :  { %6221 = vst.msk [vmem:[#allocation2 + $0x48] sm:$0xff] %vm6211_vm4, %v6182_v37  ;;  %13854 = vmatprep.subr.mxu0 %v11626_v6 }
 0x892   :  { %13855 = vmatpush3.msra.mxu0 %v11626_v6 }
 0x893   :  { %v8869_v61 = vpop.permute.xlu1 %8868  ;;  %13856 = vmatprep.subr.mxu0 %v11625_v9 }
 0x894   :  { %v8871_v60 = vpop.permute.xlu0 %8870  ;;  %8909 = vst.msk [vmem:[#allocation2 + $0x40] sm:$0xff] %vm8900_vm5, %v8869_v61  ;;  %13857 = vmatpush3.msra.mxu0 %v11625_v9 }
 0x895   :  { %8910 = vst.msk [vmem:[#allocation2 + $0x48] sm:$0xff] %vm8900_vm5, %v8871_v60  ;;  %13858 = vmatprep.subr.mxu0 %v11624_v11 }
 0x896   :  { %13859 = vmatpush3.msra.mxu0 %v11624_v11 }
 0x897   :  { %v6184_v5 = vpop.permute.xlu1 %6183  ;;  %13860 = vmatprep.subr.mxu0 %v11623_v41 }
 0x898   :  { %v6186_v36 = vpop.permute.xlu0 %6185  ;;  %6222 = vst.msk [vmem:[#allocation2 + $0x50] sm:$0xff] %vm6211_vm4, %v6184_v5  ;;  %13861 = vmatpush3.msra.mxu0 %v11623_v41 }
 0x899   :  { %6223 = vst.msk [vmem:[#allocation2 + $0x58] sm:$0xff] %vm6211_vm4, %v6186_v36  ;;  %13862 = vmatprep.subr.mxu0 %v11622_v39 }
 0x89a   :  { %13863 = vmatpush3.msra.mxu0 %v11622_v39 }
 0x89b   :  { %v8873_v55 = vpop.permute.xlu1 %8872 }
 0x89c   :  { %v8875_v17 = vpop.permute.xlu0 %8874  ;;  %8911 = vst.msk [vmem:[#allocation2 + $0x50] sm:$0xff] %vm8900_vm5, %v8873_v55 }
 0x89d   :  { %8912 = vst.msk [vmem:[#allocation2 + $0x58] sm:$0xff] %vm8900_vm5, %v8875_v17 }
 0x89f   :  { %v6188_v31 = vpop.permute.xlu1 %6187 }
 0x8a0   :  { %v6190_v42 = vpop.permute.xlu0 %6189  ;;  %6224 = vst.msk [vmem:[#allocation2 + $0x60] sm:$0xff] %vm6211_vm4, %v6188_v31 }
 0x8a1   :  { %6225 = vst.msk [vmem:[#allocation2 + $0x68] sm:$0xff] %vm6211_vm4, %v6190_v42 }
 0x8a3   :  { %v8877_v19 = vpop.permute.xlu1 %8876 }
 0x8a4   :  { %v8879_v38 = vpop.permute.xlu0 %8878  ;;  %8913 = vst.msk [vmem:[#allocation2 + $0x60] sm:$0xff] %vm8900_vm5, %v8877_v19 }
 0x8a5   :  { %8914 = vst.msk [vmem:[#allocation2 + $0x68] sm:$0xff] %vm8900_vm5, %v8879_v38 }
 0x8a7   :  { %v6192_v4 = vpop.permute.xlu1 %6191 }
 0x8a8   :  { %v6194_v2 = vpop.permute.xlu0 %6193  ;;  %6226 = vst.msk [vmem:[#allocation2 + $0x70] sm:$0xff] %vm6211_vm4, %v6192_v4 }
 0x8a9   :  { %6227 = vst.msk [vmem:[#allocation2 + $0x78] sm:$0xff] %vm6211_vm4, %v6194_v2 }
 0x8ab   :  { %v8881_v29 = vpop.permute.xlu1 %8880 }
 0x8ac   :  { %v8883_v50 = vpop.permute.xlu0 %8882  ;;  %8915 = vst.msk [vmem:[#allocation2 + $0x70] sm:$0xff] %vm8900_vm5, %v8881_v29 }
 0x8ad   :  { %8916 = vst.msk [vmem:[#allocation2 + $0x78] sm:$0xff] %vm8900_vm5, %v8883_v50 }
 0x91d   :  { %v10457_v54 = vpop.f32.mrf.mxu1 }
 0x91e   :  { %v10381_v12 = vpop.f32.mrf.mxu0  ;;  %11543 = vrot.lane.b32.xlu0 %v10457_v54, %s14310_s20  ;;  %v16921_v54 = vld [vmem:[%s17176_s10] ss:$0 sm:$0xff] }
 0x91f   :  { %11541 = vrot.lane.b32.xlu1 %v10381_v12, %s14310_s20  ;;  %v13761_v49 = vpop.f32.mrf.mxu1 }
 0x920   :  { %v13756_v13 = vpop.f32.mrf.mxu0 }
 0x922   :  { %v10609_v22 = vpop.f32.mrf.mxu1 }
 0x923   :  { %v10533_v48 = vpop.f32.mrf.mxu0  ;;  %11547 = vrot.lane.b32.xlu0 %v10609_v22, %s14310_s20 }
 0x924   :  { %11545 = vrot.lane.b32.xlu1 %v10533_v48, %s14310_s20  ;;  %v13771_v30 = vpop.f32.mrf.mxu1 }
 0x925   :  { %v13766_v57 = vpop.f32.mrf.mxu0 }
 0x926   :  { %v10761_v58 = vpop.f32.mrf.mxu1 }
 0x927   :  { %v10685_v8 = vpop.f32.mrf.mxu0  ;;  %11551 = vrot.lane.b32.xlu0 %v10761_v58, %s14310_s20 }
 0x928   :  { %11549 = vrot.lane.b32.xlu1 %v10685_v8, %s14310_s20  ;;  %v13781_v62 = vpop.f32.mrf.mxu1 }
 0x929   :  { %v13776_v21 = vpop.f32.mrf.mxu0 }
 0x92a   :  { %v10913_v52 = vpop.f32.mrf.mxu1 }
 0x92b   :  { %v10837_v26 = vpop.f32.mrf.mxu0  ;;  %11555 = vrot.lane.b32.xlu0 %v10913_v52, %s14310_s20 }
 0x92c   :  { %11553 = vrot.lane.b32.xlu1 %v10837_v26, %s14310_s20  ;;  %v13791_v24 = vpop.f32.mrf.mxu1 }
 0x92d   :  { %v13786_v63 = vpop.f32.mrf.mxu0  ;;  %v16932_v24 = vld [vmem:[%s17177_s11] ss:$0 sm:$0xff] }
 0x92e   :  { %v11065_v14 = vpop.f32.mrf.mxu1 }
 0x92f   :  { %v10989_v56 = vpop.f32.mrf.mxu0  ;;  %11559 = vrot.lane.b32.xlu0 %v11065_v14, %s14310_s20 }
 0x930   :  { %11557 = vrot.lane.b32.xlu1 %v10989_v56, %s14310_s20  ;;  %v13801_v59 = vpop.f32.mrf.mxu1 }
 0x931   :  { %v13796_v46 = vpop.f32.mrf.mxu0 }
 0x932   :  { %v11217_v27 = vpop.f32.mrf.mxu1 }
 0x933   :  { %v11141_v40 = vpop.f32.mrf.mxu0  ;;  %11563 = vrot.lane.b32.xlu0 %v11217_v27, %s14310_s20 }
 0x934   :  { %11561 = vrot.lane.b32.xlu1 %v11141_v40, %s14310_s20  ;;  %v13811_v47 = vpop.f32.mrf.mxu1 }
 0x935   :  { %v13806_v34 = vpop.f32.mrf.mxu0 }
 0x936   :  { %v11369_v15 = vpop.f32.mrf.mxu1 }
 0x937   :  { %v11293_v32 = vpop.f32.mrf.mxu0  ;;  %11567 = vrot.lane.b32.xlu0 %v11369_v15, %s14310_s20 }
 0x938   :  { %11565 = vrot.lane.b32.xlu1 %v11293_v32, %s14310_s20  ;;  %v13821_v33 = vpop.f32.mrf.mxu1 }
 0x939   :  { %v13816_v0 = vpop.f32.mrf.mxu0 }
 0x93a   :  { %v11521_v20 = vpop.f32.mrf.mxu1 }
 0x93b   :  { %v11445_v3 = vpop.f32.mrf.mxu0  ;;  %11571 = vrot.lane.b32.xlu0 %v11521_v20, %s14310_s20 }
 0x93c   :  { %11569 = vrot.lane.b32.xlu1 %v11445_v3, %s14310_s20  ;;  %v13831_v25 = vpop.f32.mrf.mxu1 }
 0x93d   :  { %v13826_v1 = vpop.f32.mrf.mxu0 }
 0x990   :  { %v11544_v43 = vpop.permute.xlu0 %11543 }
 0x991   :  { %v11542_v37 = vpop.permute.xlu1 %11541  ;;  %11591 = vst.msk [vmem:[#allocation2 + $0x8] sm:$0xff] %vm11589_vm6, %v11544_v43 }
 0x992   :  { %11590 = vst.msk [vmem:[#allocation2] sm:$0xff] %vm11589_vm6, %v11542_v37 }
 0x995   :  { %v11548_v61 = vpop.permute.xlu0 %11547 }
 0x996   :  { %v11546_v60 = vpop.permute.xlu1 %11545  ;;  %11593 = vst.msk [vmem:[#allocation2 + $0x18] sm:$0xff] %vm11589_vm6, %v11548_v61 }
 0x997   :  { %11592 = vst.msk [vmem:[#allocation2 + $0x10] sm:$0xff] %vm11589_vm6, %v11546_v60 }
 0x998   :  { %v16864_v5 = vld [vmem:[#allocation2 + $0x8] sm:$0xff] }
 0x999   :  { %v11552_v36 = vpop.permute.xlu0 %11551  ;;  %v16866_v55 = vld [vmem:[#allocation2] sm:$0xff] }
 0x99a   :  { %v11550_v17 = vpop.permute.xlu1 %11549  ;;  %11595 = vst.msk [vmem:[#allocation2 + $0x28] sm:$0xff] %vm11589_vm6, %v11552_v36  ;;  %13864 = vmatprep.mubr.f32.mxu0 %v16866_v55 }
 0x99b   :  { %11594 = vst.msk [vmem:[#allocation2 + $0x20] sm:$0xff] %vm11589_vm6, %v11550_v17  ;;  %13865 = vmatmul.mubr.f32.vlgmr.msra.gmra.mxu0 %v16864_v5 }
 0x99d   :  { %v11556_v31 = vpop.permute.xlu0 %11555  ;;  %v16872_v42 = vld [vmem:[#allocation2 + $0x18] sm:$0xff] }
 0x99e   :  { %v11554_v19 = vpop.permute.xlu1 %11553  ;;  %11597 = vst.msk [vmem:[#allocation2 + $0x38] sm:$0xff] %vm11589_vm6, %v11556_v31  ;;  %v16875_v38 = vld [vmem:[#allocation2 + $0x10] sm:$0xff] }
 0x99f   :  { %11596 = vst.msk [vmem:[#allocation2 + $0x30] sm:$0xff] %vm11589_vm6, %v11554_v19  ;;  %13867 = vmatprep.mubr.f32.mxu0 %v16875_v38 }
 0x9a0   :  { %13868 = vmatmul.mubr.f32.gmra.mxu0 %v16872_v42 }
 0x9a1   :  { %v11560_v4 = vpop.permute.xlu0 %11559  ;;  %v16880_v2 = vld [vmem:[#allocation2 + $0x28] sm:$0xff] }
 0x9a2   :  { %v11558_v29 = vpop.permute.xlu1 %11557  ;;  %11599 = vst.msk [vmem:[#allocation2 + $0x48] sm:$0xff] %vm11589_vm6, %v11560_v4  ;;  %v16883_v50 = vld [vmem:[#allocation2 + $0x20] sm:$0xff] }
 0x9a3   :  { %11598 = vst.msk [vmem:[#allocation2 + $0x40] sm:$0xff] %vm11589_vm6, %v11558_v29  ;;  %13870 = vmatprep.mubr.f32.mxu0 %v16883_v50 }
 0x9a4   :  { %13871 = vmatmul.mubr.f32.gmra.mxu0 %v16880_v2 }
 0x9a5   :  { %v11564_v16 = vpop.permute.xlu0 %11563  ;;  %v16888_v28 = vld [vmem:[#allocation2 + $0x38] sm:$0xff] }
 0x9a6   :  { %v11562_v18 = vpop.permute.xlu1 %11561  ;;  %11601 = vst.msk [vmem:[#allocation2 + $0x58] sm:$0xff] %vm11589_vm6, %v11564_v16  ;;  %v16891_v35 = vld [vmem:[#allocation2 + $0x30] sm:$0xff] }
 0x9a7   :  { %11600 = vst.msk [vmem:[#allocation2 + $0x50] sm:$0xff] %vm11589_vm6, %v11562_v18  ;;  %13873 = vmatprep.mubr.f32.mxu0 %v16891_v35 }
 0x9a8   :  { %13874 = vmatmul.mubr.f32.gmra.mxu0 %v16888_v28 }
 0x9a9   :  { %v11568_v10 = vpop.permute.xlu0 %11567  ;;  %v16896_v53 = vld [vmem:[#allocation2 + $0x48] sm:$0xff] }
 0x9aa   :  { %v11566_v7 = vpop.permute.xlu1 %11565  ;;  %11603 = vst.msk [vmem:[#allocation2 + $0x68] sm:$0xff] %vm11589_vm6, %v11568_v10  ;;  %v16899_v45 = vld [vmem:[#allocation2 + $0x40] sm:$0xff] }
 0x9ab   :  { %11602 = vst.msk [vmem:[#allocation2 + $0x60] sm:$0xff] %vm11589_vm6, %v11566_v7  ;;  %13876 = vmatprep.mubr.f32.mxu0 %v16899_v45 }
 0x9ac   :  { %13877 = vmatmul.mubr.f32.gmra.mxu0 %v16896_v53 }
 0x9ad   :  { %v11572_v44 = vpop.permute.xlu0 %11571  ;;  %v16904_v23 = vld [vmem:[#allocation2 + $0x58] sm:$0xff] }
 0x9ae   :  { %v11570_v51 = vpop.permute.xlu1 %11569  ;;  %11605 = vst.msk [vmem:[#allocation2 + $0x78] sm:$0xff] %vm11589_vm6, %v11572_v44  ;;  %v16907_v6 = vld [vmem:[#allocation2 + $0x50] sm:$0xff] }
 0x9af   :  { %11604 = vst.msk [vmem:[#allocation2 + $0x70] sm:$0xff] %vm11589_vm6, %v11570_v51  ;;  %13879 = vmatprep.mubr.f32.mxu0 %v16907_v6 }
 0x9b0   :  { %13880 = vmatmul.mubr.f32.gmra.mxu0 %v16904_v23 }
 0x9b1   :  { %v16912_v9 = vld [vmem:[#allocation2 + $0x68] sm:$0xff] }
 0x9b2   :  { %v16914_v11 = vld [vmem:[#allocation2 + $0x60] sm:$0xff] }
 0x9b3   :  { %13882 = vmatprep.mubr.f32.mxu0 %v16914_v11 }
 0x9b4   :  { %13883 = vmatmul.mubr.f32.gmra.mxu0 %v16912_v9 }
 0x9b5   :  { %v11621_v41 = vld [vmem:[#allocation2 + $0x78] sm:$0xff] }
 0x9b6   :  { %v11620_v39 = vld [vmem:[#allocation2 + $0x70] sm:$0xff] }
 0x9b7   :  { %13885 = vmatprep.mubr.f32.mxu0 %v11620_v39 }
 0x9b8   :  { %13886 = vmatmul.mubr.f32.gmra.mxu0 %v11621_v41 }
 0xa5b   :  { %v13866_v12 = vpop.f32.mrf.mxu0 }
 0xa5c   :  { %v11717_v49 = vadd.f32 %v13866_v12, %v16921_v54 }
 0xa5d   :  { %v11711_v13 = vpop.f32.mrf.mxu0 }
 0xa5e   :  { %14207 = vtanh.f32 %v11717_v49  ;;  %v11712_v22 = vadd.f32 %v16921_v54, %v11711_v13 }
 0xa60   :  { %14209 = vtanh.f32 %v11712_v22  ;;  %v13869_v48 = vpop.f32.mrf.mxu0 }
 0xa61   :  { %v11727_v30 = vadd.f32 %v13869_v48, %v16921_v54 }
 0xa62   :  { %v11721_v57 = vpop.f32.mrf.mxu0 }
 0xa63   :  { %14211 = vtanh.f32 %v11727_v30  ;;  %v11722_v58 = vadd.f32 %v16921_v54, %v11721_v57 }
 0xa64   :  { %v13872_v8 = vpop.f32.mrf.mxu0 }
 0xa65   :  { %14213 = vtanh.f32 %v11722_v58  ;;  %v11737_v62 = vadd.f32 %v13872_v8, %v16921_v54 }
 0xa66   :  { %v11731_v21 = vpop.f32.mrf.mxu0 }
 0xa67   :  { %14215 = vtanh.f32 %v11737_v62  ;;  %v11732_v52 = vadd.f32 %v16921_v54, %v11731_v21 }
 0xa68   :  { %v13875_v26 = vpop.f32.mrf.mxu0 }
 0xa69   :  { %14217 = vtanh.f32 %v11732_v52  ;;  %v11747_v0 = vadd.f32 %v13875_v26, %v16921_v54 }
 0xa6a   :  { %v11741_v63 = vpop.f32.mrf.mxu0 }
 0xa6b   :  { %v14208_v14 = vpop.eup %14207  ;;  %v11742_v56 = vadd.f32 %v16921_v54, %v11741_v63 }
 0xa6c   :  { %v13878_v59 = vpop.f32.mrf.mxu0  ;;  %v11814_v46 = vmul.f32 %v14208_v14, %v16932_v24 }
 0xa6d   :  { %v14210_v27 = vpop.eup %14209  ;;  %14219 = vtanh.f32 %v11742_v56  ;;  %v11757_v40 = vadd.f32 %v13878_v59, %v16921_v54 }
 0xa6e   :  { %v11751_v47 = vpop.f32.mrf.mxu0  ;;  %v11832_v34 = vsel %vm977_vm2, %v11814_v46, 0.0  ;;  %v11813_v15 = vmul.f32 %v14210_v27, %v16932_v24 }
 0xa6f   :  { %14221 = vtanh.f32 %v11757_v40  ;;  %v11752_v32 = vadd.f32 %v16921_v54, %v11751_v47  ;;  %11833 = vadd.xlane.f32.xlu0 %v11832_v34 }
 0xa70   :  { %v14212_v33 = vpop.eup %14211  ;;  %v13881_v20 = vpop.f32.mrf.mxu0  ;;  %v11829_v3 = vsel %vm977_vm2, %v11813_v15, 0.0 }
 0xa71   :  { %14223 = vtanh.f32 %v11752_v32  ;;  %v11767_v25 = vadd.f32 %v13881_v20, %v16921_v54  ;;  %11830 = vadd.xlane.f32.xlu1 %v11829_v3  ;;  %v11816_v1 = vmul.f32 %v14212_v33, %v16932_v24 }
 0xa72   :  { %v14214_v43 = vpop.eup %14213  ;;  %v11761_v37 = vpop.f32.mrf.mxu0 }
 0xa73   :  { %14225 = vtanh.f32 %v11767_v25  ;;  %v11762_v61 = vadd.f32 %v16921_v54, %v11761_v37  ;;  %v11815_v60 = vmul.f32 %v14214_v43, %v16932_v24  ;;  %v11838_v31 = vsel %vm977_vm2, %v11816_v1, 0.0  ;;  %v12198_v37 = vld [vmem:[%s17178_s13 + $0x78] sm:$0xff] }
 0xa74   :  { %v14216_v36 = vpop.eup %14215  ;;  %14227 = vtanh.f32 %v11747_v0  ;;  %v13884_v17 = vpop.f32.mrf.mxu0  ;;  %13888 = vmatprep.subr.mxu1 %v12198_v37 }
 0xa75   :  { %14229 = vtanh.f32 %v11762_v61  ;;  %v11777_v19 = vadd.f32 %v13884_v17, %v16921_v54  ;;  %11839 = vadd.xlane.f32.xlu1 %v11838_v31  ;;  %v11835_v4 = vsel %vm977_vm2, %v11815_v60, 0.0  ;;  %v11818_v29 = vmul.f32 %v14216_v36, %v16932_v24  ;;  %v12197_v61 = vld [vmem:[%s17178_s13 + $0x70] sm:$0xff]  ;;  %13889 = vmatpush3.msra.mxu1 %v12198_v37  ;;  %v12196_v60 = vld [vmem:[%s17178_s13 + $0x68] sm:$0xff]  ;;  %v12194_v36 = vld [vmem:[%s17178_s13 + $0x58] sm:$0xff] }
 0xa76   :  { %v14218_v16 = vpop.eup %14217  ;;  %11836 = vadd.xlane.f32.xlu0 %v11835_v4  ;;  %v11771_v18 = vpop.f32.mrf.mxu0  ;;  %13890 = vmatprep.subr.mxu1 %v12197_v61  ;;  %v12193_v17 = vld [vmem:[%s17178_s13 + $0x50] sm:$0xff]  ;;  %v12192_v31 = vld [vmem:[%s17178_s13 + $0x48] sm:$0xff]  ;;  %v12190_v4 = vld [vmem:[%s17178_s13 + $0x38] sm:$0xff] }
 0xa77   :  { %14231 = vtanh.f32 %v11777_v19  ;;  %v11772_v10 = vadd.f32 %v16921_v54, %v11771_v18  ;;  %v11844_v44 = vsel %vm977_vm2, %v11818_v29, 0.0  ;;  %v11817_v51 = vmul.f32 %v14218_v16, %v16932_v24  ;;  %13891 = vmatpush3.msra.mxu1 %v12197_v61  ;;  %v12191_v19 = vld [vmem:[%s17178_s13 + $0x40] sm:$0xff]  ;;  %v12189_v29 = vld [vmem:[%s17178_s13 + $0x30] sm:$0xff]  ;;  %v12188_v16 = vld [vmem:[%s17178_s13 + $0x28] sm:$0xff] }
 0xa78   :  { %v13887_v7 = vpop.f32.mrf.mxu0  ;;  %13892 = vmatprep.subr.mxu1 %v12196_v60  ;;  %v12187_v18 = vld [vmem:[%s17178_s13 + $0x20] sm:$0xff] }
 0xa79   :  { %v11787_v41 = vadd.f32 %v13887_v7, %v16921_v54  ;;  %11845 = vadd.xlane.f32.xlu1 %v11844_v44  ;;  %14233 = vtanh.f32 %v11772_v10  ;;  %v11841_v22 = vsel %vm977_vm2, %v11817_v51, 0.0  ;;  %13893 = vmatpush3.msra.mxu1 %v12196_v60  ;;  %v12186_v10 = vld [vmem:[%s17178_s13 + $0x18] sm:$0xff]  ;;  %v12185_v7 = vld [vmem:[%s17178_s13 + $0x10] sm:$0xff]  ;;  %v12184_v44 = vld [vmem:[%s17178_s13 + $0x8] sm:$0xff] }
 0xa7a   :  { %v14220_v39 = vpop.eup %14219  ;;  %v11781_v12 = vpop.f32.mrf.mxu0  ;;  %v12183_v51 = vld [vmem:[%s17178_s13] sm:$0xff] }
 0xa7b   :  { %14235 = vtanh.f32 %v11787_v41  ;;  %v11782_v49 = vadd.f32 %v16921_v54, %v11781_v12  ;;  %v11819_v48 = vmul.f32 %v14220_v39, %v16932_v24  ;;  %v17027_v41 = vstv %s17179_s12 }
 0xa7c   :  { %v14222_v13 = vpop.eup %14221 }
 0xa7d   :  { %11842 = vadd.xlane.f32.xlu1 %v11841_v22  ;;  %v11822_v30 = vmul.f32 %v14222_v13, %v16932_v24  ;;  %14237 = vtanh.f32 %v11782_v49  ;;  %v11847_v62 = vsel %vm977_vm2, %v11819_v48, 0.0 }
 0xa7e   :  { %v14224_v57 = vpop.eup %14223 }
 0xa7f   :  { %v11856_v58 = vsel %vm977_vm2, %v11822_v30, 0.0  ;;  %v11821_v21 = vmul.f32 %v14224_v57, %v16932_v24 }
 0xa80   :  { %v14226_v8 = vpop.eup %14225  ;;  %11857 = vadd.xlane.f32.xlu0 %v11856_v58 }
 0xa81   :  { %v14228_v52 = vpop.eup %14227  ;;  %11848 = vadd.xlane.f32.xlu1 %v11847_v62  ;;  %v11824_v54 = vmul.f32 %v14226_v8, %v16932_v24  ;;  %v11853_v59 = vsel %vm977_vm2, %v11821_v21, 0.0 }
 0xa82   :  { %v14230_v26 = vpop.eup %14229  ;;  %v11820_v46 = vmul.f32 %v14228_v52, %v16932_v24 }
 0xa83   :  { %v11862_v63 = vsel %vm977_vm2, %v11824_v54, 0.0  ;;  %v11823_v14 = vmul.f32 %v14230_v26, %v16932_v24 }
 0xa84   :  { %v14232_v56 = vpop.eup %14231  ;;  %11863 = vadd.xlane.f32.xlu0 %v11862_v63  ;;  %v11850_v15 = vsel %vm977_vm2, %v11820_v46, 0.0 }
 0xa85   :  { %11854 = vadd.xlane.f32.xlu1 %v11853_v59  ;;  %v11859_v40 = vsel %vm977_vm2, %v11823_v14, 0.0  ;;  %v11826_v47 = vmul.f32 %v14232_v56, %v16932_v24 }
 0xa86   :  { %v14234_v27 = vpop.eup %14233 }
 0xa87   :  { %v11868_v33 = vsel %vm977_vm2, %v11826_v47, 0.0  ;;  %v11825_v0 = vmul.f32 %v14234_v27, %v16932_v24 }
 0xa88   :  { %v14236_v34 = vpop.eup %14235  ;;  %11860 = vadd.xlane.f32.xlu0 %v11859_v40 }
 0xa89   :  { %11851 = vadd.xlane.f32.xlu1 %v11850_v15  ;;  %v11828_v32 = vmul.f32 %v14236_v34, %v16932_v24  ;;  %v11865_v25 = vsel %vm977_vm2, %v11825_v0, 0.0 }
 0xa8a   :  { %v14238_v20 = vpop.eup %14237 }
 0xa8b   :  { %v11874_v3 = vsel %vm977_vm2, %v11828_v32, 0.0  ;;  %v11827_v1 = vmul.f32 %v14238_v20, %v16932_v24  ;;  %v12195_v24 = vld [vmem:[%s17178_s13 + $0x60] sm:$0xff] }
 0xa8c   :  { %11869 = vadd.xlane.f32.xlu0 %v11868_v33  ;;  %13894 = vmatprep.subr.mxu1 %v12195_v24 }
 0xa8d   :  { %11875 = vadd.xlane.f32.xlu1 %v11874_v3  ;;  %v11871_v43 = vsel %vm977_vm2, %v11827_v1, 0.0  ;;  %13895 = vmatpush3.msra.mxu1 %v12195_v24 }
 0xa8e   :  { %13896 = vmatprep.subr.mxu1 %v12194_v36 }
 0xa8f   :  { %13897 = vmatpush3.msra.mxu1 %v12194_v36 }
 0xa90   :  { %11866 = vadd.xlane.f32.xlu0 %v11865_v25  ;;  %13898 = vmatprep.subr.mxu1 %v12193_v17 }
 0xa91   :  { %13899 = vmatpush3.msra.mxu1 %v12193_v17 }
 0xa92   :  { %13900 = vmatprep.subr.mxu1 %v12192_v31 }
 0xa93   :  { %13901 = vmatpush3.msra.mxu1 %v12192_v31 }
 0xa94   :  { %11872 = vadd.xlane.f32.xlu0 %v11871_v43  ;;  %13902 = vmatprep.subr.mxu1 %v12191_v19 }
 0xa95   :  { %13903 = vmatpush3.msra.mxu1 %v12191_v19 }
 0xa96   :  { %13904 = vmatprep.subr.mxu1 %v12190_v4 }
 0xa97   :  { %13905 = vmatpush3.msra.mxu1 %v12190_v4 }
 0xa98   :  { %13906 = vmatprep.subr.mxu1 %v12189_v29 }
 0xa99   :  { %13907 = vmatpush3.msra.mxu1 %v12189_v29 }
 0xa9a   :  { %13908 = vmatprep.subr.mxu1 %v12188_v16 }
 0xa9b   :  { %13909 = vmatpush3.msra.mxu1 %v12188_v16 }
 0xa9c   :  { %13910 = vmatprep.subr.mxu1 %v12187_v18 }
 0xa9d   :  { %13911 = vmatpush3.msra.mxu1 %v12187_v18 }
 0xa9e   :  { %13912 = vmatprep.subr.mxu1 %v12186_v10 }
 0xa9f   :  { %13913 = vmatpush3.msra.mxu1 %v12186_v10 }
 0xaa0   :  { %13914 = vmatprep.subr.mxu1 %v12185_v7 }
 0xaa1   :  { %13915 = vmatpush3.msra.mxu1 %v12185_v7 }
 0xaa2   :  { %13916 = vmatprep.subr.mxu1 %v12184_v44 }
 0xaa3   :  { %13917 = vmatpush3.msra.mxu1 %v12184_v44 }
 0xaa4   :  { %13918 = vmatprep.subr.mxu1 %v12183_v51 }
 0xaa5   :  { %13919 = vmatpush3.msra.mxu1 %v12183_v51 }
 0xaf8   :  { %v11834_v39 = vpop.xlane.xlu0 %11833 }
 0xaf9   :  { %v11880_v12 = vadd.f32 %v17027_v41, %v11834_v39 }
 0xafa   :  { %v11831_v49 = vpop.xlane.xlu1 %11830 }
 0xafb   :  { %v11897_v13 = vmul.f32 1.442695, %v11880_v12  ;;  %v11879_v22 = vadd.f32 %v17027_v41, %v11831_v49 }
 0xafd   :  { %14239 = vpow2.f32 %v11897_v13  ;;  %v11895_v48 = vmul.f32 1.442695, %v11879_v22 }
 0xafe   :  { %v11840_v30 = vpop.xlane.xlu1 %11839 }
 0xaff   :  { %14241 = vpow2.f32 %v11895_v48  ;;  %v11882_v57 = vadd.f32 %v17027_v41, %v11840_v30  ;;  %v11837_v58 = vpop.xlane.xlu0 %11836 }
 0xb00   :  { %v11881_v8 = vadd.f32 %v17027_v41, %v11837_v58 }
 0xb01   :  { %v11901_v62 = vmul.f32 1.442695, %v11882_v57 }
 0xb02   :  { %v11899_v21 = vmul.f32 1.442695, %v11881_v8  ;;  %v11846_v52 = vpop.xlane.xlu1 %11845 }
 0xb03   :  { %14243 = vpow2.f32 %v11901_v62  ;;  %v11884_v54 = vadd.f32 %v17027_v41, %v11846_v52 }
 0xb04   :  { %14245 = vpow2.f32 %v11899_v21 }
 0xb05   :  { %v11905_v26 = vmul.f32 1.442695, %v11884_v54 }
 0xb06   :  { %v11843_v63 = vpop.xlane.xlu1 %11842 }
 0xb07   :  { %14247 = vpow2.f32 %v11905_v26  ;;  %v11883_v14 = vadd.f32 %v17027_v41, %v11843_v63 }
 0xb09   :  { %v11903_v56 = vmul.f32 1.442695, %v11883_v14  ;;  %v11858_v59 = vpop.xlane.xlu0 %11857 }
 0xb0a   :  { %v17035_v46 = vpop.eup %14239  ;;  %v11888_v27 = vadd.f32 %v17027_v41, %v11858_v59  ;;  %v11849_v40 = vpop.xlane.xlu1 %11848 }
 0xb0b   :  { %v11933_v47 = vrot.slane %v17035_v46, 4  ;;  %14249 = vpow2.f32 %v11903_v56  ;;  %v11885_v34 = vadd.f32 %v17027_v41, %v11849_v40 }
 0xb0c   :  { %v17040_v15 = vpop.eup %14241  ;;  %v11913_v32 = vmul.f32 1.442695, %v11888_v27 }
 0xb0d   :  { %v11934_v33 = vadd.f32 %v17035_v46, %v11933_v47  ;;  %v11927_v0 = vrot.slane %v17040_v15, 4  ;;  %v11907_v20 = vmul.f32 1.442695, %v11885_v34  ;;  %v11864_v3 = vpop.xlane.xlu0 %11863 }
 0xb0e   :  { %14251 = vpow2.f32 %v11913_v32  ;;  %v11890_v25 = vadd.f32 %v17027_v41, %v11864_v3  ;;  %v11855_v1 = vpop.xlane.xlu1 %11854 }
 0xb0f   :  { %v11935_v43 = vrot.slane %v11934_v33, 2  ;;  %v11928_v37 = vadd.f32 %v17040_v15, %v11927_v0  ;;  %14253 = vpow2.f32 %v11907_v20  ;;  %v11887_v61 = vadd.f32 %v17027_v41, %v11855_v1 }
 0xb10   :  { %v17047_v60 = vpop.eup %14243  ;;  %v11917_v24 = vmul.f32 1.442695, %v11890_v25 }
 0xb11   :  { %v17049_v36 = vpop.eup %14245  ;;  %v11936_v17 = vadd.f32 %v11935_v43, %v11934_v33  ;;  %v11929_v31 = vrot.slane %v11928_v37, 2  ;;  %v11945_v19 = vrot.slane %v17047_v60, 4  ;;  %v11911_v4 = vmul.f32 1.442695, %v11887_v61  ;;  %v11861_v29 = vpop.xlane.xlu0 %11860 }
 0xb12   :  { %v11939_v16 = vrot.slane %v17049_v36, 4  ;;  %14255 = vpow2.f32 %v11917_v24  ;;  %v11889_v18 = vadd.f32 %v17027_v41, %v11861_v29  ;;  %v11852_v10 = vpop.xlane.xlu1 %11851 }
 0xb13   :  { %v11937_v7 = vrot.slane %v11936_v17, 1  ;;  %v11930_v44 = vadd.f32 %v11929_v31, %v11928_v37  ;;  %v11946_v51 = vadd.f32 %v17047_v60, %v11945_v19  ;;  %14257 = vpow2.f32 %v11911_v4 }
 0xb14   :  { %v17055_v39 = vpop.eup %14247  ;;  %v11940_v12 = vadd.f32 %v17049_v36, %v11939_v16  ;;  %v11915_v49 = vmul.f32 1.442695, %v11889_v18  ;;  %v11886_v13 = vadd.f32 %v17027_v41, %v11852_v10 }
 0xb15   :  { %v11938_v22 = vadd.f32 %v11937_v7, %v11936_v17  ;;  %v11931_v48 = vrot.slane %v11930_v44, 1  ;;  %v11947_v30 = vrot.slane %v11946_v51, 2  ;;  %v11957_v57 = vrot.slane %v17055_v39, 4  ;;  %v11870_v58 = vpop.xlane.xlu0 %11869 }
 0xb16   :  { %v11941_v8 = vrot.slane %v11940_v12, 2  ;;  %14259 = vpow2.f32 %v11915_v49  ;;  %v11909_v62 = vmul.f32 1.442695, %v11886_v13  ;;  %v11892_v21 = vadd.f32 %v17027_v41, %v11870_v58  ;;  %v11876_v52 = vpop.xlane.xlu1 %11875 }
 0xb17   :  { %v12024_v54 = vadd.f32 1e-08, %v11938_v22  ;;  %v11932_v26 = vadd.f32 %v11931_v48, %v11930_v44  ;;  %v11948_v63 = vadd.f32 %v11947_v30, %v11946_v51  ;;  %v11958_v14 = vadd.f32 %v17055_v39, %v11957_v57 }
 0xb18   :  { %v17062_v56 = vpop.eup %14249  ;;  %v11942_v59 = vadd.f32 %v11941_v8, %v11940_v12  ;;  %14261 = vpow2.f32 %v11909_v62  ;;  %v11921_v27 = vmul.f32 1.442695, %v11892_v21  ;;  %v11894_v40 = vadd.f32 %v17027_v41, %v11876_v52 }
 0xb19   :  { %14263 = vrcp.f32 %v12024_v54  ;;  %v12023_v47 = vadd.f32 1e-08, %v11932_v26  ;;  %v11949_v34 = vrot.slane %v11948_v63, 1  ;;  %v11959_v32 = vrot.slane %v11958_v14, 2  ;;  %v11867_v33 = vpop.xlane.xlu0 %11866 }
 0xb1a   :  { %v11943_v0 = vrot.slane %v11942_v59, 1  ;;  %v11951_v20 = vrot.slane %v17062_v56, 4  ;;  %14265 = vpow2.f32 %v11921_v27  ;;  %v11925_v3 = vmul.f32 1.442695, %v11894_v40 }
 0xb1b   :  { %v17066_v25 = vpop.eup %14251  ;;  %14267 = vrcp.f32 %v12023_v47  ;;  %v11950_v1 = vadd.f32 %v11949_v34, %v11948_v63  ;;  %v11960_v43 = vadd.f32 %v11959_v32, %v11958_v14  ;;  %v11891_v37 = vadd.f32 %v17027_v41, %v11867_v33 }
 0xb1c   :  { %v17069_v61 = vpop.eup %14253  ;;  %v11944_v24 = vadd.f32 %v11943_v0, %v11942_v59  ;;  %v11952_v17 = vadd.f32 %v17062_v56, %v11951_v20  ;;  %v11981_v31 = vrot.slane %v17066_v25, 4  ;;  %14269 = vpow2.f32 %v11925_v3 }
 0xb1d   :  { %v12026_v19 = vadd.f32 1e-08, %v11950_v1  ;;  %v11963_v4 = vrot.slane %v17069_v61, 4  ;;  %v11919_v29 = vmul.f32 1.442695, %v11891_v37  ;;  %v11873_v16 = vpop.xlane.xlu0 %11872  ;;  %v11961_v18 = vrot.slane %v11960_v43, 1 }
 0xb1e   :  { %v12025_v10 = vadd.f32 1e-08, %v11944_v24  ;;  %v11953_v7 = vrot.slane %v11952_v17, 2  ;;  %v11982_v44 = vadd.f32 %v17066_v25, %v11981_v31  ;;  %v11893_v51 = vadd.f32 %v17027_v41, %v11873_v16 }
 0xb1f   :  { %v17076_v12 = vpop.eup %14255  ;;  %v11964_v49 = vadd.f32 %v17069_v61, %v11963_v4  ;;  %14271 = vpow2.f32 %v11919_v29  ;;  %v11962_v13 = vadd.f32 %v11961_v18, %v11960_v43 }
 0xb20   :  { %v17079_v22 = vpop.eup %14257  ;;  %14273 = vrcp.f32 %v12025_v10  ;;  %v11954_v48 = vadd.f32 %v11953_v7, %v11952_v17  ;;  %v11983_v30 = vrot.slane %v11982_v44, 2  ;;  %v11993_v57 = vrot.slane %v17076_v12, 4 }
 0xb21   :  { %v11965_v58 = vrot.slane %v11964_v49, 2  ;;  %v11975_v8 = vrot.slane %v17079_v22, 4  ;;  %v11923_v62 = vmul.f32 1.442695, %v11893_v51  ;;  %v12028_v21 = vadd.f32 1e-08, %v11962_v13 }
 0xb22   :  { %v11955_v52 = vrot.slane %v11954_v48, 1  ;;  %v11984_v41 = vadd.f32 %v11983_v30, %v11982_v44  ;;  %v11994_v54 = vadd.f32 %v17076_v12, %v11993_v57  ;;  %14275 = vrcp.f32 %v12026_v19 }
 0xb23   :  { %v17084_v26 = vpop.eup %14259  ;;  %v11976_v63 = vadd.f32 %v17079_v22, %v11975_v8  ;;  %14277 = vpow2.f32 %v11923_v62  ;;  %v11966_v14 = vadd.f32 %v11965_v58, %v11964_v49 }
 0xb24   :  { %v11985_v59 = vrot.slane %v11984_v41, 1  ;;  %v11995_v27 = vrot.slane %v11994_v54, 2  ;;  %v11987_v40 = vrot.slane %v17084_v26, 4  ;;  %v11956_v47 = vadd.f32 %v11955_v52, %v11954_v48 }
 0xb25   :  { %v17088_v34 = vpop.eup %14261  ;;  %v11977_v32 = vrot.slane %v11976_v63, 2  ;;  %v11967_v33 = vrot.slane %v11966_v14, 1  ;;  %14279 = vrcp.f32 %v12028_v21 }
 0xb26   :  { %v14264_v0 = vpop.eup %14263  ;;  %v11986_v20 = vadd.f32 %v11985_v59, %v11984_v41  ;;  %v11996_v3 = vadd.f32 %v11995_v27, %v11994_v54  ;;  %v11988_v1 = vadd.f32 %v17084_v26, %v11987_v40  ;;  %v11969_v43 = vrot.slane %v17088_v34, 4 }
 0xb27   :  { %v17092_v37 = vpop.eup %14265  ;;  %v11978_v24 = vadd.f32 %v11977_v32, %v11976_v63  ;;  %v11968_v17 = vadd.f32 %v11967_v33, %v11966_v14  ;;  %v12027_v31 = vadd.f32 1e-08, %v11956_v47  ;;  %v12056_v18 = vmul.f32 %v14264_v0, %v17035_v46 }
 0xb28   :  { %v14268_v19 = vpop.eup %14267  ;;  %v11997_v4 = vrot.slane %v11996_v3, 1  ;;  %v11989_v29 = vrot.slane %v11988_v1, 2  ;;  %v11970_v16 = vadd.f32 %v17088_v34, %v11969_v43  ;;  %v12005_v44 = vrot.slane %v17092_v37, 4 }
 0xb29   :  { %v17096_v10 = vpop.eup %14269  ;;  %v11979_v7 = vrot.slane %v11978_v24, 1  ;;  %v12029_v51 = vadd.f32 1e-08, %v11968_v17  ;;  %14281 = vrcp.f32 %v12027_v31  ;;  %v12032_v49 = vadd.f32 1e-08, %v11986_v20 }
 0xb2a   :  { %v11998_v13 = vadd.f32 %v11997_v4, %v11996_v3  ;;  %v11990_v48 = vadd.f32 %v11989_v29, %v11988_v1  ;;  %v12017_v30 = vrot.slane %v17096_v10, 4  ;;  %v12006_v58 = vadd.f32 %v17092_v37, %v12005_v44 }
 0xb2b   :  { %v11980_v57 = vadd.f32 %v11979_v7, %v11978_v24  ;;  %v11971_v8 = vrot.slane %v11970_v16, 2  ;;  %14283 = vrcp.f32 %v12029_v51  ;;  %v12055_v41 = vmul.f32 %v14268_v19, %v17040_v15 }
 0xb2c   :  { %v17101_v62 = vpop.eup %14271  ;;  %v12034_v46 = vadd.f32 1e-08, %v11998_v13  ;;  %v11991_v21 = vrot.slane %v11990_v48, 1  ;;  %v12018_v52 = vadd.f32 %v17096_v10, %v12017_v30  ;;  %v12007_v14 = vrot.slane %v12006_v58, 2 }
 0xb2d   :  { %v14274_v54 = vpop.eup %14273  ;;  %v12031_v63 = vadd.f32 1e-08, %v11980_v57  ;;  %v11999_v59 = vrot.slane %v17101_v62, 4  ;;  %v11972_v27 = vadd.f32 %v11971_v8, %v11970_v16  ;;  %14285 = vrcp.f32 %v12032_v49 }
 0xb2e   :  { %v11992_v40 = vadd.f32 %v11991_v21, %v11990_v48  ;;  %v12019_v47 = vrot.slane %v12018_v52, 2  ;;  %v12057_v32 = vmul.f32 %v14274_v54, %v17049_v36  ;;  %14287 = vrcp.f32 %v12034_v46 }
 0xb2f   :  { %v14276_v33 = vpop.eup %14275  ;;  %v12008_v0 = vadd.f32 %v12007_v14, %v12006_v58  ;;  %v12000_v20 = vadd.f32 %v17101_v62, %v11999_v59  ;;  %v11973_v3 = vrot.slane %v11972_v27, 1  ;;  %14289 = vrcp.f32 %v12031_v63 }
 0xb30   :  { %v17108_v1 = vpop.eup %14277  ;;  %v12033_v15 = vadd.f32 1e-08, %v11992_v40  ;;  %v12058_v43 = vmul.f32 %v14276_v33, %v17047_v60  ;;  %v12071_v24 = vmul.f32 %v12055_v41, %v16866_v55  ;;  %v17112_v17 = vadd.f32 %v12019_v47, %v12018_v52 }
 0xb31   :  { %v12001_v31 = vrot.slane %v12000_v20, 2  ;;  %v12011_v19 = vrot.slane %v17108_v1, 4  ;;  %v11974_v36 = vadd.f32 %v11973_v3, %v11972_v27  ;;  %v12009_v29 = vrot.slane %v12008_v0, 1 }
 0xb32   :  { %v14280_v4 = vpop.eup %14279  ;;  %v12072_v16 = vmul.f32 %v12056_v18, %v16864_v5  ;;  %v12073_v7 = vmul.f32 %v12057_v32, %v16875_v38  ;;  %v12074_v44 = vmul.f32 %v12058_v43, %v16872_v42  ;;  %14291 = vrcp.f32 %v12033_v15 }
 0xb33   :  { %v12002_v51 = vadd.f32 %v12001_v31, %v12000_v20  ;;  %v12012_v60 = vadd.f32 %v17108_v1, %v12011_v19  ;;  %v12030_v49 = vadd.f32 1e-08, %v11974_v36  ;;  %v12060_v55 = vmul.f32 %v14280_v4, %v17055_v39 }
 0xb34   :  { %v12087_v13 = vrot.slane %v12071_v24, 4  ;;  %v12093_v48 = vrot.slane %v12072_v16, 4  ;;  %v12099_v30 = vrot.slane %v12073_v7, 4  ;;  %v12105_v8 = vrot.slane %v12074_v44, 4 }
 0xb35   :  { %v12003_v57 = vrot.slane %v12002_v51, 1  ;;  %v12013_v58 = vrot.slane %v12012_v60, 2  ;;  %14293 = vrcp.f32 %v12030_v49  ;;  %v12076_v5 = vmul.f32 %v12060_v55, %v16880_v2 }
 0xb36   :  { %v14282_v46 = vpop.eup %14281  ;;  %v12088_v38 = vadd.f32 %v12087_v13, %v12071_v24  ;;  %v12094_v18 = vadd.f32 %v12093_v48, %v12072_v16  ;;  %v12100_v42 = vadd.f32 %v12099_v30, %v12073_v7  ;;  %v12106_v54 = vadd.f32 %v12105_v8, %v12074_v44 }
 0xb37   :  { %v12004_v21 = vadd.f32 %v12003_v57, %v12002_v51  ;;  %v12014_v52 = vadd.f32 %v12013_v58, %v12012_v60  ;;  %v12059_v41 = vmul.f32 %v14282_v46, %v17062_v56  ;;  %v12117_v27 = vrot.slane %v12076_v5, 4 }
 0xb38   :  { %v14284_v63 = vpop.eup %14283  ;;  %v12089_v39 = vrot.slane %v12088_v38, 2  ;;  %v12095_v14 = vrot.slane %v12094_v18, 2  ;;  %v12101_v59 = vrot.slane %v12100_v42, 2  ;;  %v12107_v15 = vrot.slane %v12106_v54, 2 }
 0xb39   :  { %v12035_v40 = vadd.f32 1e-08, %v12004_v21  ;;  %v12015_v47 = vrot.slane %v12014_v52, 1  ;;  %v12061_v32 = vmul.f32 %v14284_v63, %v17069_v61  ;;  %v12075_v33 = vmul.f32 %v12059_v41, %v16883_v50 }
 0xb3a   :  { %v12090_v2 = vadd.f32 %v12089_v39, %v12088_v38  ;;  %v12096_v20 = vadd.f32 %v12095_v14, %v12094_v18  ;;  %v12102_v3 = vadd.f32 %v12101_v59, %v12100_v42  ;;  %v14286_v43 = vpop.eup %14285  ;;  %v12118_v31 = vadd.f32 %v12117_v27, %v12076_v5 }
 0xb3b   :  { %14295 = vrcp.f32 %v12035_v40  ;;  %v12077_v56 = vmul.f32 %v12061_v32, %v16891_v35  ;;  %v12111_v24 = vrot.slane %v12075_v33, 4  ;;  %v14288_v19 = vpop.eup %14287  ;;  %v12010_v36 = vadd.f32 %v12009_v29, %v12008_v0 }
 0xb3c   :  { %v14290_v4 = vpop.eup %14289  ;;  %v12091_v16 = vrot.slane %v12090_v2, 1  ;;  %v12016_v51 = vadd.f32 %v12015_v47, %v12014_v52  ;;  %v12097_v61 = vrot.slane %v12096_v20, 1  ;;  %v12103_v60 = vrot.slane %v12102_v3, 1 }
 0xb3d   :  { %v12112_v7 = vadd.f32 %v12111_v24, %v12075_v33  ;;  %v12123_v44 = vrot.slane %v12077_v56, 4  ;;  %v12108_v50 = vadd.f32 %v12107_v15, %v12106_v54  ;;  %v12119_v55 = vrot.slane %v12118_v31, 2 }
 0xb3e   :  { %v12021_v48 = vrot.slane %v17112_v17, 1  ;;  %v12036_v35 = vadd.f32 1e-08, %v12010_v36  ;;  %v12037_v57 = vadd.f32 1e-08, %v12016_v51  ;;  %v12092_v58 = vadd.f32 %v12091_v16, %v12090_v2 }
 0xb3f   :  { %v12113_v49 = vrot.slane %v12112_v7, 2  ;;  %v12124_v13 = vadd.f32 %v12123_v44, %v12077_v56  ;;  %v14292_v30 = vpop.eup %14291  ;;  %v12098_v46 = vadd.f32 %v12097_v61, %v12096_v20  ;;  %v12063_v38 = vmul.f32 %v14290_v4, %v17079_v22 }
 0xb40   :  { %v12022_v5 = vadd.f32 %v12021_v48, %v17112_v17  ;;  %14297 = vrcp.f32 %v12036_v35  ;;  %v12104_v42 = vadd.f32 %v12103_v60, %v12102_v3  ;;  %v12109_v21 = vrot.slane %v12108_v50, 1 }
 0xb41   :  { %v12114_v8 = vadd.f32 %v12113_v49, %v12112_v7  ;;  %v12125_v0 = vrot.slane %v12124_v13, 2  ;;  %v12120_v52 = vadd.f32 %v12119_v55, %v12118_v31  ;;  %14299 = vrcp.f32 %v12037_v57 }
 0xb42   :  { %v14294_v29 = vpop.eup %14293  ;;  %v12038_v41 = vadd.f32 1e-08, %v12022_v5  ;;  %v12064_v54 = vmul.f32 %v14286_v43, %v17066_v25  ;;  %v12065_v63 = vmul.f32 %v14292_v30, %v17084_v26  ;;  %v12066_v17 = vmul.f32 %v14288_v19, %v17076_v12 }
 0xb43   :  { %v12062_v18 = vmul.f32 %v14294_v29, %v17088_v34  ;;  %v12115_v14 = vrot.slane %v12114_v8, 1  ;;  %v12126_v59 = vadd.f32 %v12125_v0, %v12124_v13  ;;  %v12079_v22 = vmul.f32 %v12063_v38, %v16899_v45 }
 0xb44   :  { %14301 = vrcp.f32 %v12038_v41  ;;  %v12080_v34 = vmul.f32 %v12064_v54, %v16896_v53  ;;  %v12081_v27 = vmul.f32 %v12065_v63, %v16907_v6  ;;  %v12110_v40 = vadd.f32 %v12109_v21, %v12108_v50 }
 0xb45   :  { %v12078_v39 = vmul.f32 %v12062_v18, %v16888_v28  ;;  %v12223_v25 = vsel %vm12222_vm7, %v12098_v46, %v12092_v58  ;;  %v12082_v26 = vmul.f32 %v12066_v17, %v16904_v23  ;;  %v12135_v33 = vrot.slane %v12079_v22, 4 }
 0xb46   :  { %v12225_v28 = vsel %vm12224_vm8, %v12104_v42, %v12223_v25  ;;  %v12141_v2 = vrot.slane %v12080_v34, 4  ;;  %v12147_v12 = vrot.slane %v12081_v27, 4  ;;  %v12127_v20 = vrot.slane %v12126_v59, 1 }
 0xb47   :  { %v12129_v47 = vrot.slane %v12078_v39, 4  ;;  %v12153_v15 = vrot.slane %v12082_v26, 4  ;;  %v12116_v53 = vadd.f32 %v12115_v14, %v12114_v8  ;;  %v12136_v43 = vadd.f32 %v12135_v33, %v12079_v22  ;;  %v14303_v14 = vld [vmem:[#allocation2 + $0x70] sm:$0xff] }
 0xb48   :  { %v14296_v32 = vpop.eup %14295  ;;  %v12142_v6 = vadd.f32 %v12141_v2, %v12080_v34  ;;  %v12148_v56 = vadd.f32 %v12147_v12, %v12081_v27  ;;  %v12121_v24 = vrot.slane %v12120_v52, 1  ;;  %v12128_v7 = vadd.f32 %v12127_v20, %v12126_v59  ;;  %v14304_v27 = vld [vmem:[#allocation2 + $0x78] sm:$0xff] }
 0xb49   :  { %v12130_v3 = vadd.f32 %v12129_v47, %v12078_v39  ;;  %v12067_v45 = vmul.f32 %v14296_v32, %v17101_v62  ;;  %v12154_v23 = vadd.f32 %v12153_v15, %v12082_v26  ;;  %v12137_v36 = vrot.slane %v12136_v43, 2 }
 0xb4a   :  { %v12143_v4 = vrot.slane %v12142_v6, 2  ;;  %v12149_v16 = vrot.slane %v12148_v56, 2  ;;  %v12227_v51 = vsel %vm12226_vm9, %v12110_v40, %v12225_v28  ;;  %v12122_v13 = vadd.f32 %v12121_v24, %v12120_v52 }
 0xb4b   :  { %v12131_v31 = vrot.slane %v12130_v3, 2  ;;  %v12083_v19 = vmul.f32 %v12067_v45, %v16914_v11  ;;  %v12229_v62 = vsel %vm12228_vm10, %v12116_v53, %v12227_v51  ;;  %v12138_v60 = vadd.f32 %v12137_v36, %v12136_v43 }
 0xb4c   :  { %v12144_v50 = vadd.f32 %v12143_v4, %v12142_v6  ;;  %v12150_v49 = vadd.f32 %v12149_v16, %v12148_v56  ;;  %v12155_v30 = vrot.slane %v12154_v23, 2  ;;  %v12231_v29 = vsel %vm12230_vm11, %v12122_v13, %v12229_v62 }
 0xb4d   :  { %v12132_v44 = vadd.f32 %v12131_v31, %v12130_v3  ;;  %v12159_v61 = vrot.slane %v12083_v19, 4  ;;  %v14298_v55 = vpop.eup %14297  ;;  %v12139_v57 = vrot.slane %v12138_v60, 1  ;;  %v12233_v38 = vsel %vm12232_vm12, %v12128_v7, %v12231_v29 }
 0xb4e   :  { %v12068_v35 = vmul.f32 %v14298_v55, %v17092_v37  ;;  %v12145_v58 = vrot.slane %v12144_v50, 1  ;;  %v14300_v8 = vpop.eup %14299  ;;  %v12151_v46 = vrot.slane %v12150_v49, 1  ;;  %v12156_v37 = vadd.f32 %v12155_v30, %v12154_v23 }
 0xb4f   :  { %v12133_v48 = vrot.slane %v12132_v44, 1  ;;  %v12160_v11 = vadd.f32 %v12159_v61, %v12083_v19  ;;  %v12069_v18 = vmul.f32 %v14300_v8, %v17108_v1  ;;  %v12140_v21 = vadd.f32 %v12139_v57, %v12138_v60 }
 0xb50   :  { %v12084_v42 = vmul.f32 %v12068_v35, %v16912_v9  ;;  %v12146_v54 = vadd.f32 %v12145_v58, %v12144_v50  ;;  %v12152_v22 = vadd.f32 %v12151_v46, %v12150_v49  ;;  %v12157_v25 = vrot.slane %v12156_v37, 1 }
 0xb51   :  { %v12134_v0 = vadd.f32 %v12133_v48, %v12132_v44  ;;  %v12161_v5 = vrot.slane %v12160_v11, 2  ;;  %v14302_v52 = vpop.eup %14301  ;;  %v12085_v59 = vmul.f32 %v14303_v14, %v12069_v18  ;;  %v12605_v44 = vld [vmem:[%s17180_s14] ss:$0 sm:$0xff] }
 0xb52   :  { %v12070_v39 = vmul.f32 %v14302_v52, %v17096_v10  ;;  %v12165_v17 = vrot.slane %v12084_v42, 4  ;;  %v12236_v34 = vsel %vm12222_vm7, %v12146_v54, %v12140_v21  ;;  %v12158_v3 = vadd.f32 %v12157_v25, %v12156_v37 }
 0xb53   :  { %v12235_v41 = vsel %vm12234_vm13, %v12134_v0, %v12233_v38  ;;  %v12162_v63 = vadd.f32 %v12161_v5, %v12160_v11  ;;  %v12171_v47 = vrot.slane %v12085_v59, 4  ;;  %v12237_v33 = vsel %vm12224_vm8, %v12152_v22, %v12236_v34 }
 0xb54   :  { %13920 = vmatprep.mubr.f32.mxu1 %v12235_v41  ;;  %v12086_v1 = vmul.f32 %v14304_v27, %v12070_v39  ;;  %v12166_v9 = vadd.f32 %v12165_v17, %v12084_v42  ;;  %v12238_v43 = vsel %vm12226_vm9, %v12158_v3, %v12237_v33 }
 0xb55   :  { %v12163_v40 = vrot.slane %v12162_v63, 1  ;;  %v12172_v32 = vadd.f32 %v12171_v47, %v12085_v59 }
 0xb56   :  { %v12167_v26 = vrot.slane %v12166_v9, 2  ;;  %v12177_v28 = vrot.slane %v12086_v1, 4 }
 0xb57   :  { %v12164_v2 = vadd.f32 %v12163_v40, %v12162_v63  ;;  %v12173_v10 = vrot.slane %v12172_v32, 2 }
 0xb58   :  { %v12168_v12 = vadd.f32 %v12167_v26, %v12166_v9  ;;  %v12178_v20 = vadd.f32 %v12177_v28, %v12086_v1 }
 0xb59   :  { %v12174_v15 = vadd.f32 %v12173_v10, %v12172_v32  ;;  %v12239_v24 = vsel %vm12228_vm10, %v12164_v2, %v12238_v43 }
 0xb5a   :  { %v12169_v45 = vrot.slane %v12168_v12, 1  ;;  %v12179_v53 = vrot.slane %v12178_v20, 2 }
 0xb5b   :  { %v12175_v6 = vrot.slane %v12174_v15, 1 }
 0xb5c   :  { %v12180_v56 = vadd.f32 %v12179_v53, %v12178_v20  ;;  %v12170_v31 = vadd.f32 %v12169_v45, %v12168_v12 }
 0xb5d   :  { %v12176_v19 = vadd.f32 %v12175_v6, %v12174_v15 }
 0xb5e   :  { %v12181_v23 = vrot.slane %v12180_v56, 1  ;;  %v12240_v36 = vsel %vm12230_vm11, %v12170_v31, %v12239_v24 }
 0xb5f   :  { %v12241_v16 = vsel %vm12232_vm12, %v12176_v19, %v12240_v36 }
 0xb60   :  { %v12182_v4 = vadd.f32 %v12181_v23, %v12180_v56 }
 0xb62   :  { %v12242_v7 = vsel %vm12234_vm13, %v12182_v4, %v12241_v16 }
 0xb63   :  { %13921 = vmatmul.mubr.f32.vlgmr.msra.gmra.mxu1 %v12242_v7 }
 0xc23   :  { %v13922_v51 = vpop.f32.mrf.mxu1 }
 0xc24   :  { %v12317_v61 = vadd.f32 %v13922_v51, %v12605_v44 }
 0xc25   :  { %v12311_v62 = vpop.f32.mrf.mxu1 }
 0xc26   :  { %12321 = vst [vmem:[%s17181_s15 + $0x8] sm:$0xff] %v12317_v61  ;;  %v12312_v60 = vadd.f32 %v12605_v44, %v12311_v62 }
 0xc28   :  { %12320 = vst [vmem:[%s17181_s15] sm:$0xff] %v12312_v60 }

</bundles_post_ra>
